<compile_context>
chip_gen: v5e
topology: v5e:2x2
jax: 0.10.0
libtpu: 0.0.40
codegen_flags: <defaults>
</compile_context>

<pallas_src>
import functools
import numpy as np
import jax
import jax.numpy as jnp
from jax.experimental import pallas as pl
from jax.experimental.pallas import tpu as pltpu

EPS = 1e-5  # nn.LayerNorm default eps


def _layernorm(x, gamma, beta):
    mu = jnp.mean(x, axis=-1, keepdims=True)
    var = jnp.mean((x - mu) ** 2, axis=-1, keepdims=True)
    return (x - mu) * jax.lax.rsqrt(var + EPS) * gamma + beta


def swin_block_kernel(x_ref, g1_ref, b1_ref, wqkv_ref, bqkv_ref, wo_ref, bo_ref,
                      rpb_ref, g2_ref, b2_ref, w1_ref, bb1_ref, w2_ref, bb2_ref,
                      o_ref, *, num_heads, head_dim, compute_dtype):
    """Fused Swin block for a batch of WB windows.

    x_ref   : (WB, N, C) raw (pre-norm) window tokens -> also the residual branch
    rpb_ref : (num_heads, N, N) relative position bias (already gathered)
    Computes the full block: x1 = x + proj(attn(LN1(x))); out = x1 + FFN(LN2(x1)).
    Softmax scale is already folded into wq/bq (see wrapper).
    """
    cdt = compute_dtype
    WB, N, C = x_ref.shape
    M = WB * N

    x_raw = x_ref[...].astype(jnp.float32).reshape(M, C)          # (M, C)
    xn = _layernorm(x_raw, g1_ref[...], b1_ref[...])

    # Fused QKV projection: one (M, C) @ (C, 3C) matmul (f32 accumulation).
    qkv = jnp.dot(xn.astype(cdt), wqkv_ref[...],
                  preferred_element_type=jnp.float32) + bqkv_ref[...]
    q = qkv[:, 0 * C:1 * C].reshape(WB, N, C)
    k = qkv[:, 1 * C:2 * C].reshape(WB, N, C)
    v = qkv[:, 2 * C:3 * C].reshape(WB, N, C)

    # Per-head attention, batched over the WB windows (single-batch-dim einsums).
    heads_out = []
    for h in range(num_heads):                                    # static unroll
        lo = h * head_dim
        hi = lo + head_dim
        qh = q[:, :, lo:hi].astype(cdt)                           # (WB, N, hd)
        kh = k[:, :, lo:hi].astype(cdt)
        vh = v[:, :, lo:hi].astype(cdt)
        s = jnp.einsum('wqd,wkd->wqk', qh, kh,
                       preferred_element_type=jnp.float32)        # (WB, N, N)
        s = s + rpb_ref[h][None]
        s = s - jnp.max(s, axis=-1, keepdims=True)
        p = jnp.exp(s)
        p = p * pl.reciprocal(jnp.sum(p, axis=-1, keepdims=True), approx=True)
        heads_out.append(jnp.einsum('wqk,wkd->wqd', p.astype(cdt), vh,
                                    preferred_element_type=jnp.float32))
    o = jnp.concatenate(heads_out, axis=-1).reshape(M, C)         # (M, C)

    # Single full-K output projection + first residual.
    attn = jnp.dot(o.astype(cdt), wo_ref[...],
                   preferred_element_type=jnp.float32) + bo_ref[...]
    x1 = attn + x_raw

    # norm2 + FFN (fc1 -> GELU -> fc2) + second residual, fused in the same kernel.
    xn2 = _layernorm(x1, g2_ref[...], b2_ref[...])
    hdn = jnp.dot(xn2.astype(cdt), w1_ref[...],
                  preferred_element_type=jnp.float32) + bb1_ref[...]
    # TODO(synk): PyTorch nn.GELU default is exact erf-based; tanh-approx GELU here.
    hdn = 0.5 * hdn * (1.0 + jnp.tanh(0.7978845608028654 *
                                      (hdn + 0.044715 * hdn * hdn * hdn)))
    y = jnp.dot(hdn.astype(cdt), w2_ref[...],
                preferred_element_type=jnp.float32) + bb2_ref[...]
    out = y + x1
    o_ref[...] = out.reshape(WB, N, C).astype(o_ref.dtype)


def _rep_spec(shape):
    # whole-array operand replicated across the 1-D grid
    return pl.BlockSpec(shape, lambda i, _s=shape: (0,) * len(_s))


def swin_block_forward(x, hw_shape, params, *, num_heads, window_size,
                       compute_dtype=jnp.float32):
    B, L, C = x.shape
    H, W = hw_shape
    ws = window_size
    N = ws * ws
    head_dim = C // num_heads
    assert H % ws == 0 and W % ws == 0 and H * W == L

    # --- parameter prep: fuse qkv, fold softmax scale into q (constants) ---
    scale = head_dim ** -0.5
    wqkv = jnp.concatenate([params["wq"] * scale, params["wk"], params["wv"]],
                           axis=1).astype(compute_dtype)           # (C, 3C)
    bqkv = jnp.concatenate([params["bq"] * scale, params["bk"], params["bv"]],
                           axis=1)                                  # (1, 3C), f32
    wo = params["wo"].astype(compute_dtype)
    w1 = params["w1"].astype(compute_dtype)
    w2 = params["w2"].astype(compute_dtype)
    hidden = params["w1"].shape[1]

    # --- window partition of raw x (norm1 applied per-token inside the kernel) ---
    xg = x.reshape(B, H // ws, ws, W // ws, ws, C)
    xg = xg.transpose(0, 1, 3, 2, 4, 5).reshape(-1, N, C)           # (n_win, N, C)
    n_win = xg.shape[0]

    # Windows per grid step: target >= 128 token rows so matmuls are MXU-shaped.
    WB = min(n_win, max(1, pl.cdiv(128, N)))
    while n_win % WB:
        WB -= 1
    # v7x has 2 TensorCores: if we can keep >=128 rows per block AND >=2 grid
    # steps, prefer that so both cores get work.
    if n_win // WB == 1 and n_win % 2 == 0 and (n_win // 2) * N >= 128:
        WB = n_win // 2
    grid = (n_win // WB,)

    out_w = pl.pallas_call(
        functools.partial(swin_block_kernel, num_heads=num_heads,
                          head_dim=head_dim, compute_dtype=compute_dtype),
        grid=grid,
        in_specs=[
            pl.BlockSpec((WB, N, C), lambda i: (i, 0, 0)),
            _rep_spec((1, C)), _rep_spec((1, C)),                   # norm1
            _rep_spec((C, 3 * C)), _rep_spec((1, 3 * C)),           # fused qkv
            _rep_spec((C, C)), _rep_spec((1, C)),                   # out proj
            _rep_spec((num_heads, N, N)),                           # rel pos bias
            _rep_spec((1, C)), _rep_spec((1, C)),                   # norm2
            _rep_spec((C, hidden)), _rep_spec((1, hidden)),         # fc1
            _rep_spec((hidden, C)), _rep_spec((1, C)),              # fc2
        ],
        out_specs=pl.BlockSpec((WB, N, C), lambda i: (i, 0, 0)),
        out_shape=jax.ShapeDtypeStruct((n_win, N, C), x.dtype),
        compiler_params=pltpu.CompilerParams(
            dimension_semantics=("parallel",)),
        # NOTE: at production Swin sizes (C>=384, hidden=4C) on v7x (64 MiB VMEM),
        # pass compute_dtype=bf16 and set vmem_limit_bytes explicitly; at these
        # toy sizes the defaults are fine.
    )(xg, params["g1"], params["b1"], wqkv, bqkv, wo, params["bo"],
      params["rpb"], params["g2"], params["b2"],
      w1, params["bb1"], w2, params["bb2"])

    # --- single window reverse of the fully-processed tokens ---
    y = out_w.reshape(B, H // ws, W // ws, ws, ws, C)
    y = y.transpose(0, 1, 3, 2, 4, 5).reshape(B, L, C)
    return y


# ----------------------------- reference (plain JAX) -----------------------------
def ref_forward(x, hw_shape, p, *, num_heads, window_size):
    B, L, C = x.shape
    H, W = hw_shape
    ws = window_size
    N = ws * ws
    hd = C // num_heads

    def ln(v, g, b):
        mu = v.mean(-1, keepdims=True)
        var = ((v - mu) ** 2).mean(-1, keepdims=True)
        return (v - mu) / jnp.sqrt(var + EPS) * g[0] + b[0]

    identity = x
    xn = ln(x, p["g1"], p["b1"])
    xg = xn.reshape(B, H // ws, ws, W // ws, ws, C).transpose(0, 1, 3, 2, 4, 5).reshape(-1, N, C)
    q = xg @ p["wq"] + p["bq"]
    k = xg @ p["wk"] + p["bk"]
    v = xg @ p["wv"] + p["bv"]

    def split(t):
        return t.reshape(-1, N, num_heads, hd).transpose(0, 2, 1, 3)

    q, k, v = split(q) * hd ** -0.5, split(k), split(v)
    attn = q @ k.transpose(0, 1, 3, 2) + p["rpb"][None]
    attn = jax.nn.softmax(attn, axis=-1)
    o = (attn @ v).transpose(0, 2, 1, 3).reshape(-1, N, C)
    o = o @ p["wo"] + p["bo"]
    o = o.reshape(B, H // ws, W // ws, ws, ws, C).transpose(0, 1, 3, 2, 4, 5).reshape(B, L, C)
    x1 = o + identity
    xn2 = ln(x1, p["g2"], p["b2"])
    h = xn2 @ p["w1"] + p["bb1"]
    h = 0.5 * h * (1.0 + jnp.tanh(0.7978845608028654 * (h + 0.044715 * h ** 3)))
    return h @ p["w2"] + p["bb2"] + x1


def make_params(key, C, num_heads, window_size, ffn_ratio):
    ws = window_size
    N = ws * ws
    hidden = int(C * ffn_ratio)
    ks = jax.random.split(key, 16)
    w = lambda k, s: jax.random.normal(k, s, jnp.float32) * 0.02

    # relative position index (as in WindowMSA)
    coords = np.stack(np.meshgrid(np.arange(ws), np.arange(ws), indexing="ij"))
    cf = coords.reshape(2, -1)
    rel = (cf[:, :, None] - cf[:, None, :]).transpose(1, 2, 0).astype(np.int64)
    rel[:, :, 0] += ws - 1
    rel[:, :, 1] += ws - 1
    rel[:, :, 0] *= 2 * ws - 1
    rel_index = rel.sum(-1)                                     # (N, N)
    table = w(ks[0], ((2 * ws - 1) ** 2, num_heads))            # bias table
    rpb = jnp.asarray(table)[jnp.asarray(rel_index).reshape(-1)]
    rpb = rpb.reshape(N, N, num_heads).transpose(2, 0, 1)       # (heads, N, N)

    return dict(
        g1=jnp.ones((1, C), jnp.float32), b1=jnp.zeros((1, C), jnp.float32),
        wq=w(ks[1], (C, C)), bq=w(ks[2], (1, C)),
        wk=w(ks[3], (C, C)), bk=w(ks[4], (1, C)),
        wv=w(ks[5], (C, C)), bv=w(ks[6], (1, C)),
        wo=w(ks[7], (C, C)), bo=w(ks[8], (1, C)),
        rpb=rpb,
        g2=jnp.ones((1, C), jnp.float32), b2=jnp.zeros((1, C), jnp.float32),
        w1=w(ks[9], (C, hidden)), bb1=w(ks[10], (1, hidden)),
        w2=w(ks[11], (hidden, C)), bb2=w(ks[12], (1, C)),
    )


if __name__ == "__main__":
    # small config: embed_dims=32, num_heads=4, window_size=4, shift=False, ffn_ratio=4
    B, H, W, C = 2, 8, 8, 32
    num_heads, window_size, ffn_ratio = 4, 4, 4.0
    L = H * W

    key = jax.random.PRNGKey(0)
    kx, kp = jax.random.split(key)
    x = jax.random.normal(kx, (B, L, C), jnp.float32)
    params = make_params(kp, C, num_heads, window_size, ffn_ratio)

    out = swin_block_forward(x, (H, W), params,
                             num_heads=num_heads, window_size=window_size,
                             compute_dtype=jnp.float32)  # bf16 recommended on v6e/v7x
    out = jax.block_until_ready(out)

    ref = ref_forward(x, (H, W), params, num_heads=num_heads, window_size=window_size)
    assert out.shape == (B, L, C)
    assert jnp.allclose(out, ref, atol=2e-3, rtol=2e-3), "Pallas output mismatch vs reference"
    print("KERNEL_OK")
</pallas_src>

<mosaic_0001>
module attributes {stable_mosaic.version = 11 : i64} {
  func.func @swin_block_kernel(%arg0: i32, %arg1: memref<8x16x32xf32, #tpu.memory_space<vmem>>, %arg2: memref<1x32xf32, #tpu.memory_space<vmem>>, %arg3: memref<1x32xf32, #tpu.memory_space<vmem>>, %arg4: memref<32x96xf32, #tpu.memory_space<vmem>>, %arg5: memref<1x96xf32, #tpu.memory_space<vmem>>, %arg6: memref<32x32xf32, #tpu.memory_space<vmem>>, %arg7: memref<1x32xf32, #tpu.memory_space<vmem>>, %arg8: memref<4x16x16xf32, #tpu.memory_space<vmem>>, %arg9: memref<1x32xf32, #tpu.memory_space<vmem>>, %arg10: memref<1x32xf32, #tpu.memory_space<vmem>>, %arg11: memref<32x128xf32, #tpu.memory_space<vmem>>, %arg12: memref<1x128xf32, #tpu.memory_space<vmem>>, %arg13: memref<128x32xf32, #tpu.memory_space<vmem>>, %arg14: memref<1x32xf32, #tpu.memory_space<vmem>>, %arg15: memref<8x16x32xf32, #tpu.memory_space<vmem>>) attributes {dimension_semantics = [#tpu.dimension_semantics<parallel>], iteration_bounds = array<i64: 1>, scalar_prefetch = 0 : i64, scratch_operands = 0 : i64, tpu.core_type = #tpu.core_type<tc>, window_params = [{transform_indices = @transform_0, window_bounds = array<i64: 8, 16, 32>}, {pipeline_mode = #tpu.pipeline_mode<synchronous>, transform_indices = @transform_1, window_bounds = array<i64: 1, 32>}, {pipeline_mode = #tpu.pipeline_mode<synchronous>, transform_indices = @transform_2, window_bounds = array<i64: 1, 32>}, {pipeline_mode = #tpu.pipeline_mode<synchronous>, transform_indices = @transform_3, window_bounds = array<i64: 32, 96>}, {pipeline_mode = #tpu.pipeline_mode<synchronous>, transform_indices = @transform_4, window_bounds = array<i64: 1, 96>}, {pipeline_mode = #tpu.pipeline_mode<synchronous>, transform_indices = @transform_5, window_bounds = array<i64: 32, 32>}, {pipeline_mode = #tpu.pipeline_mode<synchronous>, transform_indices = @transform_6, window_bounds = array<i64: 1, 32>}, {pipeline_mode = #tpu.pipeline_mode<synchronous>, transform_indices = @transform_7, window_bounds = array<i64: 4, 16, 16>}, {pipeline_mode = #tpu.pipeline_mode<synchronous>, transform_indices = @transform_8, window_bounds = array<i64: 1, 32>}, {pipeline_mode = #tpu.pipeline_mode<synchronous>, transform_indices = @transform_9, window_bounds = array<i64: 1, 32>}, {pipeline_mode = #tpu.pipeline_mode<synchronous>, transform_indices = @transform_10, window_bounds = array<i64: 32, 128>}, {pipeline_mode = #tpu.pipeline_mode<synchronous>, transform_indices = @transform_11, window_bounds = array<i64: 1, 128>}, {pipeline_mode = #tpu.pipeline_mode<synchronous>, transform_indices = @transform_12, window_bounds = array<i64: 128, 32>}, {pipeline_mode = #tpu.pipeline_mode<synchronous>, transform_indices = @transform_13, window_bounds = array<i64: 1, 32>}, {transform_indices = @transform_14, window_bounds = array<i64: 8, 16, 32>}]} {
    %c0 = arith.constant 0 : index
    %c0_0 = arith.constant 0 : index
    %c0_1 = arith.constant 0 : index
    %0 = vector.load %arg1[%c0, %c0_0, %c0_1] : memref<8x16x32xf32, #tpu.memory_space<vmem>>, vector<8x16x32xf32>
    %1 = vector.shape_cast %0 : vector<8x16x32xf32> to vector<128x32xf32>
    %c0_2 = arith.constant 0 : index
    %c0_3 = arith.constant 0 : index
    %2 = vector.load %arg2[%c0_2, %c0_3] : memref<1x32xf32, #tpu.memory_space<vmem>>, vector<1x32xf32>
    %c0_4 = arith.constant 0 : index
    %c0_5 = arith.constant 0 : index
    %3 = vector.load %arg3[%c0_4, %c0_5] : memref<1x32xf32, #tpu.memory_space<vmem>>, vector<1x32xf32>
    %cst = arith.constant dense<0.000000e+00> : vector<128xf32>
    %4 = vector.multi_reduction <add>, %1, %cst [1] : vector<128x32xf32> to vector<128xf32>
    %5 = vector.shape_cast %4 : vector<128xf32> to vector<128x1xf32>
    %cst_6 = arith.constant 3.200000e+01 : f32
    %6 = vector.broadcast %cst_6 : f32 to vector<128x1xf32>
    %7 = arith.divf %5, %6 : vector<128x1xf32>
    %8 = vector.broadcast %7 : vector<128x1xf32> to vector<128x32xf32>
    %9 = arith.subf %1, %8 : vector<128x32xf32>
    %10 = arith.mulf %9, %9 : vector<128x32xf32>
    %cst_7 = arith.constant dense<0.000000e+00> : vector<128xf32>
    %11 = vector.multi_reduction <add>, %10, %cst_7 [1] : vector<128x32xf32> to vector<128xf32>
    %12 = vector.shape_cast %11 : vector<128xf32> to vector<128x1xf32>
    %cst_8 = arith.constant 3.200000e+01 : f32
    %13 = vector.broadcast %cst_8 : f32 to vector<128x1xf32>
    %14 = arith.divf %12, %13 : vector<128x1xf32>
    %15 = vector.broadcast %7 : vector<128x1xf32> to vector<128x32xf32>
    %16 = arith.subf %1, %15 : vector<128x32xf32>
    %cst_9 = arith.constant 9.99999974E-6 : f32
    %17 = vector.broadcast %cst_9 : f32 to vector<128x1xf32>
    %18 = arith.addf %14, %17 : vector<128x1xf32>
    %19 = math.rsqrt %18 : vector<128x1xf32>
    %20 = vector.broadcast %19 : vector<128x1xf32> to vector<128x32xf32>
    %21 = arith.mulf %16, %20 : vector<128x32xf32>
    %22 = vector.broadcast %2 : vector<1x32xf32> to vector<128x32xf32>
    %23 = arith.mulf %21, %22 : vector<128x32xf32>
    %24 = vector.broadcast %3 : vector<1x32xf32> to vector<128x32xf32>
    %25 = arith.addf %23, %24 : vector<128x32xf32>
    %c0_10 = arith.constant 0 : index
    %c0_11 = arith.constant 0 : index
    %26 = vector.load %arg4[%c0_10, %c0_11] : memref<32x96xf32, #tpu.memory_space<vmem>>, vector<32x96xf32>
    %cst_12 = arith.constant dense<0.000000e+00> : vector<128x96xf32>
    %27 = tpu.matmul %25, %26, %cst_12 {dimension_numbers = #tpu.dot_dimension_numbers<[1], [0], [0], [1], [0, 0, 1, 1], [], []>} : vector<128x32xf32>, vector<32x96xf32>, vector<128x96xf32> -> vector<128x96xf32>
    %c0_13 = arith.constant 0 : index
    %c0_14 = arith.constant 0 : index
    %28 = vector.load %arg5[%c0_13, %c0_14] : memref<1x96xf32, #tpu.memory_space<vmem>>, vector<1x96xf32>
    %29 = vector.broadcast %28 : vector<1x96xf32> to vector<128x96xf32>
    %30 = arith.addf %27, %29 : vector<128x96xf32>
    %31 = vector.extract_strided_slice %30 {offsets = [0, 0], sizes = [128, 32], strides = [1, 1]} : vector<128x96xf32> to vector<128x32xf32>
    %32 = vector.shape_cast %31 : vector<128x32xf32> to vector<8x16x32xf32>
    %33 = vector.extract_strided_slice %30 {offsets = [0, 32], sizes = [128, 32], strides = [1, 1]} : vector<128x96xf32> to vector<128x32xf32>
    %34 = vector.shape_cast %33 : vector<128x32xf32> to vector<8x16x32xf32>
    %35 = vector.extract_strided_slice %30 {offsets = [0, 64], sizes = [128, 32], strides = [1, 1]} : vector<128x96xf32> to vector<128x32xf32>
    %36 = vector.shape_cast %35 : vector<128x32xf32> to vector<8x16x32xf32>
    %37 = vector.extract_strided_slice %32 {offsets = [0, 0, 0], sizes = [8, 16, 8], strides = [1, 1, 1]} : vector<8x16x32xf32> to vector<8x16x8xf32>
    %38 = vector.extract_strided_slice %34 {offsets = [0, 0, 0], sizes = [8, 16, 8], strides = [1, 1, 1]} : vector<8x16x32xf32> to vector<8x16x8xf32>
    %39 = vector.extract_strided_slice %36 {offsets = [0, 0, 0], sizes = [8, 16, 8], strides = [1, 1, 1]} : vector<8x16x32xf32> to vector<8x16x8xf32>
    "tpu.trace_start"() <{level = 10 : i32, message = "wqd,wkd->wqk"}> : () -> ()
    %cst_15 = arith.constant dense<0.000000e+00> : vector<8x16x16xf32>
    %40 = tpu.matmul %37, %38, %cst_15 {dimension_numbers = #tpu.dot_dimension_numbers<[2], [2], [1], [1], [0, 0, 0, 1, 1, 1], [0], [0]>} : vector<8x16x8xf32>, vector<8x16x8xf32>, vector<8x16x16xf32> -> vector<8x16x16xf32>
    "tpu.trace_stop"() : () -> ()
    %c0_16 = arith.constant 0 : index
    %c0_17 = arith.constant 0 : index
    %c0_18 = arith.constant 0 : index
    %41 = vector.load %arg8[%c0_16, %c0_17, %c0_18] : memref<4x16x16xf32, #tpu.memory_space<vmem>>, vector<1x16x16xf32>
    %42 = vector.shape_cast %41 : vector<1x16x16xf32> to vector<16x16xf32>
    %43 = vector.shape_cast %42 : vector<16x16xf32> to vector<1x16x16xf32>
    %44 = vector.broadcast %43 : vector<1x16x16xf32> to vector<8x16x16xf32>
    %45 = arith.addf %40, %44 : vector<8x16x16xf32>
    %cst_19 = arith.constant dense<0xFF800000> : vector<8x16xf32>
    %46 = vector.multi_reduction <maximumf>, %45, %cst_19 [2] : vector<8x16x16xf32> to vector<8x16xf32>
    %47 = vector.shape_cast %46 : vector<8x16xf32> to vector<8x16x1xf32>
    %48 = vector.broadcast %47 : vector<8x16x1xf32> to vector<8x16x16xf32>
    %49 = arith.subf %45, %48 : vector<8x16x16xf32>
    %50 = math.exp %49 : vector<8x16x16xf32>
    %cst_20 = arith.constant dense<0.000000e+00> : vector<8x16xf32>
    %51 = vector.multi_reduction <add>, %50, %cst_20 [2] : vector<8x16x16xf32> to vector<8x16xf32>
    %52 = vector.shape_cast %51 : vector<8x16xf32> to vector<8x16x1xf32>
    %53 = tpu.reciprocal %52 {approx = true} : vector<8x16x1xf32> -> vector<8x16x1xf32>
    %54 = vector.broadcast %53 : vector<8x16x1xf32> to vector<8x16x16xf32>
    %55 = arith.mulf %50, %54 : vector<8x16x16xf32>
    "tpu.trace_start"() <{level = 10 : i32, message = "wqk,wkd->wqd"}> : () -> ()
    %cst_21 = arith.constant dense<0.000000e+00> : vector<8x16x8xf32>
    %56 = tpu.matmul %55, %39, %cst_21 {dimension_numbers = #tpu.dot_dimension_numbers<[2], [1], [1], [2], [0, 0, 0, 1, 1, 2], [0], [0]>} : vector<8x16x16xf32>, vector<8x16x8xf32>, vector<8x16x8xf32> -> vector<8x16x8xf32>
    "tpu.trace_stop"() : () -> ()
    %57 = vector.extract_strided_slice %32 {offsets = [0, 0, 8], sizes = [8, 16, 8], strides = [1, 1, 1]} : vector<8x16x32xf32> to vector<8x16x8xf32>
    %58 = vector.extract_strided_slice %34 {offsets = [0, 0, 8], sizes = [8, 16, 8], strides = [1, 1, 1]} : vector<8x16x32xf32> to vector<8x16x8xf32>
    %59 = vector.extract_strided_slice %36 {offsets = [0, 0, 8], sizes = [8, 16, 8], strides = [1, 1, 1]} : vector<8x16x32xf32> to vector<8x16x8xf32>
    "tpu.trace_start"() <{level = 10 : i32, message = "wqd,wkd->wqk"}> : () -> ()
    %cst_22 = arith.constant dense<0.000000e+00> : vector<8x16x16xf32>
    %60 = tpu.matmul %57, %58, %cst_22 {dimension_numbers = #tpu.dot_dimension_numbers<[2], [2], [1], [1], [0, 0, 0, 1, 1, 1], [0], [0]>} : vector<8x16x8xf32>, vector<8x16x8xf32>, vector<8x16x16xf32> -> vector<8x16x16xf32>
    "tpu.trace_stop"() : () -> ()
    %c1 = arith.constant 1 : index
    %c0_23 = arith.constant 0 : index
    %c0_24 = arith.constant 0 : index
    %61 = vector.load %arg8[%c1, %c0_23, %c0_24] : memref<4x16x16xf32, #tpu.memory_space<vmem>>, vector<1x16x16xf32>
    %62 = vector.shape_cast %61 : vector<1x16x16xf32> to vector<16x16xf32>
    %63 = vector.shape_cast %62 : vector<16x16xf32> to vector<1x16x16xf32>
    %64 = vector.broadcast %63 : vector<1x16x16xf32> to vector<8x16x16xf32>
    %65 = arith.addf %60, %64 : vector<8x16x16xf32>
    %cst_25 = arith.constant dense<0xFF800000> : vector<8x16xf32>
    %66 = vector.multi_reduction <maximumf>, %65, %cst_25 [2] : vector<8x16x16xf32> to vector<8x16xf32>
    %67 = vector.shape_cast %66 : vector<8x16xf32> to vector<8x16x1xf32>
    %68 = vector.broadcast %67 : vector<8x16x1xf32> to vector<8x16x16xf32>
    %69 = arith.subf %65, %68 : vector<8x16x16xf32>
    %70 = math.exp %69 : vector<8x16x16xf32>
    %cst_26 = arith.constant dense<0.000000e+00> : vector<8x16xf32>
    %71 = vector.multi_reduction <add>, %70, %cst_26 [2] : vector<8x16x16xf32> to vector<8x16xf32>
    %72 = vector.shape_cast %71 : vector<8x16xf32> to vector<8x16x1xf32>
    %73 = tpu.reciprocal %72 {approx = true} : vector<8x16x1xf32> -> vector<8x16x1xf32>
    %74 = vector.broadcast %73 : vector<8x16x1xf32> to vector<8x16x16xf32>
    %75 = arith.mulf %70, %74 : vector<8x16x16xf32>
    "tpu.trace_start"() <{level = 10 : i32, message = "wqk,wkd->wqd"}> : () -> ()
    %cst_27 = arith.constant dense<0.000000e+00> : vector<8x16x8xf32>
    %76 = tpu.matmul %75, %59, %cst_27 {dimension_numbers = #tpu.dot_dimension_numbers<[2], [1], [1], [2], [0, 0, 0, 1, 1, 2], [0], [0]>} : vector<8x16x16xf32>, vector<8x16x8xf32>, vector<8x16x8xf32> -> vector<8x16x8xf32>
    "tpu.trace_stop"() : () -> ()
    %77 = vector.extract_strided_slice %32 {offsets = [0, 0, 16], sizes = [8, 16, 8], strides = [1, 1, 1]} : vector<8x16x32xf32> to vector<8x16x8xf32>
    %78 = vector.extract_strided_slice %34 {offsets = [0, 0, 16], sizes = [8, 16, 8], strides = [1, 1, 1]} : vector<8x16x32xf32> to vector<8x16x8xf32>
    %79 = vector.extract_strided_slice %36 {offsets = [0, 0, 16], sizes = [8, 16, 8], strides = [1, 1, 1]} : vector<8x16x32xf32> to vector<8x16x8xf32>
    "tpu.trace_start"() <{level = 10 : i32, message = "wqd,wkd->wqk"}> : () -> ()
    %cst_28 = arith.constant dense<0.000000e+00> : vector<8x16x16xf32>
    %80 = tpu.matmul %77, %78, %cst_28 {dimension_numbers = #tpu.dot_dimension_numbers<[2], [2], [1], [1], [0, 0, 0, 1, 1, 1], [0], [0]>} : vector<8x16x8xf32>, vector<8x16x8xf32>, vector<8x16x16xf32> -> vector<8x16x16xf32>
    "tpu.trace_stop"() : () -> ()
    %c2 = arith.constant 2 : index
    %c0_29 = arith.constant 0 : index
    %c0_30 = arith.constant 0 : index
    %81 = vector.load %arg8[%c2, %c0_29, %c0_30] : memref<4x16x16xf32, #tpu.memory_space<vmem>>, vector<1x16x16xf32>
    %82 = vector.shape_cast %81 : vector<1x16x16xf32> to vector<16x16xf32>
    %83 = vector.shape_cast %82 : vector<16x16xf32> to vector<1x16x16xf32>
    %84 = vector.broadcast %83 : vector<1x16x16xf32> to vector<8x16x16xf32>
    %85 = arith.addf %80, %84 : vector<8x16x16xf32>
    %cst_31 = arith.constant dense<0xFF800000> : vector<8x16xf32>
    %86 = vector.multi_reduction <maximumf>, %85, %cst_31 [2] : vector<8x16x16xf32> to vector<8x16xf32>
    %87 = vector.shape_cast %86 : vector<8x16xf32> to vector<8x16x1xf32>
    %88 = vector.broadcast %87 : vector<8x16x1xf32> to vector<8x16x16xf32>
    %89 = arith.subf %85, %88 : vector<8x16x16xf32>
    %90 = math.exp %89 : vector<8x16x16xf32>
    %cst_32 = arith.constant dense<0.000000e+00> : vector<8x16xf32>
    %91 = vector.multi_reduction <add>, %90, %cst_32 [2] : vector<8x16x16xf32> to vector<8x16xf32>
    %92 = vector.shape_cast %91 : vector<8x16xf32> to vector<8x16x1xf32>
    %93 = tpu.reciprocal %92 {approx = true} : vector<8x16x1xf32> -> vector<8x16x1xf32>
    %94 = vector.broadcast %93 : vector<8x16x1xf32> to vector<8x16x16xf32>
    %95 = arith.mulf %90, %94 : vector<8x16x16xf32>
    "tpu.trace_start"() <{level = 10 : i32, message = "wqk,wkd->wqd"}> : () -> ()
    %cst_33 = arith.constant dense<0.000000e+00> : vector<8x16x8xf32>
    %96 = tpu.matmul %95, %79, %cst_33 {dimension_numbers = #tpu.dot_dimension_numbers<[2], [1], [1], [2], [0, 0, 0, 1, 1, 2], [0], [0]>} : vector<8x16x16xf32>, vector<8x16x8xf32>, vector<8x16x8xf32> -> vector<8x16x8xf32>
    "tpu.trace_stop"() : () -> ()
    %97 = vector.extract_strided_slice %32 {offsets = [0, 0, 24], sizes = [8, 16, 8], strides = [1, 1, 1]} : vector<8x16x32xf32> to vector<8x16x8xf32>
    %98 = vector.extract_strided_slice %34 {offsets = [0, 0, 24], sizes = [8, 16, 8], strides = [1, 1, 1]} : vector<8x16x32xf32> to vector<8x16x8xf32>
    %99 = vector.extract_strided_slice %36 {offsets = [0, 0, 24], sizes = [8, 16, 8], strides = [1, 1, 1]} : vector<8x16x32xf32> to vector<8x16x8xf32>
    "tpu.trace_start"() <{level = 10 : i32, message = "wqd,wkd->wqk"}> : () -> ()
    %cst_34 = arith.constant dense<0.000000e+00> : vector<8x16x16xf32>
    %100 = tpu.matmul %97, %98, %cst_34 {dimension_numbers = #tpu.dot_dimension_numbers<[2], [2], [1], [1], [0, 0, 0, 1, 1, 1], [0], [0]>} : vector<8x16x8xf32>, vector<8x16x8xf32>, vector<8x16x16xf32> -> vector<8x16x16xf32>
    "tpu.trace_stop"() : () -> ()
    %c3 = arith.constant 3 : index
    %c0_35 = arith.constant 0 : index
    %c0_36 = arith.constant 0 : index
    %101 = vector.load %arg8[%c3, %c0_35, %c0_36] : memref<4x16x16xf32, #tpu.memory_space<vmem>>, vector<1x16x16xf32>
    %102 = vector.shape_cast %101 : vector<1x16x16xf32> to vector<16x16xf32>
    %103 = vector.shape_cast %102 : vector<16x16xf32> to vector<1x16x16xf32>
    %104 = vector.broadcast %103 : vector<1x16x16xf32> to vector<8x16x16xf32>
    %105 = arith.addf %100, %104 : vector<8x16x16xf32>
    %cst_37 = arith.constant dense<0xFF800000> : vector<8x16xf32>
    %106 = vector.multi_reduction <maximumf>, %105, %cst_37 [2] : vector<8x16x16xf32> to vector<8x16xf32>
    %107 = vector.shape_cast %106 : vector<8x16xf32> to vector<8x16x1xf32>
    %108 = vector.broadcast %107 : vector<8x16x1xf32> to vector<8x16x16xf32>
    %109 = arith.subf %105, %108 : vector<8x16x16xf32>
    %110 = math.exp %109 : vector<8x16x16xf32>
    %cst_38 = arith.constant dense<0.000000e+00> : vector<8x16xf32>
    %111 = vector.multi_reduction <add>, %110, %cst_38 [2] : vector<8x16x16xf32> to vector<8x16xf32>
    %112 = vector.shape_cast %111 : vector<8x16xf32> to vector<8x16x1xf32>
    %113 = tpu.reciprocal %112 {approx = true} : vector<8x16x1xf32> -> vector<8x16x1xf32>
    %114 = vector.broadcast %113 : vector<8x16x1xf32> to vector<8x16x16xf32>
    %115 = arith.mulf %110, %114 : vector<8x16x16xf32>
    "tpu.trace_start"() <{level = 10 : i32, message = "wqk,wkd->wqd"}> : () -> ()
    %cst_39 = arith.constant dense<0.000000e+00> : vector<8x16x8xf32>
    %116 = tpu.matmul %115, %99, %cst_39 {dimension_numbers = #tpu.dot_dimension_numbers<[2], [1], [1], [2], [0, 0, 0, 1, 1, 2], [0], [0]>} : vector<8x16x16xf32>, vector<8x16x8xf32>, vector<8x16x8xf32> -> vector<8x16x8xf32>
    "tpu.trace_stop"() : () -> ()
    %117 = tpu.concatenate %56, %76, %96, %116 in 2 : vector<8x16x8xf32>, vector<8x16x8xf32>, vector<8x16x8xf32>, vector<8x16x8xf32> -> vector<8x16x32xf32>
    %118 = vector.shape_cast %117 : vector<8x16x32xf32> to vector<128x32xf32>
    %c0_40 = arith.constant 0 : index
    %c0_41 = arith.constant 0 : index
    %119 = vector.load %arg6[%c0_40, %c0_41] : memref<32x32xf32, #tpu.memory_space<vmem>>, vector<32x32xf32>
    %cst_42 = arith.constant dense<0.000000e+00> : vector<128x32xf32>
    %120 = tpu.matmul %118, %119, %cst_42 {dimension_numbers = #tpu.dot_dimension_numbers<[1], [0], [0], [1], [0, 0, 1, 1], [], []>} : vector<128x32xf32>, vector<32x32xf32>, vector<128x32xf32> -> vector<128x32xf32>
    %c0_43 = arith.constant 0 : index
    %c0_44 = arith.constant 0 : index
    %121 = vector.load %arg7[%c0_43, %c0_44] : memref<1x32xf32, #tpu.memory_space<vmem>>, vector<1x32xf32>
    %122 = vector.broadcast %121 : vector<1x32xf32> to vector<128x32xf32>
    %123 = arith.addf %120, %122 : vector<128x32xf32>
    %124 = arith.addf %123, %1 : vector<128x32xf32>
    %c0_45 = arith.constant 0 : index
    %c0_46 = arith.constant 0 : index
    %125 = vector.load %arg9[%c0_45, %c0_46] : memref<1x32xf32, #tpu.memory_space<vmem>>, vector<1x32xf32>
    %c0_47 = arith.constant 0 : index
    %c0_48 = arith.constant 0 : index
    %126 = vector.load %arg10[%c0_47, %c0_48] : memref<1x32xf32, #tpu.memory_space<vmem>>, vector<1x32xf32>
    %cst_49 = arith.constant dense<0.000000e+00> : vector<128xf32>
    %127 = vector.multi_reduction <add>, %124, %cst_49 [1] : vector<128x32xf32> to vector<128xf32>
    %128 = vector.shape_cast %127 : vector<128xf32> to vector<128x1xf32>
    %cst_50 = arith.constant 3.200000e+01 : f32
    %129 = vector.broadcast %cst_50 : f32 to vector<128x1xf32>
    %130 = arith.divf %128, %129 : vector<128x1xf32>
    %131 = vector.broadcast %130 : vector<128x1xf32> to vector<128x32xf32>
    %132 = arith.subf %124, %131 : vector<128x32xf32>
    %133 = arith.mulf %132, %132 : vector<128x32xf32>
    %cst_51 = arith.constant dense<0.000000e+00> : vector<128xf32>
    %134 = vector.multi_reduction <add>, %133, %cst_51 [1] : vector<128x32xf32> to vector<128xf32>
    %135 = vector.shape_cast %134 : vector<128xf32> to vector<128x1xf32>
    %cst_52 = arith.constant 3.200000e+01 : f32
    %136 = vector.broadcast %cst_52 : f32 to vector<128x1xf32>
    %137 = arith.divf %135, %136 : vector<128x1xf32>
    %138 = vector.broadcast %130 : vector<128x1xf32> to vector<128x32xf32>
    %139 = arith.subf %124, %138 : vector<128x32xf32>
    %cst_53 = arith.constant 9.99999974E-6 : f32
    %140 = vector.broadcast %cst_53 : f32 to vector<128x1xf32>
    %141 = arith.addf %137, %140 : vector<128x1xf32>
    %142 = math.rsqrt %141 : vector<128x1xf32>
    %143 = vector.broadcast %142 : vector<128x1xf32> to vector<128x32xf32>
    %144 = arith.mulf %139, %143 : vector<128x32xf32>
    %145 = vector.broadcast %125 : vector<1x32xf32> to vector<128x32xf32>
    %146 = arith.mulf %144, %145 : vector<128x32xf32>
    %147 = vector.broadcast %126 : vector<1x32xf32> to vector<128x32xf32>
    %148 = arith.addf %146, %147 : vector<128x32xf32>
    %c0_54 = arith.constant 0 : index
    %c0_55 = arith.constant 0 : index
    %149 = vector.load %arg11[%c0_54, %c0_55] : memref<32x128xf32, #tpu.memory_space<vmem>>, vector<32x128xf32>
    %cst_56 = arith.constant dense<0.000000e+00> : vector<128x128xf32>
    %150 = tpu.matmul %148, %149, %cst_56 {dimension_numbers = #tpu.dot_dimension_numbers<[1], [0], [0], [1], [0, 0, 1, 1], [], []>} : vector<128x32xf32>, vector<32x128xf32>, vector<128x128xf32> -> vector<128x128xf32>
    %c0_57 = arith.constant 0 : index
    %c0_58 = arith.constant 0 : index
    %151 = vector.load %arg12[%c0_57, %c0_58] : memref<1x128xf32, #tpu.memory_space<vmem>>, vector<1x128xf32>
    %152 = vector.broadcast %151 : vector<1x128xf32> to vector<128x128xf32>
    %153 = arith.addf %150, %152 : vector<128x128xf32>
    %cst_59 = arith.constant 5.000000e-01 : f32
    %154 = vector.broadcast %cst_59 : f32 to vector<128x128xf32>
    %155 = arith.mulf %154, %153 : vector<128x128xf32>
    %cst_60 = arith.constant 4.471500e-02 : f32
    %156 = vector.broadcast %cst_60 : f32 to vector<128x128xf32>
    %157 = arith.mulf %156, %153 : vector<128x128xf32>
    %158 = arith.mulf %157, %153 : vector<128x128xf32>
    %159 = arith.mulf %158, %153 : vector<128x128xf32>
    %160 = arith.addf %153, %159 : vector<128x128xf32>
    %cst_61 = arith.constant 0.797884583 : f32
    %161 = vector.broadcast %cst_61 : f32 to vector<128x128xf32>
    %162 = arith.mulf %161, %160 : vector<128x128xf32>
    %163 = math.tanh %162 : vector<128x128xf32>
    %cst_62 = arith.constant 1.000000e+00 : f32
    %164 = vector.broadcast %cst_62 : f32 to vector<128x128xf32>
    %165 = arith.addf %164, %163 : vector<128x128xf32>
    %166 = arith.mulf %155, %165 : vector<128x128xf32>
    %c0_63 = arith.constant 0 : index
    %c0_64 = arith.constant 0 : index
    %167 = vector.load %arg13[%c0_63, %c0_64] : memref<128x32xf32, #tpu.memory_space<vmem>>, vector<128x32xf32>
    %cst_65 = arith.constant dense<0.000000e+00> : vector<128x32xf32>
    %168 = tpu.matmul %166, %167, %cst_65 {dimension_numbers = #tpu.dot_dimension_numbers<[1], [0], [0], [1], [0, 0, 1, 1], [], []>} : vector<128x128xf32>, vector<128x32xf32>, vector<128x32xf32> -> vector<128x32xf32>
    %c0_66 = arith.constant 0 : index
    %c0_67 = arith.constant 0 : index
    %169 = vector.load %arg14[%c0_66, %c0_67] : memref<1x32xf32, #tpu.memory_space<vmem>>, vector<1x32xf32>
    %170 = vector.broadcast %169 : vector<1x32xf32> to vector<128x32xf32>
    %171 = arith.addf %168, %170 : vector<128x32xf32>
    %172 = arith.addf %171, %124 : vector<128x32xf32>
    %173 = vector.shape_cast %172 : vector<128x32xf32> to vector<8x16x32xf32>
    %c0_68 = arith.constant 0 : index
    %c0_69 = arith.constant 0 : index
    %c0_70 = arith.constant 0 : index
    %174 = vector.load %arg15[%c0_68, %c0_69, %c0_70] : memref<8x16x32xf32, #tpu.memory_space<vmem>>, vector<8x16x32xf32>
    tpu.vector_store %arg15[%c0_68, %c0_69, %c0_70], %173 {strides = array<i32>} : memref<8x16x32xf32, #tpu.memory_space<vmem>>, vector<8x16x32xf32>,
    return
  }
  func.func @transform_0(%arg0: i32) -> (i32, i32, i32) {
    %c0_i32 = arith.constant 0 : i32
    %c0_i32_0 = arith.constant 0 : i32
    %c0_i32_1 = arith.constant 0 : i32
    return %arg0, %c0_i32, %c0_i32_0 : i32, i32, i32
  }
  func.func @transform_1(%arg0: i32) -> (i32, i32) {
    %c0_i32 = arith.constant 0 : i32
    %c0_i32_0 = arith.constant 0 : i32
    %c0_i32_1 = arith.constant 0 : i32
    return %c0_i32, %c0_i32_0 : i32, i32
  }
  func.func @transform_2(%arg0: i32) -> (i32, i32) {
    %c0_i32 = arith.constant 0 : i32
    %c0_i32_0 = arith.constant 0 : i32
    %c0_i32_1 = arith.constant 0 : i32
    return %c0_i32, %c0_i32_0 : i32, i32
  }
  func.func @transform_3(%arg0: i32) -> (i32, i32) {
    %c0_i32 = arith.constant 0 : i32
    %c0_i32_0 = arith.constant 0 : i32
    %c0_i32_1 = arith.constant 0 : i32
    return %c0_i32, %c0_i32_0 : i32, i32
  }
  func.func @transform_4(%arg0: i32) -> (i32, i32) {
    %c0_i32 = arith.constant 0 : i32
    %c0_i32_0 = arith.constant 0 : i32
    %c0_i32_1 = arith.constant 0 : i32
    return %c0_i32, %c0_i32_0 : i32, i32
  }
  func.func @transform_5(%arg0: i32) -> (i32, i32) {
    %c0_i32 = arith.constant 0 : i32
    %c0_i32_0 = arith.constant 0 : i32
    %c0_i32_1 = arith.constant 0 : i32
    return %c0_i32, %c0_i32_0 : i32, i32
  }
  func.func @transform_6(%arg0: i32) -> (i32, i32) {
    %c0_i32 = arith.constant 0 : i32
    %c0_i32_0 = arith.constant 0 : i32
    %c0_i32_1 = arith.constant 0 : i32
    return %c0_i32, %c0_i32_0 : i32, i32
  }
  func.func @transform_7(%arg0: i32) -> (i32, i32, i32) {
    %c0_i32 = arith.constant 0 : i32
    %c0_i32_0 = arith.constant 0 : i32
    %c0_i32_1 = arith.constant 0 : i32
    %c0_i32_2 = arith.constant 0 : i32
    return %c0_i32, %c0_i32_0, %c0_i32_1 : i32, i32, i32
  }
  func.func @transform_8(%arg0: i32) -> (i32, i32) {
    %c0_i32 = arith.constant 0 : i32
    %c0_i32_0 = arith.constant 0 : i32
    %c0_i32_1 = arith.constant 0 : i32
    return %c0_i32, %c0_i32_0 : i32, i32
  }
  func.func @transform_9(%arg0: i32) -> (i32, i32) {
    %c0_i32 = arith.constant 0 : i32
    %c0_i32_0 = arith.constant 0 : i32
    %c0_i32_1 = arith.constant 0 : i32
    return %c0_i32, %c0_i32_0 : i32, i32
  }
  func.func @transform_10(%arg0: i32) -> (i32, i32) {
    %c0_i32 = arith.constant 0 : i32
    %c0_i32_0 = arith.constant 0 : i32
    %c0_i32_1 = arith.constant 0 : i32
    return %c0_i32, %c0_i32_0 : i32, i32
  }
  func.func @transform_11(%arg0: i32) -> (i32, i32) {
    %c0_i32 = arith.constant 0 : i32
    %c0_i32_0 = arith.constant 0 : i32
    %c0_i32_1 = arith.constant 0 : i32
    return %c0_i32, %c0_i32_0 : i32, i32
  }
  func.func @transform_12(%arg0: i32) -> (i32, i32) {
    %c0_i32 = arith.constant 0 : i32
    %c0_i32_0 = arith.constant 0 : i32
    %c0_i32_1 = arith.constant 0 : i32
    return %c0_i32, %c0_i32_0 : i32, i32
  }
  func.func @transform_13(%arg0: i32) -> (i32, i32) {
    %c0_i32 = arith.constant 0 : i32
    %c0_i32_0 = arith.constant 0 : i32
    %c0_i32_1 = arith.constant 0 : i32
    return %c0_i32, %c0_i32_0 : i32, i32
  }
  func.func @transform_14(%arg0: i32) -> (i32, i32, i32) {
    %c0_i32 = arith.constant 0 : i32
    %c0_i32_0 = arith.constant 0 : i32
    %c0_i32_1 = arith.constant 0 : i32
    return %arg0, %c0_i32, %c0_i32_0 : i32, i32, i32
  }
}

</mosaic_0001>

<bundles_post_ra>
// kernel: tpu_custom_call.1
= control target key start
LH: loop header
LB: loop body
LE: loop exit
PB: predicated region body
PF: predicated region fallthrough
CT: control target
= control target key end

     0   :  { %19 = vsyncpa [#allocation3], 0  ;;  %s8578_s0 = inlined_call_operand.vmem [shape: f32[8,16,32], index: 0, kind: input, shape index: {}]   ;;  %s8579_s1 = inlined_call_operand.hbm [shape: f32[1,32], index: 1, kind: input, shape index: {}]   ;;  %s8580_s2 = inlined_call_operand.vmem [shape: f32[1,32], index: 2, kind: input, shape index: {}]   ;;  %s8581_s3 = inlined_call_operand.vmem [shape: f32[32,96], index: 3, kind: input, shape index: {}]   ;;  %s8582_s4 = inlined_call_operand.vmem [shape: f32[1,96], index: 4, kind: input, shape index: {}]   ;;  %s8583_s5 = inlined_call_operand.hbm [shape: f32[32,32], index: 5, kind: input, shape index: {}]   ;;  %s8584_s6 = inlined_call_operand.vmem [shape: f32[1,32], index: 6, kind: input, shape index: {}]   ;;  %s8585_s7 = inlined_call_operand.hbm [shape: f32[4,16,16], index: 7, kind: input, shape index: {}]   ;;  %s8586_s8 = inlined_call_operand.vmem [shape: f32[1,32], index: 8, kind: input, shape index: {}]   ;;  %s8587_s9 = inlined_call_operand.vmem [shape: f32[1,32], index: 9, kind: input, shape index: {}]   ;;  %s8588_s10 = inlined_call_operand.hbm [shape: f32[32,128], index: 10, kind: input, shape index: {}]   ;;  %s8589_s11 = inlined_call_operand.vmem [shape: f32[1,128], index: 11, kind: input, shape index: {}]   ;;  %s8590_s12 = inlined_call_operand.vmem [shape: f32[128,32], index: 12, kind: input, shape index: {}]   ;;  %s8591_s13 = inlined_call_operand.vmem [shape: f32[1,32], index: 13, kind: input, shape index: {}]   ;;  %s8592_s14 = inlined_call_operand.hbm [shape: f32[8,16,32], index: 14, kind: output, shape index: {}]  }
   0x1   :  { %20 = vsyncpa [#allocation6], 0 }
   0x2   :  { %21 = vsyncpa [#allocation9], 0  ;;  %s46_s15 = sshll.u32 %s8583_s5, 4  ;;  %s47_s15 = int_to_ptr.hbm [resolvable:$true] %s46_s15 }
   0x3   :  { %22 = vsyncpa [#allocation4], 0  ;;  %s5837_s16 = smov [#allocation5]   ;;  %s30_s20 = sshll.u32 %s8579_s1, 4  ;;  %s31_s20 = int_to_ptr.hbm [resolvable:$true] %s30_s20 }
   0x4   :  { %s48_s17 = sshll.u32 %s5837_s16, 4  ;;  %s5838_s21 = smov 128   ;;  %s49_s17 = int_to_ptr.vmem [resolvable:$true] %s48_s17 }
   0x5   :  { %s5839_s22 = smov 8   ;;  %s5840_s23 = smov [#allocation2]  }
   0x6   :  { %54 = dma.hbm_to_vmem [thread:$0]  %s47_s15, 512, %s49_s17, [#allocation6], %s5838_s21, %s5838_s21, %s5839_s22  }
   0x7   :  { %s32_s24 = sshll.u32 %s5840_s23, 4  ;;  %s61_s26 = sshll.u32 %s8585_s7, 4  ;;  %s33_s24 = int_to_ptr.vmem [resolvable:$true] %s32_s24  ;;  %s62_s26 = int_to_ptr.hbm [resolvable:$true] %s61_s26 }
   0x8   :  { %35 = dma.hbm_to_vmem [thread:$0]  %s31_s20, 16, %s33_s24, [#allocation3]  }
   0x9   :  { %s78_s1 = sshll.u32 %s8588_s10, 4  ;;  %s5841_s29 = smov [#allocation7]   ;;  %s79_s1 = int_to_ptr.hbm [resolvable:$true] %s78_s1 }
   0xa   :  { %s63_s30 = sshll.u32 %s5841_s29, 4  ;;  %s5842_s15 = smov [#allocation8]   ;;  %s64_s30 = int_to_ptr.vmem [resolvable:$true] %s63_s30 }
   0xb   :  { %69 = dma.hbm_to_vmem [thread:$0]  %s62_s26, 1024, %s64_s30, [#allocation6], %s5838_s21, %s5838_s21, %s5839_s22  }
   0xc   :  { %s80_s16 = sshll.u32 %s5842_s15, 4  ;;  %s81_s16 = int_to_ptr.vmem [resolvable:$true] %s80_s16 }
   0xd   :  { %86 = dma.hbm_to_vmem [thread:$0]  %s79_s1, 512, %s81_s16, [#allocation9], %s5838_s21, %s5838_s21, %s5839_s22  }
   0xe   :  { %5829 = dma.done.wait [#allocation3], 16  }
   0xf   :  { %5830 = vsyncadd [#allocation3], 4294967280 }
  0x10   :  { %5831 = dma.done.wait [#allocation6], 1536  }
  0x11   :  { %5832 = vsyncadd [#allocation6], 4294965760 }
  0x12   :  { %5833 = dma.done.wait [#allocation9], 512  }
  0x13   :  { %5834 = vsyncadd [#allocation9], 4294966784  ;;  %vm127_vm0 = vcmask 261120   ;;  %v111_v0 = vld [vmem:[%s8578_s0 + $0x10] sm:$0xff]  ;;  %v109_v1 = vld [vmem:[%s8578_s0] sm:$0xff]  ;;  %v5843_v14 = vmov 32.0  }
  0x14   :  { %v5963_v2 = vld [vmem:[%s8578_s0 + $0x20] sm:$0xff]  ;;  %v134_v3 = vsel %vm127_vm0, %v111_v0, 0.0  ;;  %v128_v4 = vsel %vm127_vm0, %v109_v1, 0.0  ;;  %v110_v6 = vld [vmem:[%s8578_s0 + $0x8] sm:$0xff]  ;;  %v112_v8 = vld [vmem:[%s8578_s0 + $0x18] sm:$0xff]  ;;  %5339 = vrcp.f32 %v5843_v14  ;;  %s5845_s23 = smov 64  }
  0x15   :  { %v140_v5 = vsel %vm127_vm0, %v5963_v2, 0.0  ;;  %135 = vadd.xlane.f32.xlu1 %v134_v3  ;;  %129 = vadd.xlane.f32.xlu0 %v128_v4  ;;  %v114_v7 = vld [vmem:[%s8578_s0 + $0x28] sm:$0xff]  ;;  %v131_v9 = vsel %vm127_vm0, %v110_v6, 0.0  ;;  %v137_v10 = vsel %vm127_vm0, %v112_v8, 0.0  ;;  %v115_v12 = vld [vmem:[%s8578_s0 + $0x30] sm:$0xff]  ;;  %v6010_v39 = vld [vmem:[%s8578_s0 + $0x38] sm:$0xff] }
  0x16   :  { %141 = vadd.xlane.f32.xlu2 %v140_v5  ;;  %v143_v11 = vsel %vm127_vm0, %v114_v7, 0.0  ;;  %v146_v13 = vsel %vm127_vm0, %v115_v12, 0.0  ;;  %v6003_v36 = vld [vmem:[%s8578_s0 + $0x48] sm:$0xff]  ;;  %v149_v44 = vsel %vm127_vm0, %v6010_v39, 0.0  ;;  %v6033_v51 = vld [vmem:[%s8578_s0 + $0x40] sm:$0xff]  ;;  %v6046_v57 = vld [vmem:[%s8578_s0 + $0x50] sm:$0xff] }
  0x17   :  { %v155_v41 = vsel %vm127_vm0, %v6003_v36, 0.0  ;;  %v152_v55 = vsel %vm127_vm0, %v6033_v51, 0.0  ;;  %v6051_v58 = vld [vmem:[%s8578_s0 + $0x58] sm:$0xff]  ;;  %v158_v60 = vsel %vm127_vm0, %v6046_v57, 0.0  ;;  %v6062_v63 = vld [vmem:[%s8578_s0 + $0x68] sm:$0xff]  ;;  %s5846_s24 = smov 88  }
  0x18   :  { %v161_v61 = vsel %vm127_vm0, %v6051_v58, 0.0  ;;  %s5847_s25 = smov 120   ;;  %s5848_s5 = smov 56  }
  0x19   :  { %s5849_s26 = smov 80   ;;  %s5850_s27 = smov 112  }
  0x1a   :  { %v5340_v15 = vpop.eup %5339  ;;  %s5851_s28 = smov 48   ;;  %s5852_s1 = smov 72  }
  0x1b   :  { %v177_v16 = vmul.f32 32.0, %v5340_v15  ;;  %vm181_vm1 = vweird.f32 %v5340_v15  ;;  %s5853_s29 = smov 104   ;;  %s5854_s30 = smov 40  }
  0x1c   :  { %s5855_s15 = smov 16   ;;  %s5856_s16 = smov 24  }
  0x1d   :  { %132 = vadd.xlane.f32.xlu0 %v131_v9  ;;  %138 = vadd.xlane.f32.xlu1 %v137_v10  ;;  %v178_v17 = vsub.f32 1.0, %v177_v16  ;;  %v528_v10 = vld [vmem:[%s8581_s3 + $0x18] sm:$0xff]  ;;  %s4873_s18 = sshll.u32 %s8592_s14, 4  ;;  %s4874_s18 = int_to_ptr.hbm [resolvable:$true] %s4873_s18 }
  0x1e   :  { %144 = vadd.xlane.f32.xlu2 %v143_v11  ;;  %593 = vmatpush.msra.mxu0 %v528_v10  ;;  %v527_v11 = vld [vmem:[%s8581_s3 + $0x10] sm:$0xff] }
  0x1f   :  { %v179_v18 = vmul.f32 %v5340_v15, %v178_v17  ;;  %5128 = vmatpush.msra.mxu3 %v528_v10 }
  0x20   :  { %594 = vmatpush.msra.mxu0 %v527_v11 }
  0x21   :  { %v180_v19 = vadd.f32 %v5340_v15, %v179_v18  ;;  %5129 = vmatpush.msra.mxu3 %v527_v11 }
  0x23   :  { %v5985_v20 = vsel %vm181_vm1, %v5340_v15, %v180_v19 }
  0x24   :  { %8609 = vst [vmem:[#allocation15_spill] sm:$0xff] %v5985_v20 }
  0x25   :  { %147 = vadd.xlane.f32.xlu1 %v146_v13  ;;  %v525_v13 = vld [vmem:[%s8581_s3] sm:$0xff] }
  0x88   :  { %v136_v21 = vpop.xlane.xlu1 %135  ;;  %v130_v22 = vpop.xlane.xlu0 %129 }
  0x89   :  { %v185_v23 = vmul.f32 %v5985_v20, %v136_v21  ;;  %v183_v24 = vmul.f32 %v5985_v20, %v130_v22  ;;  %v142_v25 = vpop.xlane.xlu2 %141 }
  0x8a   :  { %v187_v62 = vmul.f32 %v5985_v20, %v142_v25 }
  0x8b   :  { %v5989_v26 = vsub.f32 %v111_v0, %v185_v23  ;;  %v5991_v27 = vsub.f32 %v109_v1, %v183_v24  ;;  %v6067_v0 = vld [vmem:[%s8578_s0 + $0x70] sm:$0xff]  ;;  %v167_v1 = vsel %vm127_vm0, %v6062_v63, 0.0 }
  0x8c   :  { %v6072_v3 = vsub.f32 %v5963_v2, %v187_v62  ;;  %v170_v4 = vsel %vm127_vm0, %v6067_v0, 0.0  ;;  %v6089_v2 = vld [vmem:[%s8578_s0 + $0x78] sm:$0xff]  ;;  %v6140_v62 = vld [vmem:[#allocation2] ss:$0 sm:$0xff] }
  0x8d   :  { %v217_v28 = vmul.f32 %v5989_v26, %v5989_v26  ;;  %v215_v29 = vmul.f32 %v5991_v27, %v5991_v27  ;;  %v173_v9 = vsel %vm127_vm0, %v6089_v2, 0.0 }
  0x8e   :  { %v219_v5 = vmul.f32 %v6072_v3, %v6072_v3 }
  0x8f   :  { %v237_v30 = vsel %vm127_vm0, %v217_v28, 0.0  ;;  %v231_v31 = vsel %vm127_vm0, %v215_v29, 0.0 }
  0x90   :  { %238 = vadd.xlane.f32.xlu1 %v237_v30  ;;  %232 = vadd.xlane.f32.xlu0 %v231_v31  ;;  %v133_v32 = vpop.xlane.xlu0 %132  ;;  %v139_v33 = vpop.xlane.xlu1 %138 }
  0x91   :  { %v184_v34 = vmul.f32 %v5985_v20, %v133_v32  ;;  %v145_v35 = vpop.xlane.xlu2 %144  ;;  %v186_v37 = vmul.f32 %v5985_v20, %v139_v33 }
  0x92   :  { %v188_v38 = vmul.f32 %v5985_v20, %v145_v35 }
  0x93   :  { %v6012_v40 = vsub.f32 %v110_v6, %v184_v34  ;;  %v6018_v43 = vsub.f32 %v112_v8, %v186_v37  ;;  %v6081_v6 = vld [vmem:[%s8578_s0 + $0x60] sm:$0xff]  ;;  %v243_v8 = vsel %vm127_vm0, %v219_v5, 0.0 }
  0x94   :  { %v6016_v42 = vsub.f32 %v114_v7, %v188_v38  ;;  %v164_v7 = vsel %vm127_vm0, %v6081_v6, 0.0 }
  0x95   :  { %v216_v45 = vmul.f32 %v6012_v40, %v6012_v40  ;;  %v218_v50 = vmul.f32 %v6018_v43, %v6018_v43 }
  0x96   :  { %v220_v48 = vmul.f32 %v6016_v42, %v6016_v42 }
  0x97   :  { %v234_v46 = vsel %vm127_vm0, %v216_v45, 0.0  ;;  %v240_v54 = vsel %vm127_vm0, %v218_v50, 0.0 }
  0x98   :  { %156 = vadd.xlane.f32.xlu1 %v155_v41  ;;  %150 = vadd.xlane.f32.xlu0 %v149_v44  ;;  %v148_v47 = vpop.xlane.xlu1 %147  ;;  %v246_v52 = vsel %vm127_vm0, %v220_v48, 0.0 }
  0x99   :  { %235 = vadd.xlane.f32.xlu2 %v234_v46  ;;  %v189_v49 = vmul.f32 %v5985_v20, %v148_v47 }
  0x9b   :  { %v6036_v53 = vsub.f32 %v115_v12, %v189_v49  ;;  %v526_v12 = vld [vmem:[%s8581_s3 + $0x8] sm:$0xff] }
  0x9c   :  { %595 = vmatpush.msra.mxu0 %v526_v12  ;;  %5130 = vmatpush.msra.mxu3 %v526_v12 }
  0x9d   :  { %v221_v56 = vmul.f32 %v6036_v53, %v6036_v53 }
  0x9e   :  { %596 = vmatpush.msra.mxu0 %v525_v13  ;;  %5131 = vmatpush.msra.mxu3 %v525_v13 }
  0x9f   :  { %v249_v59 = vsel %vm127_vm0, %v221_v56, 0.0 }
  0xa0   :  { %247 = vadd.xlane.f32.xlu1 %v246_v52  ;;  %241 = vadd.xlane.f32.xlu0 %v240_v54 }
  0xa1   :  { %153 = vadd.xlane.f32.xlu2 %v152_v55 }
  0xa8   :  { %250 = vadd.xlane.f32.xlu1 %v249_v59  ;;  %159 = vadd.xlane.f32.xlu0 %v158_v60 }
  0xa9   :  { %162 = vadd.xlane.f32.xlu2 %v161_v61 }
  0xb0   :  { %168 = vadd.xlane.f32.xlu0 %v167_v1 }
  0xb1   :  { %171 = vadd.xlane.f32.xlu2 %v170_v4 }
  0xb8   :  { %165 = vadd.xlane.f32.xlu0 %v164_v7 }
  0xb9   :  { %244 = vadd.xlane.f32.xlu2 %v243_v8 }
  0xc1   :  { %174 = vadd.xlane.f32.xlu2 %v173_v9  ;;  %v6147_v9 = vld [vmem:[%s8580_s2] ss:$0 sm:$0xff] }
 0x103   :  { %v239_v14 = vpop.xlane.xlu1 %238  ;;  %v233_v15 = vpop.xlane.xlu0 %232 }
 0x104   :  { %v281_v16 = vmul.f32 %v239_v14, %v5985_v20  ;;  %v279_v17 = vmul.f32 %v233_v15, %v5985_v20 }
 0x106   :  { %v6107_v18 = vadd.f32 1e-05, %v281_v16  ;;  %v295_v19 = vadd.f32 1e-05, %v279_v17 }
 0x108   :  { %5341 = vrsqrt.f32 %v6107_v18  ;;  %vm317_vm3 = vweird.f32 %v295_v19  ;;  %vm337_vm8 = vweird.f32 %v6107_v18 }
 0x109   :  { %5343 = vrsqrt.f32 %v295_v19 }
 0x10b   :  { %v157_v21 = vpop.xlane.xlu1 %156  ;;  %v151_v22 = vpop.xlane.xlu0 %150 }
 0x10c   :  { %v192_v23 = vmul.f32 %v5985_v20, %v157_v21  ;;  %v236_v24 = vpop.xlane.xlu2 %235  ;;  %v190_v25 = vmul.f32 %v5985_v20, %v151_v22 }
 0x10d   :  { %v280_v28 = vmul.f32 %v236_v24, %v5985_v20 }
 0x10e   :  { %v6113_v29 = vpop.eup %5341  ;;  %v6116_v30 = vsub.f32 %v6010_v39, %v190_v25  ;;  %v6119_v34 = vsub.f32 %v6003_v36, %v192_v23 }
 0x10f   :  { %v5344_v31 = vpop.eup %5343  ;;  %v296_v32 = vadd.f32 1e-05, %v280_v28  ;;  %v332_v37 = vmul.f32 %v6113_v29, %v6107_v18  ;;  %vm338_vm9 = vweird.f32 %v6113_v29 }
 0x110   :  { %v312_v33 = vmul.f32 %v5344_v31, %v295_v19  ;;  %v222_v35 = vmul.f32 %v6116_v30, %v6116_v30  ;;  %v224_v36 = vmul.f32 %v6119_v34, %v6119_v34  ;;  %vm318_vm2 = vweird.f32 %v5344_v31  ;;  %vm6182_vm10 = vmor %vm337_vm8, %vm338_vm9 }
 0x111   :  { %5345 = vrsqrt.f32 %v296_v32  ;;  %v333_v47 = vmul.f32 %v6113_v29, %v332_v37  ;;  %vm319_vm4 = vmor %vm317_vm3, %vm318_vm2  ;;  %vm327_vm5 = vweird.f32 %v296_v32 }
 0x112   :  { %v313_v38 = vmul.f32 %v5344_v31, %v312_v33  ;;  %v252_v41 = vsel %vm127_vm0, %v222_v35, 0.0  ;;  %v258_v59 = vsel %vm127_vm0, %v224_v36, 0.0 }
 0x113   :  { %253 = vadd.xlane.f32.xlu1 %v252_v41  ;;  %v242_v44 = vpop.xlane.xlu0 %241  ;;  %v334_v60 = vmul.f32 0.5, %v333_v47  ;;  %v248_v4 = vpop.xlane.xlu1 %247 }
 0x114   :  { %v314_v39 = vmul.f32 0.5, %v313_v38  ;;  %v154_v45 = vpop.xlane.xlu2 %153  ;;  %v282_v46 = vmul.f32 %v242_v44, %v5985_v20 }
 0x115   :  { %v191_v48 = vmul.f32 %v5985_v20, %v154_v45  ;;  %v335_v13 = vsub.f32 1.5, %v334_v60 }
 0x116   :  { %v315_v49 = vsub.f32 1.5, %v314_v39  ;;  %v6131_v50 = vadd.f32 1e-05, %v282_v46 }
 0x117   :  { %v5346_v52 = vpop.eup %5345  ;;  %v6134_v54 = vsub.f32 %v6033_v51, %v191_v48  ;;  %v336_v28 = vmul.f32 %v6113_v29, %v335_v13 }
 0x118   :  { %v316_v55 = vmul.f32 %v5344_v31, %v315_v49  ;;  %v322_v56 = vmul.f32 %v5346_v52, %v296_v32  ;;  %5347 = vrsqrt.f32 %v6131_v50  ;;  %vm328_vm6 = vweird.f32 %v5346_v52 }
 0x119   :  { %v223_v61 = vmul.f32 %v6134_v54, %v6134_v54  ;;  %vm6156_vm7 = vmor %vm327_vm5, %vm328_vm6  ;;  %vm347_vm12 = vweird.f32 %v6131_v50 }
 0x11a   :  { %v323_v1 = vmul.f32 %v5346_v52, %v322_v56  ;;  %v320_v5 = vsel %vm319_vm4, %v5344_v31, %v316_v55 }
 0x11b   :  { %v255_v51 = vsel %vm127_vm0, %v223_v61, 0.0  ;;  %259 = vadd.xlane.f32.xlu1 %v258_v59  ;;  %v160_v7 = vpop.xlane.xlu0 %159  ;;  %v471_v8 = vmul.f32 %v320_v5, %v5991_v27  ;;  %v284_v27 = vmul.f32 %v248_v4, %v5985_v20  ;;  %v251_v45 = vpop.xlane.xlu1 %250 }
 0x11c   :  { %v324_v10 = vmul.f32 0.5, %v323_v1  ;;  %256 = vadd.xlane.f32.xlu0 %v255_v51  ;;  %v163_v11 = vpop.xlane.xlu2 %162  ;;  %v193_v12 = vmul.f32 %v5985_v20, %v160_v7 }
 0x11d   :  { %v194_v14 = vmul.f32 %v5985_v20, %v163_v11  ;;  %v490_v15 = vmul.f32 %v6140_v62, %v471_v8  ;;  %v6173_v31 = vadd.f32 1e-05, %v284_v27 }
 0x11e   :  { %v325_v16 = vsub.f32 1.5, %v324_v10  ;;  %v6154_v17 = vsub.f32 %v6046_v57, %v193_v12  ;;  %v5348_v19 = vpop.eup %5347 }
 0x11f   :  { %v6161_v22 = vsub.f32 %v6051_v58, %v194_v14  ;;  %v509_v23 = vadd.f32 %v6147_v9, %v490_v15  ;;  %v342_v25 = vmul.f32 %v5348_v19, %v6131_v50  ;;  %5349 = vrsqrt.f32 %v6173_v31 }
 0x120   :  { %v326_v24 = vmul.f32 %v5346_v52, %v325_v16  ;;  %v225_v58 = vmul.f32 %v6154_v17, %v6154_v17  ;;  %vm348_vm11 = vweird.f32 %v5348_v19  ;;  %vm367_vm1 = vweird.f32 %v6173_v31 }
 0x121   :  { %4888 = vmatmul.msk.f32.vlgmr.msra.gmra.mxu0 %vm127_vm0, %v509_v23  ;;  %v226_v57 = vmul.f32 %v6161_v22, %v6161_v22  ;;  %v343_v32 = vmul.f32 %v5348_v19, %v342_v25  ;;  %vm349_vm13 = vmor %vm347_vm12, %vm348_vm11 }
 0x122   :  { %v330_v33 = vsel %vm6156_vm7, %v5346_v52, %v326_v24  ;;  %v261_v37 = vsel %vm127_vm0, %v225_v58, 0.0  ;;  %v285_v52 = vmul.f32 %v251_v45, %v5985_v20 }
 0x123   :  { %v264_v35 = vsel %vm127_vm0, %v226_v57, 0.0  ;;  %v169_v38 = vpop.xlane.xlu0 %168  ;;  %v472_v41 = vmul.f32 %v330_v33, %v6012_v40  ;;  %v344_v39 = vmul.f32 0.5, %v343_v32  ;;  %262 = vadd.xlane.f32.xlu2 %v261_v37  ;;  %v340_v40 = vsel %vm6182_vm10, %v6113_v29, %v336_v28 }
 0x124   :  { %265 = vadd.xlane.f32.xlu0 %v264_v35  ;;  %v172_v46 = vpop.xlane.xlu2 %171  ;;  %v196_v36 = vmul.f32 %v5985_v20, %v169_v38  ;;  %v473_v60 = vmul.f32 %v340_v40, %v5989_v26 }
 0x125   :  { %v197_v47 = vmul.f32 %v5985_v20, %v172_v46  ;;  %v491_v48 = vmul.f32 %v6140_v62, %v472_v41  ;;  %v345_v18 = vsub.f32 1.5, %v344_v39  ;;  %v5350_v5 = vpop.eup %5349 }
 0x126   :  { %v6194_v49 = vsub.f32 %v6062_v63, %v196_v36  ;;  %v492_v26 = vmul.f32 %v6140_v62, %v473_v60  ;;  %v362_v50 = vmul.f32 %v5350_v5, %v6173_v31  ;;  %vm368_vm2 = vweird.f32 %v5350_v5 }
 0x127   :  { %v6198_v55 = vsub.f32 %v6067_v0, %v197_v47  ;;  %v510_v56 = vadd.f32 %v6147_v9, %v491_v48  ;;  %v346_v61 = vmul.f32 %v5348_v19, %v345_v18  ;;  %v301_v0 = vadd.f32 1e-05, %v285_v52  ;;  %vm369_vm4 = vmor %vm367_vm1, %vm368_vm2 }
 0x128   :  { %v228_v59 = vmul.f32 %v6194_v49, %v6194_v49  ;;  %v511_v13 = vadd.f32 %v6147_v9, %v492_v26  ;;  %v363_v27 = vmul.f32 %v5350_v5, %v362_v50 }
 0x129   :  { %v229_v29 = vmul.f32 %v6198_v55, %v6198_v55  ;;  %4889 = vmatmul.msk.f32.gmra.mxu0 %vm127_vm0, %v510_v56  ;;  %v350_v10 = vsel %vm349_vm13, %v5348_v19, %v346_v61  ;;  %5351 = vrsqrt.f32 %v301_v0  ;;  %vm377_vm5 = vweird.f32 %v301_v0 }
 0x12a   :  { %v270_v63 = vsel %vm127_vm0, %v228_v59, 0.0  ;;  %v474_v14 = vmul.f32 %v350_v10, %v6018_v43  ;;  %v364_v25 = vmul.f32 0.5, %v363_v27 }
 0x12b   :  { %v273_v1 = vsel %vm127_vm0, %v229_v29, 0.0  ;;  %271 = vadd.xlane.f32.xlu1 %v270_v63  ;;  %v166_v4 = vpop.xlane.xlu0 %165 }
 0x12c   :  { %v245_v51 = vpop.xlane.xlu2 %244  ;;  %274 = vadd.xlane.f32.xlu2 %v273_v1  ;;  %v195_v7 = vmul.f32 %v5985_v20, %v166_v4  ;;  %v493_v19 = vmul.f32 %v6140_v62, %v474_v14  ;;  %v365_v35 = vsub.f32 1.5, %v364_v25 }
 0x12d   :  { %v283_v8 = vmul.f32 %v245_v51, %v5985_v20 }
 0x12e   :  { %v6214_v11 = vsub.f32 %v6081_v6, %v195_v7  ;;  %v512_v58 = vadd.f32 %v6147_v9, %v493_v19  ;;  %v366_v44 = vmul.f32 %v5350_v5, %v365_v35 }
 0x12f   :  { %v299_v12 = vadd.f32 1e-05, %v283_v8  ;;  %v5352_v21 = vpop.eup %5351 }
 0x130   :  { %v227_v15 = vmul.f32 %v6214_v11, %v6214_v11  ;;  %v372_v28 = vmul.f32 %v5352_v21, %v301_v0  ;;  %v370_v48 = vsel %vm369_vm4, %v5350_v5, %v366_v44  ;;  %vm378_vm6 = vweird.f32 %v5352_v21 }
 0x131   :  { %5353 = vrsqrt.f32 %v299_v12  ;;  %4890 = vmatmul.msk.f32.gmra.mxu0 %vm127_vm0, %v511_v13  ;;  %vm357_vm14 = vweird.f32 %v299_v12  ;;  %v476_v31 = vmul.f32 %v370_v48, %v6016_v42  ;;  %vm379_vm7 = vmor %vm377_vm5, %vm378_vm6 }
 0x132   :  { %v267_v16 = vsel %vm127_vm0, %v227_v15, 0.0  ;;  %v373_v38 = vmul.f32 %v5352_v21, %v372_v28  ;;  %v6258_v28 = vld [vmem:[%s8582_s4] ss:$0 sm:$0xff]  ;;  %s5844_s4 = smov 96  }
 0x133   :  { %268 = vadd.xlane.f32.xlu0 %v267_v16  ;;  %v495_v56 = vmul.f32 %v6140_v62, %v476_v31 }
 0x134   :  { %v175_v6 = vpop.xlane.xlu2 %174  ;;  %v374_v39 = vmul.f32 0.5, %v373_v38 }
 0x135   :  { %v198_v23 = vmul.f32 %v5985_v20, %v175_v6  ;;  %v514_v60 = vadd.f32 %v6147_v9, %v495_v56 }
 0x136   :  { %v375_v47 = vsub.f32 1.5, %v374_v39 }
 0x137   :  { %v5354_v24 = vpop.eup %5353  ;;  %v6226_v43 = vsub.f32 %v6089_v2, %v198_v23 }
 0x138   :  { %v352_v57 = vmul.f32 %v5354_v24, %v299_v12  ;;  %vm358_vm15 = vweird.f32 %v5354_v24  ;;  %v376_v52 = vmul.f32 %v5352_v21, %v375_v47 }
 0x139   :  { %v230_v32 = vmul.f32 %v6226_v43, %v6226_v43  ;;  %4891 = vmatmul.msk.f32.gmra.mxu0 %vm127_vm0, %v512_v58  ;;  %vm359_vm3 = vmor %vm357_vm14, %vm358_vm15 }
 0x13a   :  { %v353_v33 = vmul.f32 %v5354_v24, %v352_v57  ;;  %v380_v59 = vsel %vm379_vm7, %v5352_v21, %v376_v52 }
 0x13b   :  { %v276_v37 = vsel %vm127_vm0, %v230_v32, 0.0 }
 0x13c   :  { %v354_v41 = vmul.f32 0.5, %v353_v33  ;;  %277 = vadd.xlane.f32.xlu1 %v276_v37 }
 0x13e   :  { %v355_v2 = vsub.f32 1.5, %v354_v41 }
 0x140   :  { %v356_v45 = vmul.f32 %v5354_v24, %v355_v2 }
 0x142   :  { %v360_v46 = vsel %vm359_vm3, %v5354_v24, %v356_v45 }
 0x143   :  { %v475_v36 = vmul.f32 %v360_v46, %v6072_v3  ;;  %v477_v3 = vmul.f32 %v380_v59, %v6036_v53 }
 0x145   :  { %v494_v40 = vmul.f32 %v6140_v62, %v475_v36  ;;  %v496_v61 = vmul.f32 %v6140_v62, %v477_v3 }
 0x147   :  { %v513_v18 = vadd.f32 %v6147_v9, %v494_v40  ;;  %v515_v29 = vadd.f32 %v6147_v9, %v496_v61 }
 0x149   :  { %4892 = vmatmul.msk.f32.gmra.mxu0 %vm127_vm0, %v513_v18 }
 0x151   :  { %4893 = vmatmul.msk.f32.gmra.mxu0 %vm127_vm0, %v514_v60 }
 0x159   :  { %4894 = vmatmul.msk.f32.gmra.mxu0 %vm127_vm0, %v515_v29 }
 0x186   :  { %v254_v42 = vpop.xlane.xlu1 %253 }
 0x187   :  { %v286_v63 = vmul.f32 %v254_v42, %v5985_v20 }
 0x189   :  { %v302_v0 = vadd.f32 1e-05, %v286_v63 }
 0x18b   :  { %5355 = vrsqrt.f32 %v302_v0  ;;  %vm387_vm9 = vweird.f32 %v302_v0 }
 0x18e   :  { %v260_v1 = vpop.xlane.xlu1 %259 }
 0x18f   :  { %v288_v4 = vmul.f32 %v260_v1, %v5985_v20  ;;  %v257_v5 = vpop.xlane.xlu0 %256 }
 0x190   :  { %v287_v51 = vmul.f32 %v257_v5, %v5985_v20 }
 0x191   :  { %v5356_v53 = vpop.eup %5355  ;;  %v304_v26 = vadd.f32 1e-05, %v288_v4 }
 0x192   :  { %v382_v7 = vmul.f32 %v5356_v53, %v302_v0  ;;  %v303_v8 = vadd.f32 1e-05, %v287_v51  ;;  %vm388_vm8 = vweird.f32 %v5356_v53 }
 0x193   :  { %5357 = vrsqrt.f32 %v304_v26  ;;  %vm389_vm10 = vmor %vm387_vm9, %vm388_vm8  ;;  %vm407_vm13 = vweird.f32 %v304_v26 }
 0x194   :  { %v383_v10 = vmul.f32 %v5356_v53, %v382_v7  ;;  %5359 = vrsqrt.f32 %v303_v8  ;;  %vm397_vm11 = vweird.f32 %v303_v8 }
 0x196   :  { %v384_v50 = vmul.f32 0.5, %v383_v10  ;;  %v263_v12 = vpop.xlane.xlu2 %262 }
 0x197   :  { %v266_v13 = vpop.xlane.xlu0 %265  ;;  %v289_v15 = vmul.f32 %v263_v12, %v5985_v20 }
 0x198   :  { %v385_v14 = vsub.f32 1.5, %v384_v50  ;;  %v290_v16 = vmul.f32 %v266_v13, %v5985_v20 }
 0x199   :  { %v5358_v27 = vpop.eup %5357  ;;  %v6251_v23 = vadd.f32 1e-05, %v289_v15 }
 0x19a   :  { %v5360_v6 = vpop.eup %5359  ;;  %v386_v19 = vmul.f32 %v5356_v53, %v385_v14  ;;  %v402_v21 = vmul.f32 %v5358_v27, %v304_v26  ;;  %v6253_v25 = vadd.f32 1e-05, %v290_v16  ;;  %vm408_vm14 = vweird.f32 %v5358_v27 }
 0x19b   :  { %v392_v24 = vmul.f32 %v5360_v6, %v303_v8  ;;  %5361 = vrsqrt.f32 %v6251_v23  ;;  %vm398_vm12 = vweird.f32 %v5360_v6  ;;  %vm409_vm1 = vmor %vm407_vm13, %vm408_vm14  ;;  %vm417_vm3 = vweird.f32 %v6251_v23 }
 0x19c   :  { %v403_v57 = vmul.f32 %v5358_v27, %v402_v21  ;;  %v390_v58 = vsel %vm389_vm10, %v5356_v53, %v386_v19  ;;  %5363 = vrsqrt.f32 %v6253_v25  ;;  %vm399_vm15 = vmor %vm397_vm11, %vm398_vm12  ;;  %vm427_vm5 = vweird.f32 %v6253_v25 }
 0x19d   :  { %v393_v32 = vmul.f32 %v5360_v6, %v392_v24  ;;  %v478_v33 = vmul.f32 %v390_v58, %v6116_v30 }
 0x19e   :  { %v404_v35 = vmul.f32 0.5, %v403_v57  ;;  %v598_v37 = vpop.f32.mrf.mxu0  ;;  %v272_v38 = vpop.xlane.xlu1 %271 }
 0x19f   :  { %v394_v41 = vmul.f32 0.5, %v393_v32  ;;  %v6264_v2 = vadd.f32 %v6258_v28, %v598_v37  ;;  %v275_v44 = vpop.xlane.xlu2 %274  ;;  %v292_v39 = vmul.f32 %v272_v38, %v5985_v20  ;;  %v497_v45 = vmul.f32 %v6140_v62, %v478_v33 }
 0x1a0   :  { %v405_v46 = vsub.f32 1.5, %v404_v35  ;;  %v293_v36 = vmul.f32 %v275_v44, %v5985_v20 }
 0x1a1   :  { %v395_v47 = vsub.f32 1.5, %v394_v41  ;;  %v6269_v48 = vadd.f32 1e-05, %v292_v39  ;;  %650 = vrot.lane.b32.xlu0 %v6264_v2, %s5844_s4  ;;  %v516_v30 = vadd.f32 %v6147_v9, %v497_v45  ;;  %v6274_v40 = vpop.eup %5361 }
 0x1a2   :  { %v406_v18 = vmul.f32 %v5358_v27, %v405_v46  ;;  %v6278_v31 = vadd.f32 1e-05, %v293_v36  ;;  %v6280_v52 = vpop.eup %5363  ;;  %v412_v59 = vmul.f32 %v6274_v40, %v6251_v23  ;;  %vm418_vm2 = vweird.f32 %v6274_v40 }
 0x1a3   :  { %v396_v56 = vmul.f32 %v5360_v6, %v395_v47  ;;  %5365 = vrsqrt.f32 %v6269_v48  ;;  %4895 = vmatmul.msk.f32.gmra.mxu0 %vm127_vm0, %v516_v30  ;;  %v422_v60 = vmul.f32 %v6280_v52, %v6253_v25  ;;  %vm6308_vm4 = vmor %vm417_vm3, %vm418_vm2  ;;  %vm428_vm9 = vweird.f32 %v6280_v52 }
 0x1a4   :  { %5367 = vrsqrt.f32 %v6278_v31  ;;  %v413_v3 = vmul.f32 %v6274_v40, %v412_v59  ;;  %v410_v63 = vsel %vm409_vm1, %v5358_v27, %v406_v18  ;;  %vm457_vm6 = vweird.f32 %v6278_v31  ;;  %vm6338_vm13 = vmor %vm427_vm5, %vm428_vm9 }
 0x1a5   :  { %v400_v61 = vsel %vm399_vm15, %v5360_v6, %v396_v56  ;;  %v423_v1 = vmul.f32 %v6280_v52, %v422_v60  ;;  %v480_v8 = vmul.f32 %v410_v63, %v6119_v34  ;;  %vm447_vm10 = vweird.f32 %v6269_v48 }
 0x1a6   :  { %v479_v29 = vmul.f32 %v400_v61, %v6134_v54  ;;  %v269_v42 = vpop.xlane.xlu0 %268  ;;  %v414_v0 = vmul.f32 0.5, %v413_v3  ;;  %v6292_v4 = vpop.f32.mrf.mxu0  ;;  %vm654_vm5 = vcmask 64512  }
 0x1a7   :  { %v291_v5 = vmul.f32 %v269_v42, %v5985_v20  ;;  %v424_v13 = vmul.f32 0.5, %v423_v1  ;;  %v499_v16 = vmul.f32 %v6140_v62, %v480_v8 }
 0x1a8   :  { %v498_v51 = vmul.f32 %v6140_v62, %v479_v29  ;;  %v415_v26 = vsub.f32 1.5, %v414_v0 }
 0x1a9   :  { %v5366_v53 = vpop.eup %5365  ;;  %v6296_v7 = vadd.f32 1e-05, %v291_v5  ;;  %v425_v19 = vsub.f32 1.5, %v424_v13  ;;  %v518_v38 = vadd.f32 %v6147_v9, %v499_v16 }
 0x1aa   :  { %v5368_v10 = vpop.eup %5367  ;;  %v442_v54 = vmul.f32 %v5366_v53, %v6269_v48  ;;  %v517_v50 = vadd.f32 %v6147_v9, %v498_v51  ;;  %v416_v12 = vmul.f32 %v6274_v40, %v415_v26  ;;  %vm448_vm7 = vweird.f32 %v5366_v53 }
 0x1ab   :  { %v452_v14 = vmul.f32 %v5368_v10, %v6278_v31  ;;  %5369 = vrsqrt.f32 %v6296_v7  ;;  %vm458_vm8 = vweird.f32 %v5368_v10  ;;  %vm449_vm11 = vmor %vm447_vm10, %vm448_vm7  ;;  %v426_v46 = vmul.f32 %v6280_v52, %v425_v19 }
 0x1ac   :  { %v443_v15 = vmul.f32 %v5366_v53, %v442_v54  ;;  %4896 = vmatmul.msk.f32.gmra.mxu0 %vm127_vm0, %v517_v50  ;;  %v420_v23 = vsel %vm6308_vm4, %v6274_v40, %v416_v12  ;;  %vm6332_vm12 = vmor %vm457_vm6, %vm458_vm8  ;;  %vm437_vm14 = vweird.f32 %v6296_v7  ;;  %vm945_vm6 = vcmask 130048  }
 0x1ad   :  { %v453_v34 = vmul.f32 %v5368_v10, %v452_v14  ;;  %v481_v45 = vmul.f32 %v420_v23, %v6154_v17  ;;  %v430_v60 = vsel %vm6338_vm13, %v6280_v52, %v426_v46  ;;  %vm3939_vm7 = vcmask 195584  }
 0x1ae   :  { %v444_v6 = vmul.f32 0.5, %v443_v15  ;;  %v604_v24 = vpop.f32.mrf.mxu0  ;;  %v482_v1 = vmul.f32 %v430_v60, %v6161_v22 }
 0x1af   :  { %v454_v21 = vmul.f32 0.5, %v453_v34  ;;  %v278_v57 = vpop.xlane.xlu1 %277  ;;  %v6318_v32 = vadd.f32 %v6258_v28, %v604_v24  ;;  %v500_v31 = vmul.f32 %v6140_v62, %v481_v45 }
 0x1b0   :  { %v445_v58 = vsub.f32 1.5, %v444_v6  ;;  %v294_v33 = vmul.f32 %v278_v57, %v5985_v20 }
 0x1b1   :  { %v5370_v35 = vpop.eup %5369  ;;  %v455_v37 = vsub.f32 1.5, %v454_v21  ;;  %688 = vrot.lane.b32.xlu1 %v6318_v32, %s5844_s4  ;;  %v519_v0 = vadd.f32 %v6147_v9, %v500_v31 }
 0x1b2   :  { %v446_v41 = vmul.f32 %v5366_v53, %v445_v58  ;;  %v310_v44 = vadd.f32 1e-05, %v294_v33  ;;  %v432_v39 = vmul.f32 %v5370_v35, %v6296_v7  ;;  %vm438_vm15 = vweird.f32 %v5370_v35 }
 0x1b3   :  { %v456_v36 = vmul.f32 %v5368_v10, %v455_v37  ;;  %vm439_vm1 = vmor %vm437_vm14, %vm438_vm15 }
 0x1b4   :  { %5371 = vrsqrt.f32 %v310_v44  ;;  %v433_v30 = vmul.f32 %v5370_v35, %v432_v39  ;;  %4897 = vmatmul.msk.f32.gmra.mxu0 %vm127_vm0, %v518_v38  ;;  %v450_v17 = vsel %vm449_vm11, %v5366_v53, %v446_v41  ;;  %vm467_vm2 = vweird.f32 %v310_v44 }
 0x1b5   :  { %v484_v40 = vmul.f32 %v450_v17, %v6194_v49  ;;  %v460_v56 = vsel %vm6332_vm12, %v5368_v10, %v456_v36  ;;  %v6417_v39 = vadd.f32 %v6258_v28, %v6292_v4 }
 0x1b6   :  { %v434_v18 = vmul.f32 0.5, %v433_v30  ;;  %v607_v25 = vpop.f32.mrf.mxu0  ;;  %v485_v29 = vmul.f32 %v460_v56, %v6198_v55  ;;  %v501_v55 = vmul.f32 %v6140_v62, %v482_v1 }
 0x1b7   :  { %v503_v59 = vmul.f32 %v6140_v62, %v484_v40  ;;  %v6353_v61 = vadd.f32 %v6258_v28, %v607_v25 }
 0x1b8   :  { %v435_v3 = vsub.f32 1.5, %v434_v18  ;;  %v504_v51 = vmul.f32 %v6140_v62, %v485_v29  ;;  %v520_v22 = vadd.f32 %v6147_v9, %v501_v55 }
 0x1b9   :  { %v522_v49 = vadd.f32 %v6147_v9, %v503_v59  ;;  %690 = vrot.lane.b32.xlu0 %v6353_v61, %s5844_s4  ;;  %v6456_v40 = vpack.i.bf16 %v6318_v32, %v6353_v61  ;;  %v6489_v59 = vpack.i.bf16 %v6264_v2, %v6417_v39 }
 0x1ba   :  { %v5372_v42 = vpop.eup %5371  ;;  %v436_v63 = vmul.f32 %v5370_v35, %v435_v3  ;;  %v523_v10 = vadd.f32 %v6147_v9, %v504_v51 }
 0x1bb   :  { %v462_v5 = vmul.f32 %v5372_v42, %v310_v44  ;;  %4901 = vmatmul.msk.f32.vlgmr.msra.gmra.mxu3 %vm127_vm0, %v522_v49  ;;  %vm468_vm3 = vweird.f32 %v5372_v42  ;;  %8624 = vst [vmem:[#allocation20_spill] sm:$0xff] %v6456_v40 }
 0x1bc   :  { %4898 = vmatmul.msk.f32.gmra.mxu0 %vm127_vm0, %v519_v0  ;;  %v440_v53 = vsel %vm439_vm1, %v5370_v35, %v436_v63  ;;  %vm469_vm4 = vmor %vm467_vm2, %vm468_vm3 }
 0x1bd   :  { %v463_v52 = vmul.f32 %v5372_v42, %v462_v5  ;;  %v483_v7 = vmul.f32 %v440_v53, %v6214_v11 }
 0x1bf   :  { %v464_v26 = vmul.f32 0.5, %v463_v52  ;;  %v502_v50 = vmul.f32 %v6140_v62, %v483_v7 }
 0x1c1   :  { %v465_v8 = vsub.f32 1.5, %v464_v26  ;;  %v521_v15 = vadd.f32 %v6147_v9, %v502_v50 }
 0x1c3   :  { %v466_v54 = vmul.f32 %v5372_v42, %v465_v8  ;;  %4902 = vmatmul.msk.f32.gmra.mxu3 %vm127_vm0, %v523_v10 }
 0x1c4   :  { %4899 = vmatmul.msk.f32.gmra.mxu0 %vm127_vm0, %v520_v22 }
 0x1c5   :  { %v470_v12 = vsel %vm469_vm4, %v5372_v42, %v466_v54 }
 0x1c6   :  { %v610_v13 = vpop.f32.mrf.mxu0  ;;  %v486_v14 = vmul.f32 %v470_v12, %v6226_v43 }
 0x1c7   :  { %v6435_v4 = vadd.f32 %v6258_v28, %v610_v13 }
 0x1c8   :  { %v505_v11 = vmul.f32 %v6140_v62, %v486_v14 }
 0x1c9   :  { %8621 = vst [vmem:[#allocation17_spill] sm:$0xff] %v6435_v4 }
 0x1ca   :  { %v524_v34 = vadd.f32 %v6147_v9, %v505_v11 }
 0x1cc   :  { %4900 = vmatmul.msk.f32.gmra.mxu0 %vm127_vm0, %v521_v15  ;;  %4903 = vmatmul.msk.f32.gmra.mxu3 %vm127_vm0, %v524_v34 }
 0x1ce   :  { %v613_v16 = vpop.f32.mrf.mxu0 }
 0x1cf   :  { %v6378_v27 = vadd.f32 %v6258_v28, %v613_v16 }
 0x1d1   :  { %727 = vrot.lane.b32.xlu1 %v6378_v27, %s5844_s4  ;;  %v6447_v30 = vpack.i.bf16 %v6435_v4, %v6378_v27 }
 0x1d3   :  { %8623 = vst [vmem:[#allocation19_spill] sm:$0xff] %v6447_v30 }
 0x1d6   :  { %v616_v6 = vpop.f32.mrf.mxu0 }
 0x1d7   :  { %v6383_v43 = vadd.f32 %v6258_v28, %v616_v6 }
 0x1d9   :  { %762 = vrot.lane.b32.xlu0 %v6383_v43, %s5844_s4 }
 0x213   :  { %v6387_v9 = vpop.permute.xlu0 %650 }
 0x220   :  { %v619_v62 = vpop.f32.mrf.mxu0 }
 0x221   :  { %v6430_v47 = vadd.f32 %v6258_v28, %v619_v62 }
 0x223   :  { %v689_v57 = vpop.permute.xlu1 %688  ;;  %v6439_v48 = vpack.i.bf16 %v6383_v43, %v6430_v47 }
 0x225   :  { %8622 = vst [vmem:[#allocation18_spill] sm:$0xff] %v6439_v48 }
 0x229   :  { %v622_v19 = vpop.f32.mrf.mxu0 }
 0x22a   :  { %v6390_v21 = vadd.f32 %v6258_v28, %v622_v19 }
 0x22b   :  { %v691_v24 = vpop.permute.xlu0 %690 }
 0x22c   :  { %8620 = vst [vmem:[#allocation16_spill] sm:$0xff] %v6390_v21  ;;  %799 = vrot.lane.b32.xlu1 %v6390_v21, %s5844_s4  ;;  %4908 = vmatpush.xpose.msk.msra.mxu2 %vm654_vm5, %v691_v24 }
 0x230   :  { %4909 = vmatpush.xpose.msk.msra.mxu2 %vm654_vm5, %v689_v57 }
 0x231   :  { %v625_v23 = vpop.f32.mrf.mxu0 }
 0x232   :  { %v6397_v58 = vadd.f32 %v6258_v28, %v625_v23  ;;  %v646_v23 = vld [vmem:[#allocation7] sm:$0xff] }
 0x233   :  { %4910 = vmatmul.msk.f32.vlgmr.msra.gmra.mxu2 %vm654_vm5, %v6318_v32 }
 0x234   :  { %801 = vrot.lane.b32.xlu0 %v6397_v58, %s5844_s4  ;;  %v6474_v31 = vpack.i.bf16 %v6390_v21, %v6397_v58 }
 0x236   :  { %8626 = vst [vmem:[#allocation22_spill] sm:$0xff] %v6474_v31 }
 0x239   :  { %v628_v33 = vpop.f32.mrf.mxu0 }
 0x23a   :  { %v6404_v35 = vadd.f32 %v6258_v28, %v628_v33 }
 0x23b   :  { %4911 = vmatmul.msk.f32.gmra.mxu2 %vm654_vm5, %v6353_v61 }
 0x23c   :  { %836 = vrot.lane.b32.xlu1 %v6404_v35, %s5844_s4 }
 0x23e   :  { %v637_v37 = vpop.f32.mrf.mxu3 }
 0x23f   :  { %v6411_v38 = vadd.f32 %v6258_v28, %v637_v37 }
 0x241   :  { %v631_v41 = vpop.f32.mrf.mxu0  ;;  %875 = vrot.lane.b32.xlu2 %v6411_v38, %s5844_s4 }
 0x242   :  { %v6452_v17 = vadd.f32 %v6258_v28, %v631_v41 }
 0x243   :  { %v728_v49 = vpop.permute.xlu1 %727 }
 0x244   :  { %v6464_v18 = vpack.i.bf16 %v6404_v35, %v6452_v17 }
 0x246   :  { %v640_v44 = vpop.f32.mrf.mxu3  ;;  %8625 = vst [vmem:[#allocation21_spill] sm:$0xff] %v6464_v18 }
 0x247   :  { %v6420_v45 = vadd.f32 %v6258_v28, %v640_v44 }
 0x249   :  { %v634_v46 = vpop.f32.mrf.mxu0  ;;  %652 = vrot.lane.b32.xlu2 %v6417_v39, %s5844_s4  ;;  %910 = vrot.lane.b32.xlu1 %v6420_v45, %s5844_s4 }
 0x24a   :  { %v6427_v36 = vadd.f32 %v6258_v28, %v634_v46  ;;  %v6590_v46 = vld [vmem:[#allocation7 + $0x8] sm:$0xff] }
 0x24b   :  { %v763_v3 = vpop.permute.xlu0 %762 }
 0x24c   :  { %873 = vrot.lane.b32.xlu0 %v6427_v36, %s5844_s4  ;;  %v6578_v19 = vpack.i.bf16 %v6427_v36, %v6411_v38 }
 0x24e   :  { %8628 = vst [vmem:[#allocation24_spill] sm:$0xff] %v6578_v19 }
 0x24f   :  { %v643_v56 = vpop.f32.mrf.mxu3 }
 0x250   :  { %v6479_v25 = vadd.f32 %v6258_v28, %v643_v56 }
 0x251   :  { %725 = vrot.lane.b32.xlu2 %v6435_v4, %s5844_s4  ;;  %5182 = vrot.lane.b32.xlu1 %v6439_v48, %s5845_s23 }
 0x252   :  { %v6511_v28 = vpack.i.bf16 %v6420_v45, %v6479_v25 }
 0x254   :  { %5177 = vrot.lane.b32.xlu0 %v6447_v30, %s5845_s23  ;;  %8627 = vst [vmem:[#allocation23_spill] sm:$0xff] %v6511_v28 }
 0x259   :  { %764 = vrot.lane.b32.xlu2 %v6430_v47, %s5844_s4  ;;  %5187 = vrot.lane.b32.xlu1 %v6456_v40, %s5845_s23 }
 0x25c   :  { %5192 = vrot.lane.b32.xlu0 %v6464_v18, %s5845_s23 }
 0x261   :  { %1450 = vrot.lane.b32.xlu1 %v6353_v61, %s5846_s24  ;;  %838 = vrot.lane.b32.xlu2 %v6452_v17, %s5844_s4 }
 0x264   :  { %5197 = vrot.lane.b32.xlu0 %v6474_v31, %s5845_s23 }
 0x269   :  { %1444 = vrot.lane.b32.xlu1 %v6318_v32, %s5847_s25  ;;  %912 = vrot.lane.b32.xlu2 %v6479_v25, %s5844_s4 }
 0x26c   :  { %1411 = vrot.lane.b32.xlu0 %v6417_v39, %s5846_s24 }
 0x271   :  { %1561 = vrot.lane.b32.xlu1 %v6390_v21, %s5847_s25  ;;  %5172 = vrot.lane.b32.xlu2 %v6489_v59, %s5845_s23 }
 0x274   :  { %1528 = vrot.lane.b32.xlu0 %v6430_v47, %s5846_s24 }
 0x279   :  { %1409 = vrot.lane.b32.xlu2 %v6264_v2, %s5846_s24 }
 0x27c   :  { %1489 = vrot.lane.b32.xlu0 %v6378_v27, %s5846_s24 }
 0x281   :  { %1448 = vrot.lane.b32.xlu2 %v6318_v32, %s5846_s24 }
 0x284   :  { %1522 = vrot.lane.b32.xlu0 %v6383_v43, %s5847_s25 }
 0x289   :  { %1405 = vrot.lane.b32.xlu2 %v6264_v2, %s5847_s25 }
 0x28c   :  { %1483 = vrot.lane.b32.xlu0 %v6435_v4, %s5847_s25 }
 0x291   :  { %5202 = vrot.lane.b32.xlu2 %v6511_v28, %s5845_s23 }
 0x294   :  { %1645 = vrot.lane.b32.xlu0 %v6411_v38, %s5846_s24 }
 0x299   :  { %1407 = vrot.lane.b32.xlu2 %v6417_v39, %s5847_s25 }
 0x29b   :  { %v876_v60 = vpop.permute.xlu2 %875 }
 0x29e   :  { %v800_v63 = vpop.permute.xlu1 %799 }
 0x2a1   :  { %1446 = vrot.lane.b32.xlu2 %v6353_v61, %s5847_s25 }
 0x2a3   :  { %v653_v29 = vpop.permute.xlu2 %652 }
 0x2a4   :  { %4904 = vmatpush.xpose.msk.msrb.mxu3 %vm654_vm5, %v653_v29 }
 0x2a6   :  { %v802_v42 = vpop.permute.xlu0 %801 }
 0x2a7   :  { %4920 = vmatpush.xpose.msk.msrb.mxu2 %vm654_vm5, %v802_v42 }
 0x2a8   :  { %4905 = vmatpush.xpose.msk.msrb.mxu3 %vm654_vm5, %v6387_v9 }
 0x2a9   :  { %1567 = vrot.lane.b32.xlu2 %v6397_v58, %s5846_s24 }
 0x2ab   :  { %4921 = vmatpush.xpose.msk.msrb.mxu2 %vm654_vm5, %v800_v63  ;;  %v726_v0 = vpop.permute.xlu2 %725  ;;  %4906 = vmatmul.msk.f32.vlgmr.msrb.gmra.mxu3 %vm654_vm5, %v6264_v2 }
 0x2ac   :  { %4912 = vmatpush.xpose.msk.msra.mxu3 %vm654_vm5, %v728_v49 }
 0x2ae   :  { %4922 = vmatmul.msk.f32.vlgmr.msrb.gmra.mxu2 %vm654_vm5, %v6390_v21  ;;  %v837_v1 = vpop.permute.xlu1 %836 }
 0x2b0   :  { %4913 = vmatpush.xpose.msk.msra.mxu3 %vm654_vm5, %v726_v0 }
 0x2b1   :  { %1526 = vrot.lane.b32.xlu2 %v6383_v43, %s5846_s24 }
 0x2b3   :  { %v765_v5 = vpop.permute.xlu2 %764  ;;  %4907 = vmatmul.msk.f32.gmra.mxu3 %vm654_vm5, %v6417_v39 }
 0x2b4   :  { %4916 = vmatpush.xpose.msk.msra.mxu1 %vm654_vm5, %v765_v5  ;;  %5132 = vmatpush.xpose.msk.msrb.mxu3 %vm654_vm5, %v765_v5 }
 0x2b6   :  { %4923 = vmatmul.msk.f32.gmra.mxu2 %vm654_vm5, %v6397_v58  ;;  %v717_v44 = vpop.f32.mrf.mxu2 }
 0x2b7   :  { %v6603_v0 = vadd.f32 %v717_v44, %v646_v23 }
 0x2b8   :  { %4917 = vmatpush.xpose.msk.msra.mxu1 %vm654_vm5, %v763_v3  ;;  %5133 = vmatpush.xpose.msk.msrb.mxu3 %vm654_vm5, %v763_v3 }
 0x2b9   :  { %1565 = vrot.lane.b32.xlu2 %v6390_v21, %s5846_s24 }
 0x2bb   :  { %v911_v52 = vpop.permute.xlu1 %910  ;;  %v839_v51 = vpop.permute.xlu2 %838  ;;  %4914 = vmatmul.msk.f32.vlgmr.msra.gmra.mxu3 %vm654_vm5, %v6435_v4  ;;  %4918 = vmatmul.msk.f32.vlgmr.msra.gmra.mxu1 %vm654_vm5, %v6383_v43 }
 0x2bc   :  { %4928 = vmatpush.xpose.msk.msrb.mxu1 %vm654_vm5, %v876_v60  ;;  %4924 = vmatpush.xpose.msk.msra.mxu3 %vm654_vm5, %v839_v51 }
 0x2be   :  { %v874_v53 = vpop.permute.xlu0 %873 }
 0x2c0   :  { %4929 = vmatpush.xpose.msk.msrb.mxu1 %vm654_vm5, %v874_v53  ;;  %4925 = vmatpush.xpose.msk.msra.mxu3 %vm654_vm5, %v837_v1 }
 0x2c1   :  { %1487 = vrot.lane.b32.xlu2 %v6435_v4, %s5846_s24 }
 0x2c3   :  { %v5183_v55 = vpop.permute.xlu1 %5182  ;;  %v913_v26 = vpop.permute.xlu2 %912  ;;  %4915 = vmatmul.msk.f32.gmra.mxu3 %vm654_vm5, %v6378_v27  ;;  %4930 = vmatmul.msk.f32.vlgmr.msrb.gmra.mxu1 %vm654_vm5, %v6427_v36 }
 0x2c4   :  { %4932 = vmatpush.xpose.msk.msra.mxu2 %vm654_vm5, %v913_v26  ;;  %v5184_v16 = vunpack.i.l.bf16 %v5183_v55  ;;  %v5185_v6 = vunpack.i.h.bf16 %v5183_v55  ;;  %v952_v55 = vsel %vm945_vm6, %v6603_v0, -inf }
 0x2c6   :  { %v5178_v7 = vpop.permute.xlu0 %5177 }
 0x2c7   :  { %v5179_v8 = vunpack.i.l.bf16 %v5178_v7  ;;  %v5180_v10 = vunpack.i.h.bf16 %v5178_v7 }
 0x2c8   :  { %4933 = vmatpush.xpose.msk.msra.mxu2 %vm654_vm5, %v911_v52  ;;  %v720_v52 = vpop.f32.mrf.mxu2 }
 0x2c9   :  { %1524 = vrot.lane.b32.xlu2 %v6430_v47, %s5847_s25  ;;  %v6614_v26 = vadd.f32 %v720_v52, %v6590_v46 }
 0x2cb   :  { %v5188_v22 = vpop.permute.xlu1 %5187  ;;  %v5173_v54 = vpop.permute.xlu2 %5172  ;;  %4919 = vmatmul.msk.f32.vlgmr.msrb.gmra.mxu3 %vm654_vm5, %v6430_v47  ;;  %4931 = vmatmul.msk.f32.gmra.mxu1 %vm654_vm5, %v6411_v38 }
 0x2cc   :  { %1218 = vmatpush.msrb.mxu2 %v5179_v8  ;;  %v5189_v50 = vunpack.i.l.bf16 %v5188_v22  ;;  %v5174_v12 = vunpack.i.l.bf16 %v5173_v54  ;;  %v5190_v13 = vunpack.i.h.bf16 %v5188_v22  ;;  %v5175_v14 = vunpack.i.h.bf16 %v5173_v54 }
 0x2cd   :  { %4934 = vmatmul.msk.f32.vlgmr.msra.gmra.mxu2 %vm654_vm5, %v6420_v45  ;;  %v955_v54 = vsel %vm945_vm6, %v6614_v26, -inf }
 0x2ce   :  { %1219 = vmatpush.msrb.mxu2 %v5180_v10  ;;  %v5193_v15 = vpop.permute.xlu0 %5192  ;;  %1148 = vmatpush.msrb.mxu3 %v5174_v12 }
 0x2cf   :  { %1183 = vmatpush.msra.mxu1 %v5189_v50  ;;  %v5194_v11 = vunpack.i.l.bf16 %v5193_v15  ;;  %v5195_v34 = vunpack.i.h.bf16 %v5193_v15 }
 0x2d0   :  { %1149 = vmatpush.msrb.mxu3 %v5175_v14 }
 0x2d1   :  { %1184 = vmatpush.msra.mxu1 %v5190_v13  ;;  %1323 = vmatpush.msra.mxu2 %v5194_v11 }
 0x2d2   :  { %1563 = vrot.lane.b32.xlu2 %v6397_v58, %s5847_s25 }
 0x2d3   :  { %1324 = vmatpush.msra.mxu2 %v5195_v34  ;;  %4926 = vmatmul.msk.f32.vlgmr.msra.gmra.mxu3 %vm654_vm5, %v6404_v35  ;;  %v6584_v57 = vpop.permute.xlu2 %1409 }
 0x2d4   :  { %1253 = vmatpush.msra.mxu3 %v5184_v16 }
 0x2d5   :  { %4935 = vmatmul.msk.f32.gmra.mxu2 %vm654_vm5, %v6479_v25 }
 0x2d6   :  { %1254 = vmatpush.msra.mxu3 %v5185_v6  ;;  %v5198_v62 = vpop.permute.xlu0 %5197 }
 0x2d7   :  { %v5199_v9 = vunpack.i.l.bf16 %v5198_v62  ;;  %v5200_v24 = vunpack.i.h.bf16 %v5198_v62 }
 0x2d9   :  { %1288 = vmatpush.msrb.mxu1 %v5199_v9 }
 0x2da   :  { %5207 = vrot.lane.b32.xlu2 %v6578_v19, %s5845_s23 }
 0x2db   :  { %1289 = vmatpush.msrb.mxu1 %v5200_v24  ;;  %4927 = vmatmul.msk.f32.gmra.mxu3 %vm654_vm5, %v6452_v17  ;;  %v6592_v60 = vpop.permute.xlu2 %1448 }
 0x2e3   :  { %v6607_v51 = vpop.permute.xlu2 %1405 }
 0x2eb   :  { %v6623_v50 = vpop.permute.xlu2 %5202 }
 0x2f3   :  { %v6634_v6 = vpop.permute.xlu2 %1407 }
 0x2f4   :  { %8629 = vst [vmem:[#allocation25_spill] sm:$0xff] %v6634_v6 }
 0x2fb   :  { %v6654_v52 = vpop.permute.xlu2 %1446 }
 0x2fc   :  { %8630 = vst [vmem:[#allocation26_spill] sm:$0xff] %v6654_v52 }
 0x32e   :  { %v680_v33 = vpop.f32.mrf.mxu3 }
 0x32f   :  { %v6586_v37 = vadd.f32 %v680_v33, %v646_v23 }
 0x331   :  { %v946_v41 = vsel %vm945_vm6, %v6586_v37, -inf  ;;  %v828_v10 = vpop.f32.mrf.mxu2 }
 0x332   :  { %947 = vmax.xlane.f32.xlu0 %v946_v41  ;;  %v6625_v12 = vadd.f32 %v828_v10, %v646_v23 }
 0x334   :  { %v970_v34 = vsel %vm945_vm6, %v6625_v12, -inf }
 0x336   :  { %v683_v56 = vpop.f32.mrf.mxu3 }
 0x337   :  { %v6595_v3 = vadd.f32 %v683_v56, %v6590_v46 }
 0x338   :  { %v791_v49 = vpop.f32.mrf.mxu1 }
 0x339   :  { %v6597_v29 = vadd.f32 %v791_v49, %v646_v23  ;;  %v949_v42 = vsel %vm945_vm6, %v6595_v3, -inf  ;;  %v831_v16 = vpop.f32.mrf.mxu2 }
 0x33a   :  { %950 = vmax.xlane.f32.xlu2 %v949_v42  ;;  %v6637_v62 = vadd.f32 %v831_v16, %v6590_v46 }
 0x33b   :  { %v964_v63 = vsel %vm945_vm6, %v6597_v29, -inf }
 0x33c   :  { %965 = vmax.xlane.f32.xlu0 %v964_v63  ;;  %v973_v44 = vsel %vm945_vm6, %v6637_v62, -inf }
 0x33e   :  { %v754_v1 = vpop.f32.mrf.mxu3 }
 0x33f   :  { %v6605_v5 = vadd.f32 %v754_v1, %v646_v23 }
 0x340   :  { %v902_v15 = vpop.f32.mrf.mxu1 }
 0x341   :  { %v958_v53 = vsel %vm945_vm6, %v6605_v5, -inf  ;;  %v6639_v9 = vadd.f32 %v902_v15, %v646_v23 }
 0x342   :  { %959 = vmax.xlane.f32.xlu1 %v958_v53  ;;  %953 = vmax.xlane.f32.xlu2 %v952_v55 }
 0x343   :  { %v982_v49 = vsel %vm945_vm6, %v6639_v9, -inf }
 0x346   :  { %v757_v7 = vpop.f32.mrf.mxu3 }
 0x347   :  { %v6617_v8 = vadd.f32 %v757_v7, %v6590_v46 }
 0x348   :  { %v905_v42 = vpop.f32.mrf.mxu1 }
 0x349   :  { %v961_v22 = vsel %vm945_vm6, %v6617_v8, -inf  ;;  %v6652_v1 = vadd.f32 %v905_v42, %v6590_v46  ;;  %v6690_v42 = vpop.permute.xlu1 %1450 }
 0x34a   :  { %962 = vmax.xlane.f32.xlu1 %v961_v22  ;;  %956 = vmax.xlane.f32.xlu2 %v955_v54  ;;  %v6663_v22 = vpop.permute.xlu2 %1567 }
 0x34b   :  { %v985_v7 = vsel %vm945_vm6, %v6652_v1, -inf }
 0x34e   :  { %v794_v13 = vpop.f32.mrf.mxu3 }
 0x34f   :  { %v6628_v14 = vadd.f32 %v794_v13, %v6590_v46  ;;  %v6667_v13 = vpop.permute.xlu0 %1411 }
 0x350   :  { %v939_v56 = vpop.f32.mrf.mxu2 }
 0x351   :  { %v967_v11 = vsel %vm945_vm6, %v6628_v14, -inf  ;;  %v6649_v63 = vadd.f32 %v939_v56, %v646_v23 }
 0x352   :  { %968 = vmax.xlane.f32.xlu0 %v967_v11  ;;  %971 = vmax.xlane.f32.xlu2 %v970_v34  ;;  %v6674_v34 = vpop.permute.xlu2 %1526 }
 0x353   :  { %v988_v53 = vsel %vm945_vm6, %v6649_v63, -inf }
 0x356   :  { %v865_v24 = vpop.f32.mrf.mxu3 }
 0x357   :  { %v6641_v33 = vadd.f32 %v865_v24, %v646_v23  ;;  %v6676_v16 = vpop.permute.xlu0 %1528 }
 0x358   :  { %v942_v54 = vpop.f32.mrf.mxu2 }
 0x359   :  { %v976_v41 = vsel %vm945_vm6, %v6641_v33, -inf  ;;  %v6670_v15 = vadd.f32 %v942_v54, %v6590_v46 }
 0x35a   :  { %977 = vmax.xlane.f32.xlu1 %v976_v41  ;;  %974 = vmax.xlane.f32.xlu2 %v973_v44  ;;  %v6678_v24 = vpop.permute.xlu2 %1565 }
 0x35b   :  { %983 = vmax.xlane.f32.xlu0 %v982_v49  ;;  %v991_v11 = vsel %vm945_vm6, %v6670_v15, -inf }
 0x35e   :  { %v868_v55 = vpop.f32.mrf.mxu3 }
 0x35f   :  { %v6661_v10 = vadd.f32 %v868_v55, %v6590_v46  ;;  %v6680_v41 = vpop.permute.xlu0 %1489 }
 0x361   :  { %v979_v23 = vsel %vm945_vm6, %v6661_v10, -inf }
 0x362   :  { %989 = vmax.xlane.f32.xlu1 %v988_v53  ;;  %v6682_v44 = vpop.permute.xlu2 %1487 }
 0x363   :  { %986 = vmax.xlane.f32.xlu0 %v985_v7  ;;  %v6696_v7 = vpop.permute.xlu1 %1444 }
 0x367   :  { %v6684_v56 = vpop.permute.xlu0 %1522 }
 0x368   :  { %8631 = vst [vmem:[#allocation27_spill] sm:$0xff] %v6684_v56 }
 0x36a   :  { %980 = vmax.xlane.f32.xlu1 %v979_v23  ;;  %v6686_v49 = vpop.permute.xlu2 %1524 }
 0x36b   :  { %8632 = vst [vmem:[#allocation28_spill] sm:$0xff] %v6686_v49  ;;  %v6701_v19 = vpop.permute.xlu1 %1561 }
 0x36c   :  { %8635 = vst [vmem:[#allocation31_spill] sm:$0xff] %v6701_v19 }
 0x36f   :  { %v6688_v46 = vpop.permute.xlu0 %1483 }
 0x370   :  { %8633 = vst [vmem:[#allocation29_spill] sm:$0xff] %v6688_v46 }
 0x372   :  { %992 = vmax.xlane.f32.xlu1 %v991_v11  ;;  %v6692_v53 = vpop.permute.xlu2 %1563 }
 0x373   :  { %8634 = vst [vmem:[#allocation30_spill] sm:$0xff] %v6692_v53 }
 0x377   :  { %v6694_v55 = vpop.permute.xlu0 %1645 }
 0x37a   :  { %v6698_v23 = vpop.permute.xlu2 %5207 }
 0x3a5   :  { %v948_v54 = vpop.xlane.xlu0 %947 }
 0x3a6   :  { %v994_v11 = vsub.f32 %v6586_v37, %v948_v54 }
 0x3a8   :  { %v1010_v20 = vmul.f32 1.442695, %v994_v11 }
 0x3aa   :  { %5373 = vpow2.f32 %v1010_v20 }
 0x3ad   :  { %v951_v48 = vpop.xlane.xlu2 %950 }
 0x3ae   :  { %v995_v31 = vsub.f32 %v6595_v3, %v951_v48 }
 0x3af   :  { %v966_v40 = vpop.xlane.xlu0 %965 }
 0x3b0   :  { %v6704_v18 = vpop.eup %5373  ;;  %v1012_v30 = vmul.f32 1.442695, %v995_v31  ;;  %v1000_v46 = vsub.f32 %v6597_v29, %v966_v40 }
 0x3b1   :  { %v1042_v49 = vsel %vm945_vm6, %v6704_v18, 0.0 }
 0x3b2   :  { %5375 = vpow2.f32 %v1012_v30  ;;  %1043 = vadd.xlane.f32.xlu0 %v1042_v49  ;;  %v1022_v53 = vmul.f32 1.442695, %v1000_v46 }
 0x3b4   :  { %5377 = vpow2.f32 %v1022_v53 }
 0x3b5   :  { %v960_v37 = vpop.xlane.xlu1 %959  ;;  %v954_v54 = vpop.xlane.xlu2 %953 }
 0x3b6   :  { %v996_v20 = vsub.f32 %v6603_v0, %v954_v54  ;;  %v998_v53 = vsub.f32 %v6605_v5, %v960_v37 }
 0x3b8   :  { %v6710_v11 = vpop.eup %5375  ;;  %v1014_v48 = vmul.f32 1.442695, %v996_v20 }
 0x3b9   :  { %v1045_v3 = vsel %vm945_vm6, %v6710_v11, 0.0 }
 0x3ba   :  { %1046 = vadd.xlane.f32.xlu0 %v1045_v3  ;;  %5379 = vpow2.f32 %v1014_v48  ;;  %v6714_v29 = vpop.eup %5377  ;;  %v1018_v48 = vmul.f32 1.442695, %v998_v53 }
 0x3bb   :  { %v1060_v54 = vsel %vm945_vm6, %v6714_v29, 0.0 }
 0x3bd   :  { %v963_v40 = vpop.xlane.xlu1 %962  ;;  %v957_v31 = vpop.xlane.xlu2 %956 }
 0x3be   :  { %v999_v30 = vsub.f32 %v6617_v8, %v963_v40  ;;  %v997_v49 = vsub.f32 %v6614_v26, %v957_v31 }
 0x3c0   :  { %v1020_v46 = vmul.f32 1.442695, %v999_v30  ;;  %v1016_v56 = vmul.f32 1.442695, %v997_v49  ;;  %v6718_v0 = vpop.eup %5379 }
 0x3c1   :  { %v1048_v20 = vsel %vm945_vm6, %v6718_v0, 0.0 }
 0x3c2   :  { %5381 = vpow2.f32 %v1020_v46  ;;  %1061 = vadd.xlane.f32.xlu0 %v1060_v54  ;;  %1049 = vadd.xlane.f32.xlu1 %v1048_v20 }
 0x3c3   :  { %5383 = vpow2.f32 %v1016_v56 }
 0x3c4   :  { %5385 = vpow2.f32 %v1018_v48 }
 0x3c5   :  { %v969_v8 = vpop.xlane.xlu0 %968  ;;  %v972_v53 = vpop.xlane.xlu2 %971 }
 0x3c6   :  { %v1001_v26 = vsub.f32 %v6628_v14, %v969_v8  ;;  %v1002_v54 = vsub.f32 %v6625_v12, %v972_v53 }
 0x3c8   :  { %v6726_v3 = vpop.eup %5381  ;;  %v1024_v40 = vmul.f32 1.442695, %v1001_v26  ;;  %v1026_v48 = vmul.f32 1.442695, %v1002_v54 }
 0x3c9   :  { %v6728_v31 = vpop.eup %5383  ;;  %v1057_v5 = vsel %vm945_vm6, %v6726_v3, 0.0 }
 0x3ca   :  { %v1051_v37 = vsel %vm945_vm6, %v6728_v31, 0.0  ;;  %1058 = vadd.xlane.f32.xlu2 %v1057_v5  ;;  %5387 = vpow2.f32 %v1024_v40  ;;  %v6734_v56 = vpop.eup %5385 }
 0x3cb   :  { %1052 = vadd.xlane.f32.xlu1 %v1051_v37  ;;  %v1054_v14 = vsel %vm945_vm6, %v6734_v56, 0.0  ;;  %5389 = vpow2.f32 %v1026_v48 }
 0x3cd   :  { %v978_v46 = vpop.xlane.xlu1 %977  ;;  %v975_v40 = vpop.xlane.xlu2 %974 }
 0x3ce   :  { %v984_v8 = vpop.xlane.xlu0 %983  ;;  %v1004_v52 = vsub.f32 %v6641_v33, %v978_v46 }
 0x3cf   :  { %v1006_v5 = vsub.f32 %v6639_v9, %v984_v8 }
 0x3d0   :  { %v6736_v30 = vpop.eup %5387  ;;  %v1030_v53 = vmul.f32 1.442695, %v1004_v52 }
 0x3d1   :  { %v1063_v49 = vsel %vm945_vm6, %v6736_v30, 0.0  ;;  %v6752_v19 = vpop.eup %5389 }
 0x3d2   :  { %1064 = vadd.xlane.f32.xlu0 %v1063_v49  ;;  %v1034_v49 = vmul.f32 1.442695, %v1006_v5  ;;  %v1066_v12 = vsel %vm945_vm6, %v6752_v19, 0.0 }
 0x3d3   :  { %1055 = vadd.xlane.f32.xlu1 %v1054_v14  ;;  %v1003_v14 = vsub.f32 %v6637_v62, %v975_v40 }
 0x3d5   :  { %v990_v20 = vpop.xlane.xlu1 %989  ;;  %v1028_v6 = vmul.f32 1.442695, %v1003_v14 }
 0x3d6   :  { %v1008_v26 = vsub.f32 %v6649_v63, %v990_v20  ;;  %v6773_v20 = vpop.xlane.xlu0 %986 }
 0x3d8   :  { %v1038_v37 = vmul.f32 1.442695, %v1008_v26 }
 0x3da   :  { %5391 = vpow2.f32 %v1038_v37  ;;  %v5209_v37 = vunpack.i.l.bf16 %v6698_v23 }
 0x3db   :  { %5393 = vpow2.f32 %v1034_v49  ;;  %v5210_v49 = vunpack.i.h.bf16 %v6698_v23  ;;  %v5216_v23 = vpack.i.bf16 %v6353_v61, %v6378_v27 }
 0x3dc   :  { %5395 = vpow2.f32 %v1028_v6 }
 0x3dd   :  { %5397 = vpow2.f32 %v1030_v53  ;;  %v6775_v48 = vpop.xlane.xlu1 %980 }
 0x3e0   :  { %v6757_v63 = vpop.eup %5391 }
 0x3e1   :  { %v6759_v9 = vpop.eup %5393  ;;  %v1084_v62 = vsel %vm945_vm6, %v6757_v63, 0.0 }
 0x3e2   :  { %1639 = vrot.lane.b32.xlu2 %v6427_v36, %s5847_s25  ;;  %v6763_v54 = vpop.eup %5395  ;;  %v1078_v33 = vsel %vm945_vm6, %v6759_v9, 0.0 }
 0x3e3   :  { %v1069_v46 = vsel %vm945_vm6, %v6763_v54, 0.0  ;;  %v6769_v6 = vpop.eup %5397 }
 0x3e4   :  { %v1072_v52 = vsel %vm945_vm6, %v6769_v6, 0.0 }
 0x3e5   :  { %v6783_v14 = vpop.xlane.xlu1 %992 }
 0x3e6   :  { %1643 = vrot.lane.b32.xlu0 %v6427_v36, %s5846_s24 }
 0x3ec   :  { %1485 = vrot.lane.b32.xlu1 %v6378_v27, %s5847_s25 }
 0x40b   :  { %1067 = vadd.xlane.f32.xlu2 %v1066_v12 }
 0x410   :  { %1085 = vadd.xlane.f32.xlu0 %v1084_v62 }
 0x413   :  { %1079 = vadd.xlane.f32.xlu2 %v1078_v33 }
 0x416   :  { %1070 = vadd.xlane.f32.xlu1 %v1069_v46 }
 0x41b   :  { %1073 = vadd.xlane.f32.xlu2 %v1072_v52 }
 0x424   :  { %1606 = vrot.lane.b32.xlu0 %v6452_v17, %s5846_s24 }
 0x425   :  { %v1044_v8 = vpop.xlane.xlu0 %1043 }
 0x426   :  { %5399 = vrcp.f32 %v1044_v8 }
 0x42c   :  { %v5400_v26 = vpop.eup %5399  ;;  %1641 = vrot.lane.b32.xlu0 %v6411_v38, %s5847_s25 }
 0x42d   :  { %v1106_v40 = vmul.f32 %v5400_v26, %v6704_v18  ;;  %v1047_v5 = vpop.xlane.xlu0 %1046  ;;  %v5204_v26 = vunpack.i.l.bf16 %v6623_v50 }
 0x42e   :  { %5401 = vrcp.f32 %v1047_v5 }
 0x42f   :  { %1604 = vrot.lane.b32.xlu1 %v6404_v35, %s5846_s24  ;;  %4936 = vmatmul.msk.f32.vlgmr.msrb.gmra.mxu3 %vm945_vm6, %v1106_v40 }
 0x430   :  { %1358 = vmatpush.msrb.mxu3 %v5209_v37 }
 0x432   :  { %1359 = vmatpush.msrb.mxu3 %v5210_v49 }
 0x433   :  { %1600 = vrot.lane.b32.xlu2 %v6404_v35, %s5847_s25 }
 0x434   :  { %v5402_v18 = vpop.eup %5401  ;;  %1602 = vrot.lane.b32.xlu0 %v6452_v17, %s5847_s25 }
 0x435   :  { %v1062_v12 = vpop.xlane.xlu0 %1061  ;;  %v1107_v53 = vmul.f32 %v5402_v18, %v6710_v11  ;;  %v1050_v62 = vpop.xlane.xlu1 %1049 }
 0x436   :  { %5403 = vrcp.f32 %v1062_v12 }
 0x437   :  { %5405 = vrcp.f32 %v1050_v62  ;;  %1684 = vrot.lane.b32.xlu1 %v6479_v25, %s5846_s24  ;;  %4937 = vmatmul.msk.f32.gmra.mxu3 %vm945_vm6, %v1107_v53 }
 0x43b   :  { %1682 = vrot.lane.b32.xlu2 %v6420_v45, %s5846_s24 }
 0x43c   :  { %v5404_v33 = vpop.eup %5403  ;;  %5217 = vrot.lane.b32.xlu0 %v5216_v23, %s5848_s5 }
 0x43d   :  { %v5406_v46 = vpop.eup %5405  ;;  %v1112_v52 = vmul.f32 %v5404_v33, %v6714_v29  ;;  %v5205_v29 = vunpack.i.h.bf16 %v6623_v50  ;;  %v1059_v50 = vpop.xlane.xlu2 %1058 }
 0x43e   :  { %v1108_v11 = vmul.f32 %v5406_v46, %v6718_v0  ;;  %v1053_v8 = vpop.xlane.xlu1 %1052 }
 0x43f   :  { %5407 = vrcp.f32 %v1053_v8  ;;  %1678 = vrot.lane.b32.xlu1 %v6420_v45, %s5847_s25  ;;  %4942 = vmatmul.msk.f32.vlgmr.msra.gmra.mxu3 %vm945_vm6, %v1112_v52 }
 0x440   :  { %4938 = vmatmul.msk.f32.vlgmr.msra.gmra.mxu1 %vm945_vm6, %v1108_v11  ;;  %4956 = vmatpush.xpose.msk.msra.mxu3 %vm654_vm5, %v6690_v42 }
 0x441   :  { %1393 = vmatpush.msra.mxu1 %v5204_v26  ;;  %v5241_v26 = vpack.i.bf16 %v6404_v35, %v6427_v36 }
 0x443   :  { %1394 = vmatpush.msra.mxu1 %v5205_v29  ;;  %1680 = vrot.lane.b32.xlu2 %v6479_v25, %s5847_s25 }
 0x444   :  { %4957 = vmatpush.xpose.msk.msra.mxu3 %vm654_vm5, %v6592_v60  ;;  %2182 = vrot.lane.b32.xlu0 %v6417_v39, %s5849_s26 }
 0x445   :  { %v5408_v0 = vpop.eup %5407  ;;  %v1065_v5 = vpop.xlane.xlu0 %1064 }
 0x446   :  { %v1056_v40 = vpop.xlane.xlu1 %1055  ;;  %v1109_v37 = vmul.f32 %v5408_v0, %v6728_v31 }
 0x447   :  { %5409 = vrcp.f32 %v1056_v40 }
 0x448   :  { %5411 = vrcp.f32 %v1065_v5  ;;  %4939 = vmatmul.msk.f32.gmra.mxu1 %vm945_vm6, %v1109_v37 }
 0x449   :  { %5413 = vrcp.f32 %v1059_v50 }
 0x44c   :  { %2178 = vrot.lane.b32.xlu0 %v6417_v39, %s5850_s27 }
 0x44d   :  { %v5410_v42 = vpop.eup %5409 }
 0x44e   :  { %v5412_v60 = vpop.eup %5411  ;;  %v1110_v49 = vmul.f32 %v5410_v42, %v6734_v56  ;;  %v1007_v56 = vsub.f32 %v6652_v1, %v6773_v20  ;;  %v6914_v42 = vpack.i.bf16 %v6411_v38, %v6430_v47 }
 0x44f   :  { %v1113_v18 = vmul.f32 %v5412_v60, %v6736_v30  ;;  %v5414_v31 = vpop.eup %5413  ;;  %v1005_v30 = vsub.f32 %v6661_v10, %v6775_v48  ;;  %v6854_v48 = vpack.i.bf16 %v6390_v21, %v6318_v32 }
 0x450   :  { %4940 = vmatmul.msk.f32.vlgmr.msrb.gmra.mxu2 %vm945_vm6, %v1110_v49  ;;  %v1111_v12 = vmul.f32 %v5414_v31, %v6726_v3  ;;  %v1036_v53 = vmul.f32 1.442695, %v1007_v56  ;;  %v6846_v3 = vpop.permute.xlu2 %1639  ;;  %v5236_v49 = vpack.i.bf16 %v6452_v17, %v6383_v43 }
 0x451   :  { %4943 = vmatmul.msk.f32.gmra.mxu3 %vm945_vm6, %v1113_v18  ;;  %4952 = vmatpush.xpose.msk.msrb.mxu2 %vm654_vm5, %v6667_v13  ;;  %v1032_v62 = vmul.f32 1.442695, %v1005_v30 }
 0x452   :  { %5415 = vpow2.f32 %v1036_v53 }
 0x453   :  { %5417 = vpow2.f32 %v1032_v62 }
 0x454   :  { %2217 = vrot.lane.b32.xlu0 %v6353_v61, %s5850_s27 }
 0x455   :  { %4953 = vmatpush.xpose.msk.msrb.mxu2 %vm654_vm5, %v6584_v57 }
 0x458   :  { %4941 = vmatmul.msk.f32.gmra.mxu2 %vm945_vm6, %v1111_v12  ;;  %v6838_v13 = vpop.eup %5415  ;;  %v6858_v46 = vpop.permute.xlu0 %1643 }
 0x459   :  { %v6840_v57 = vpop.eup %5417  ;;  %v1081_v23 = vsel %vm945_vm6, %v6838_v13, 0.0 }
 0x45a   :  { %v1075_v1 = vsel %vm945_vm6, %v6840_v57, 0.0 }
 0x45e   :  { %v6848_v10 = vpop.permute.xlu1 %1485 }
 0x469   :  { %1082 = vadd.xlane.f32.xlu1 %v1081_v23 }
 0x46c   :  { %1076 = vadd.xlane.f32.xlu2 %v1075_v1 }
 0x47e   :  { %v1068_v20 = vpop.xlane.xlu2 %1067 }
 0x47f   :  { %5419 = vrcp.f32 %v1068_v20 }
 0x482   :  { %5212 = vrot.lane.b32.xlu1 %v6489_v59, %s5848_s5 }
 0x483   :  { %v1086_v0 = vpop.xlane.xlu0 %1085 }
 0x484   :  { %5227 = vrot.lane.b32.xlu2 %v6854_v48, %s5848_s5 }
 0x485   :  { %v5420_v33 = vpop.eup %5419 }
 0x486   :  { %v1114_v52 = vmul.f32 %v5420_v33, %v6752_v19  ;;  %v1080_v11 = vpop.xlane.xlu2 %1079  ;;  %v8636_v33 = vld [vmem:[#allocation26_spill] sm:$0xff] }
 0x487   :  { %5421 = vrcp.f32 %v1080_v11 }
 0x488   :  { %4944 = vmatmul.msk.f32.vlgmr.msrb.gmra.mxu1 %vm945_vm6, %v1114_v52  ;;  %v8638_v52 = vld [vmem:[#allocation31_spill] sm:$0xff] }
 0x489   :  { %v1071_v8 = vpop.xlane.xlu1 %1070  ;;  %4960 = vmatpush.xpose.msk.msrb.mxu1 %vm654_vm5, %v6680_v41 }
 0x48a   :  { %5423 = vrcp.f32 %v1071_v8  ;;  %v8639_v8 = vld [vmem:[#allocation27_spill] sm:$0xff] }
 0x48c   :  { %5242 = vrot.lane.b32.xlu2 %v5241_v26, %s5848_s5  ;;  %v8641_v26 = vld [vmem:[#allocation28_spill] sm:$0xff] }
 0x48d   :  { %v5422_v29 = vpop.eup %5421  ;;  %4961 = vmatpush.xpose.msk.msrb.mxu1 %vm654_vm5, %v6682_v44 }
 0x48e   :  { %v1118_v19 = vmul.f32 %v5422_v29, %v6759_v9  ;;  %v1074_v40 = vpop.xlane.xlu2 %1073 }
 0x48f   :  { %5425 = vrcp.f32 %v1074_v40 }
 0x490   :  { %v5424_v5 = vpop.eup %5423  ;;  %5427 = vrcp.f32 %v1086_v0  ;;  %4948 = vmatmul.msk.f32.vlgmr.msrb.gmra.mxu3 %vm945_vm6, %v1118_v19 }
 0x491   :  { %4968 = vmatpush.xpose.msk.msrb.mxu3 %vm654_vm5, %v6663_v22  ;;  %v1115_v41 = vmul.f32 %v5424_v5, %v6763_v54  ;;  %v1009_v22 = vsub.f32 %v6670_v15, %v6783_v14 }
 0x493   :  { %4945 = vmatmul.msk.f32.gmra.mxu1 %vm945_vm6, %v1115_v41  ;;  %v8642_v41 = vld [vmem:[#allocation29_spill] sm:$0xff] }
 0x494   :  { %2176 = vrot.lane.b32.xlu2 %v6264_v2, %s5850_s27 }
 0x495   :  { %v5426_v37 = vpop.eup %5425  ;;  %4969 = vmatpush.xpose.msk.msrb.mxu3 %vm654_vm5, %v6678_v24  ;;  %v1040_v24 = vmul.f32 1.442695, %v1009_v22 }
 0x496   :  { %v5428_v44 = vpop.eup %5427  ;;  %v1116_v9 = vmul.f32 %v5426_v37, %v6769_v6  ;;  %v1607_v54 = vpop.permute.xlu0 %1606 }
 0x497   :  { %v1120_v50 = vmul.f32 %v5428_v44, %v6757_v63  ;;  %5429 = vpow2.f32 %v1040_v24  ;;  %v5221_v63 = vpack.i.bf16 %v6397_v58, %v6435_v4 }
 0x498   :  { %4946 = vmatmul.msk.f32.vlgmr.msra.gmra.mxu2 %vm945_vm6, %v1116_v9 }
 0x499   :  { %4964 = vmatpush.xpose.msk.msra.mxu2 %vm654_vm5, %v6676_v16 }
 0x49b   :  { %4950 = vmatmul.msk.f32.vlgmr.msra.gmra.mxu1 %vm945_vm6, %v1120_v50 }
 0x49c   :  { %4972 = vmatpush.xpose.msk.msra.mxu1 %vm654_vm5, %v1607_v54  ;;  %2260 = vrot.lane.b32.xlu2 %v6378_v27, %s5849_s26 }
 0x49d   :  { %4965 = vmatpush.xpose.msk.msra.mxu2 %vm654_vm5, %v6674_v34  ;;  %v6895_v15 = vpop.eup %5429  ;;  %v6905_v34 = vpop.permute.xlu2 %1600 }
 0x49e   :  { %v1087_v16 = vsel %vm945_vm6, %v6895_v15, 0.0  ;;  %v1642_v1 = vpop.permute.xlu0 %1641 }
 0x4a1   :  { %v1605_v6 = vpop.permute.xlu1 %1604 }
 0x4a2   :  { %4973 = vmatpush.xpose.msk.msra.mxu1 %vm654_vm5, %v1605_v6 }
 0x4a4   :  { %2221 = vrot.lane.b32.xlu2 %v6353_v61, %s5849_s26 }
 0x4a5   :  { %v1683_v60 = vpop.permute.xlu2 %1682 }
 0x4a9   :  { %v1685_v14 = vpop.permute.xlu1 %1684 }
 0x4ac   :  { %1088 = vadd.xlane.f32.xlu1 %v1087_v16  ;;  %2338 = vrot.lane.b32.xlu2 %v6397_v58, %s5849_s26 }
 0x4ad   :  { %v1681_v31 = vpop.permute.xlu2 %1680 }
 0x4b1   :  { %v1679_v18 = vpop.permute.xlu1 %1678 }
 0x4b2   :  { %v6978_v22 = vpop.f32.mrf.mxu3 }
 0x4b3   :  { %8643 = vst [vmem:[#allocation26_spill] sm:$0xff] %v6978_v22 }
 0x4b4   :  { %2258 = vrot.lane.b32.xlu2 %v6435_v4, %s5849_s26 }
 0x4bc   :  { %2219 = vrot.lane.b32.xlu2 %v6318_v32, %s5849_s26 }
 0x4c4   :  { %2336 = vrot.lane.b32.xlu2 %v6390_v21, %s5849_s26 }
 0x4c5   :  { %5222 = vrot.lane.b32.xlu1 %v5221_v63, %s5848_s5  ;;  %v6982_v63 = vpop.f32.mrf.mxu3 }
 0x4cc   :  { %2215 = vrot.lane.b32.xlu2 %v6318_v32, %s5850_s27 }
 0x4cd   :  { %5232 = vrot.lane.b32.xlu1 %v6914_v42, %s5848_s5 }
 0x4d4   :  { %2256 = vrot.lane.b32.xlu2 %v6378_v27, %s5850_s27 }
 0x4d5   :  { %5237 = vrot.lane.b32.xlu1 %v5236_v49, %s5848_s5 }
 0x4dc   :  { %v1083_v12 = vpop.xlane.xlu1 %1082  ;;  %2416 = vrot.lane.b32.xlu2 %v6411_v38, %s5849_s26 }
 0x4dd   :  { %5431 = vrcp.f32 %v1083_v12  ;;  %2180 = vrot.lane.b32.xlu1 %v6264_v2, %s5849_s26 }
 0x4df   :  { %v1077_v56 = vpop.xlane.xlu2 %1076 }
 0x4e0   :  { %5433 = vrcp.f32 %v1077_v56 }
 0x4e3   :  { %v5432_v30 = vpop.eup %5431 }
 0x4e4   :  { %2377 = vrot.lane.b32.xlu2 %v6452_v17, %s5849_s26  ;;  %v1119_v53 = vmul.f32 %v5432_v30, %v6838_v13  ;;  %v1603_v13 = vpop.permute.xlu0 %1602 }
 0x4e5   :  { %5247 = vrot.lane.b32.xlu1 %v6511_v28, %s5848_s5 }
 0x4e6   :  { %v5434_v62 = vpop.eup %5433  ;;  %4949 = vmatmul.msk.f32.gmra.mxu3 %vm945_vm6, %v1119_v53 }
 0x4e7   :  { %v1117_v23 = vmul.f32 %v5434_v62, %v6840_v57  ;;  %v5228_v40 = vpop.permute.xlu2 %5227 }
 0x4e8   :  { %v5229_v37 = vunpack.i.l.bf16 %v5228_v40  ;;  %v5230_v50 = vunpack.i.h.bf16 %v5228_v40 }
 0x4e9   :  { %4947 = vmatmul.msk.f32.gmra.mxu2 %vm945_vm6, %v1117_v23 }
 0x4ed   :  { %2254 = vrot.lane.b32.xlu1 %v6435_v4, %s5850_s27 }
 0x4ee   :  { %4958 = vmatmul.msk.f32.vlgmr.msra.gmra.mxu3 %vm654_vm5, %v6696_v7 }
 0x4ef   :  { %4980 = vmatpush.xpose.msk.msra.mxu3 %vm654_vm5, %v1685_v14  ;;  %v5243_v54 = vpop.permute.xlu2 %5242 }
 0x4f0   :  { %v5244_v16 = vunpack.i.l.bf16 %v5243_v54  ;;  %v5245_v49 = vunpack.i.h.bf16 %v5243_v54 }
 0x4f1   :  { %4954 = vmatmul.msk.f32.vlgmr.msrb.gmra.mxu2 %vm654_vm5, %v6607_v51  ;;  %v8637_v51 = vld [vmem:[#allocation25_spill] sm:$0xff] }
 0x4f2   :  { %4976 = vmatpush.xpose.msk.msrb.mxu2 %vm654_vm5, %v6694_v55  ;;  %v5218_v55 = vpop.permute.xlu0 %5217  ;;  %8644 = vst [vmem:[#allocation25_spill] sm:$0xff] %v6982_v63 }
 0x4f3   :  { %4981 = vmatpush.xpose.msk.msra.mxu3 %vm654_vm5, %v1683_v60  ;;  %v5219_v11 = vunpack.i.l.bf16 %v5218_v55  ;;  %v5220_v5 = vunpack.i.h.bf16 %v5218_v55 }
 0x4f4   :  { %v5213_v57 = vpop.permute.xlu1 %5212 }
 0x4f5   :  { %2332 = vrot.lane.b32.xlu1 %v6390_v21, %s5850_s27  ;;  %v5214_v20 = vunpack.i.l.bf16 %v5213_v57  ;;  %v5215_v7 = vunpack.i.h.bf16 %v5213_v57 }
 0x4f6   :  { %4959 = vmatmul.msk.f32.gmra.mxu3 %vm654_vm5, %v8636_v33  ;;  %4977 = vmatpush.xpose.msk.msrb.mxu2 %vm654_vm5, %v6858_v46  ;;  %v8640_v46 = vld [vmem:[#allocation30_spill] sm:$0xff] }
 0x4f7   :  { %1919 = vmatpush.msrb.mxu0 %v5214_v20  ;;  %v7003_v20 = vld [vmem:[#allocation7 + $0x10] sm:$0xff] }
 0x4f9   :  { %1920 = vmatpush.msrb.mxu0 %v5215_v7  ;;  %4955 = vmatmul.msk.f32.gmra.mxu2 %vm654_vm5, %v8637_v51 }
 0x4fd   :  { %2299 = vrot.lane.b32.xlu1 %v6430_v47, %s5849_s26 }
 0x4fe   :  { %4970 = vmatmul.msk.f32.vlgmr.msrb.gmra.mxu3 %vm654_vm5, %v8638_v52 }
 0x501   :  { %4966 = vmatmul.msk.f32.vlgmr.msra.gmra.mxu2 %vm654_vm5, %v8639_v8 }
 0x502   :  { %1989 = vmatpush.msra.mxu2 %v5219_v11  ;;  %v7013_v11 = vpop.f32.mrf.mxu1 }
 0x503   :  { %8653 = vst [vmem:[#allocation35_spill] sm:$0xff] %v7013_v11 }
 0x505   :  { %2334 = vrot.lane.b32.xlu1 %v6397_v58, %s5850_s27 }
 0x506   :  { %4971 = vmatmul.msk.f32.gmra.mxu3 %vm654_vm5, %v8640_v46 }
 0x509   :  { %4967 = vmatmul.msk.f32.gmra.mxu2 %vm654_vm5, %v8641_v26  ;;  %v7017_v26 = vld [vmem:[#allocation7 + $0x18] sm:$0xff] }
 0x50e   :  { %4982 = vmatmul.msk.f32.vlgmr.msra.gmra.mxu3 %vm654_vm5, %v1679_v18 }
 0x511   :  { %4978 = vmatmul.msk.f32.vlgmr.msrb.gmra.mxu2 %vm654_vm5, %v6846_v3 }
 0x516   :  { %4983 = vmatmul.msk.f32.gmra.mxu3 %vm654_vm5, %v1681_v31  ;;  %v6987_v31 = vpop.f32.mrf.mxu3 }
 0x517   :  { %8645 = vst [vmem:[#allocation31_spill] sm:$0xff] %v6987_v31 }
 0x519   :  { %4979 = vmatmul.msk.f32.gmra.mxu2 %vm654_vm5, %v1642_v1 }
 0x51e   :  { %v6991_v30 = vpop.f32.mrf.mxu3 }
 0x51f   :  { %v1089_v29 = vpop.xlane.xlu1 %1088  ;;  %8647 = vst [vmem:[#allocation30_spill] sm:$0xff] %v6991_v30 }
 0x520   :  { %5435 = vrcp.f32 %v1089_v29 }
 0x526   :  { %v5436_v0 = vpop.eup %5435  ;;  %v6995_v23 = vpop.f32.mrf.mxu3 }
 0x527   :  { %v1121_v19 = vmul.f32 %v5436_v0, %v6895_v15  ;;  %8649 = vst [vmem:[#allocation29_spill] sm:$0xff] %v6995_v23 }
 0x529   :  { %4951 = vmatmul.msk.f32.gmra.mxu1 %vm945_vm6, %v1121_v19  ;;  %v7022_v19 = vpop.f32.mrf.mxu1 }
 0x52a   :  { %8654 = vst [vmem:[#allocation36_spill] sm:$0xff] %v7022_v19 }
 0x531   :  { %4962 = vmatmul.msk.f32.vlgmr.msrb.gmra.mxu1 %vm654_vm5, %v8642_v41  ;;  %v7026_v41 = vpop.f32.mrf.mxu1 }
 0x532   :  { %1954 = vmatpush.msrb.mxu1 %v5220_v5  ;;  %8655 = vst [vmem:[#allocation37_spill] sm:$0xff] %v7026_v41 }
 0x534   :  { %1955 = vmatpush.msrb.mxu1 %v5229_v37 }
 0x537   :  { %v5223_v3 = vpop.permute.xlu1 %5222 }
 0x538   :  { %v5225_v44 = vunpack.i.h.bf16 %v5223_v3  ;;  %v5224_v9 = vunpack.i.l.bf16 %v5223_v3 }
 0x539   :  { %4963 = vmatmul.msk.f32.gmra.mxu1 %vm654_vm5, %v6848_v10  ;;  %v7028_v3 = vpop.f32.mrf.mxu1 }
 0x53a   :  { %1990 = vmatpush.msra.mxu2 %v5224_v9  ;;  %2059 = vmatpush.msra.mxu0 %v5225_v44  ;;  %8656 = vst [vmem:[#allocation38_spill] sm:$0xff] %v7028_v3 }
 0x53c   :  { %2060 = vmatpush.msra.mxu0 %v5230_v50 }
 0x53f   :  { %v5233_v24 = vpop.permute.xlu1 %5232 }
 0x540   :  { %v5235_v6 = vunpack.i.h.bf16 %v5233_v24  ;;  %v5234_v15 = vunpack.i.l.bf16 %v5233_v24 }
 0x541   :  { %4974 = vmatmul.msk.f32.vlgmr.msra.gmra.mxu1 %vm654_vm5, %v6905_v34  ;;  %v6989_v34 = vpop.f32.mrf.mxu2 }
 0x542   :  { %2024 = vmatpush.msrb.mxu3 %v5234_v15  ;;  %2129 = vmatpush.msrb.mxu2 %v5235_v6  ;;  %8646 = vst [vmem:[#allocation27_spill] sm:$0xff] %v6989_v34  ;;  %v7038_v6 = vpop.f32.mrf.mxu1 }
 0x543   :  { %8657 = vst [vmem:[#allocation39_spill] sm:$0xff] %v7038_v6 }
 0x544   :  { %2130 = vmatpush.msrb.mxu2 %v5244_v16 }
 0x547   :  { %v5238_v10 = vpop.permute.xlu1 %5237 }
 0x548   :  { %v5240_v14 = vunpack.i.h.bf16 %v5238_v10  ;;  %v5239_v60 = vunpack.i.l.bf16 %v5238_v10 }
 0x549   :  { %4975 = vmatmul.msk.f32.gmra.mxu1 %vm654_vm5, %v1603_v13  ;;  %v6993_v62 = vpop.f32.mrf.mxu2 }
 0x54a   :  { %2025 = vmatpush.msrb.mxu3 %v5239_v60  ;;  %2094 = vmatpush.msra.mxu1 %v5240_v14  ;;  %8648 = vst [vmem:[#allocation28_spill] sm:$0xff] %v6993_v62 }
 0x54c   :  { %2095 = vmatpush.msra.mxu1 %v5245_v49 }
 0x54f   :  { %v6985_v18 = vpop.permute.xlu1 %2180 }
 0x551   :  { %v6997_v1 = vpop.f32.mrf.mxu2 }
 0x552   :  { %8650 = vst [vmem:[#allocation32_spill] sm:$0xff] %v6997_v1 }
 0x557   :  { %v5248_v12 = vpop.permute.xlu1 %5247 }
 0x558   :  { %v5249_v56 = vunpack.i.l.bf16 %v5248_v12  ;;  %v5250_v53 = vunpack.i.h.bf16 %v5248_v12 }
 0x55a   :  { %2164 = vmatpush.msra.mxu3 %v5249_v56  ;;  %v7052_v56 = vpop.permute.xlu2 %2176 }
 0x55c   :  { %2165 = vmatpush.msra.mxu3 %v5250_v53 }
 0x569   :  { %v6999_v13 = vpop.f32.mrf.mxu3 }
 0x56a   :  { %8651 = vst [vmem:[#allocation33_spill] sm:$0xff] %v6999_v13 }
 0x56c   :  { %v7001_v57 = vpop.f32.mrf.mxu2 }
 0x56d   :  { %8652 = vst [vmem:[#allocation34_spill] sm:$0xff] %v7001_v57 }
 0x571   :  { %v1477_v33 = vpop.f32.mrf.mxu3 }
 0x572   :  { %v7006_v7 = vadd.f32 %v1477_v33, %v7003_v20 }
 0x574   :  { %v1723_v51 = vsel %vm945_vm6, %v7006_v7, -inf  ;;  %v1438_v55 = vpop.f32.mrf.mxu2 }
 0x575   :  { %1724 = vmax.xlane.f32.xlu0 %v1723_v51  ;;  %v7011_v52 = vadd.f32 %v1438_v55, %v7003_v20 }
 0x577   :  { %v1717_v46 = vsel %vm945_vm6, %v7011_v52, -inf }
 0x579   :  { %v1480_v29 = vpop.f32.mrf.mxu3 }
 0x57a   :  { %v7020_v0 = vadd.f32 %v1480_v29, %v7017_v26 }
 0x57c   :  { %v1441_v8 = vpop.f32.mrf.mxu2  ;;  %v1726_v5 = vsel %vm945_vm6, %v7020_v0, -inf }
 0x57d   :  { %1718 = vmax.xlane.f32.xlu0 %v1717_v46  ;;  %v7057_v33 = vadd.f32 %v1441_v8, %v7017_v26 }
 0x581   :  { %v1594_v51 = vpop.f32.mrf.mxu3 }
 0x584   :  { %v1555_v40 = vpop.f32.mrf.mxu2 }
 0x585   :  { %1727 = vmax.xlane.f32.xlu0 %v1726_v5  ;;  %v1720_v5 = vsel %vm945_vm6, %v7057_v33, -inf  ;;  %v7072_v8 = vadd.f32 %v1555_v40, %v7003_v20 }
 0x58c   :  { %v1558_v37 = vpop.f32.mrf.mxu2 }
 0x594   :  { %v1672_v44 = vpop.f32.mrf.mxu2 }
 0x595   :  { %v7031_v9 = vadd.f32 %v1672_v44, %v7003_v20  ;;  %v7066_v44 = vpop.permute.xlu2 %2260 }
 0x597   :  { %v1753_v50 = vsel %vm945_vm6, %v7031_v9, -inf }
 0x598   :  { %1754 = vmax.xlane.f32.xlu0 %v1753_v50  ;;  %v7069_v50 = vadd.f32 %v1594_v51, %v7003_v20  ;;  %v7083_v51 = vadd.f32 %v1558_v37, %v7017_v26 }
 0x59c   :  { %v1675_v54 = vpop.f32.mrf.mxu2 }
 0x59d   :  { %v7036_v24 = vadd.f32 %v1675_v54, %v7017_v26  ;;  %v1597_v54 = vpop.f32.mrf.mxu3 }
 0x59f   :  { %v1756_v15 = vsel %vm945_vm6, %v7036_v24, -inf }
 0x5a0   :  { %1757 = vmax.xlane.f32.xlu0 %v1756_v15  ;;  %v1741_v15 = vsel %vm945_vm6, %v7069_v50, -inf }
 0x5a6   :  { %v7042_v16 = vpop.f32.mrf.mxu1 }
 0x5a7   :  { %8658 = vst [vmem:[#allocation40_spill] sm:$0xff] %v7042_v16 }
 0x5ae   :  { %v1516_v10 = vpop.f32.mrf.mxu1 }
 0x5af   :  { %v7045_v14 = vadd.f32 %v1516_v10, %v7003_v20  ;;  %v1735_v10 = vsel %vm945_vm6, %v7072_v8, -inf }
 0x5b1   :  { %v1729_v60 = vsel %vm945_vm6, %v7045_v14, -inf }
 0x5b2   :  { %1730 = vmax.xlane.f32.xlu2 %v1729_v60 }
 0x5b6   :  { %v1519_v49 = vpop.f32.mrf.mxu1 }
 0x5b7   :  { %v7050_v12 = vadd.f32 %v1519_v49, %v7017_v26  ;;  %v7078_v49 = vpop.permute.xlu0 %2182 }
 0x5b9   :  { %v1732_v53 = vsel %vm945_vm6, %v7050_v12, -inf }
 0x5ba   :  { %1733 = vmax.xlane.f32.xlu1 %v1732_v53  ;;  %v7080_v53 = vpop.permute.xlu2 %2221 }
 0x5be   :  { %v1633_v55 = vpop.f32.mrf.mxu1 }
 0x5bf   :  { %v7060_v46 = vadd.f32 %v1633_v55, %v7003_v20  ;;  %v7098_v37 = vpop.permute.xlu0 %2178 }
 0x5c1   :  { %v1747_v29 = vsel %vm945_vm6, %v7060_v46, -inf }
 0x5c2   :  { %1748 = vmax.xlane.f32.xlu2 %v1747_v29  ;;  %1721 = vmax.xlane.f32.xlu1 %v1720_v5  ;;  %v1738_v29 = vsel %vm945_vm6, %v7083_v51, -inf  ;;  %v1711_v5 = vpop.f32.mrf.mxu3  ;;  %v7100_v16 = vpop.permute.xlu2 %2338 }
 0x5c6   :  { %v1636_v60 = vpop.f32.mrf.mxu1 }
 0x5c7   :  { %v7086_v40 = vadd.f32 %v1636_v60, %v7017_v26 }
 0x5c9   :  { %v1750_v55 = vsel %vm945_vm6, %v7086_v40, -inf }
 0x5ca   :  { %1742 = vmax.xlane.f32.xlu2 %v1741_v15  ;;  %1736 = vmax.xlane.f32.xlu1 %v1735_v10  ;;  %v7093_v15 = vadd.f32 %v1597_v54, %v7017_v26  ;;  %v7096_v10 = vadd.f32 %v1711_v5, %v7003_v20  ;;  %v1714_v41 = vpop.f32.mrf.mxu3 }
 0x5cc   :  { %v1744_v60 = vsel %vm945_vm6, %v7093_v15, -inf  ;;  %v1759_v6 = vsel %vm945_vm6, %v7096_v10, -inf }
 0x5d2   :  { %1751 = vmax.xlane.f32.xlu2 %v1750_v55  ;;  %1739 = vmax.xlane.f32.xlu1 %v1738_v29  ;;  %v7106_v55 = vpop.permute.xlu0 %2217  ;;  %v7108_v29 = vpop.permute.xlu2 %2258 }
 0x5da   :  { %1745 = vmax.xlane.f32.xlu2 %v1744_v60  ;;  %1760 = vmax.xlane.f32.xlu1 %v1759_v6  ;;  %v7111_v5 = vpop.permute.xlu2 %2219 }
 0x5e8   :  { %v1725_v54 = vpop.xlane.xlu0 %1724 }
 0x5e9   :  { %v1767_v20 = vsub.f32 %v7006_v7, %v1725_v54  ;;  %v7122_v7 = vpop.permute.xlu2 %2336  ;;  %v7130_v54 = vpop.permute.xlu1 %2254 }
 0x5eb   :  { %v1785_v13 = vmul.f32 1.442695, %v1767_v20 }
 0x5ed   :  { %5437 = vpow2.f32 %v1785_v13 }
 0x5f0   :  { %v1719_v23 = vpop.xlane.xlu0 %1718 }
 0x5f1   :  { %v1765_v57 = vsub.f32 %v7011_v52, %v1719_v23  ;;  %v7128_v52 = vpop.permute.xlu2 %2215  ;;  %v7134_v20 = vpop.permute.xlu1 %2332 }
 0x5f2   :  { %2414 = vrot.lane.b32.xlu2 %v6427_v36, %s5849_s26 }
 0x5f3   :  { %v7116_v1 = vpop.eup %5437  ;;  %v1781_v6 = vmul.f32 1.442695, %v1765_v57  ;;  %2297 = vrot.lane.b32.xlu1 %v6383_v43, %s5849_s26 }
 0x5f4   :  { %v1819_v60 = vsel %vm945_vm6, %v7116_v1, 0.0 }
 0x5f5   :  { %5439 = vpow2.f32 %v1781_v6  ;;  %1820 = vadd.xlane.f32.xlu0 %v1819_v60  ;;  %v7139_v6 = vadd.f32 %v1714_v41, %v7017_v26 }
 0x5f7   :  { %v1762_v60 = vsel %vm945_vm6, %v7139_v6, -inf }
 0x5f8   :  { %v1728_v11 = vpop.xlane.xlu0 %1727 }
 0x5f9   :  { %v7132_v57 = vpop.permute.xlu2 %2256  ;;  %v7143_v30 = vpop.permute.xlu1 %2299  ;;  %v1768_v22 = vsub.f32 %v7020_v0, %v1728_v11 }
 0x5fa   :  { %8659 = vst [vmem:[#allocation41_spill] sm:$0xff] %v7132_v57 }
 0x5fb   :  { %v7124_v13 = vpop.eup %5439  ;;  %v1787_v28 = vmul.f32 1.442695, %v1768_v22 }
 0x5fc   :  { %v1813_v23 = vsel %vm945_vm6, %v7124_v13, 0.0 }
 0x5fd   :  { %1814 = vadd.xlane.f32.xlu0 %v1813_v23 }
 0x601   :  { %v7136_v3 = vpop.permute.xlu2 %2416  ;;  %v7147_v31 = vpop.permute.xlu1 %2334 }
 0x609   :  { %v7145_v23 = vpop.permute.xlu2 %2377 }
 0x61b   :  { %1763 = vmax.xlane.f32.xlu2 %v1762_v60 }
 0x625   :  { %v1731_v62 = vpop.xlane.xlu2 %1730 }
 0x626   :  { %v1769_v34 = vsub.f32 %v7045_v14, %v1731_v62 }
 0x628   :  { %v1789_v19 = vmul.f32 1.442695, %v1769_v34 }
 0x62a   :  { %5441 = vpow2.f32 %v1789_v19 }
 0x62d   :  { %v1734_v63 = vpop.xlane.xlu1 %1733 }
 0x62e   :  { %v1770_v26 = vsub.f32 %v7050_v12, %v1734_v63 }
 0x630   :  { %v7151_v41 = vpop.eup %5441  ;;  %v1791_v21 = vmul.f32 1.442695, %v1770_v26 }
 0x631   :  { %v1825_v60 = vsel %vm945_vm6, %v7151_v41, 0.0 }
 0x632   :  { %5443 = vpow2.f32 %v1791_v21  ;;  %1826 = vadd.xlane.f32.xlu2 %v1825_v60 }
 0x633   :  { %5445 = vpow2.f32 %v1787_v28 }
 0x635   :  { %v1749_v4 = vpop.xlane.xlu2 %1748  ;;  %v1722_v57 = vpop.xlane.xlu1 %1721 }
 0x636   :  { %v1775_v34 = vsub.f32 %v7060_v46, %v1749_v4  ;;  %v1766_v62 = vsub.f32 %v7057_v33, %v1722_v57 }
 0x638   :  { %v7158_v19 = vpop.eup %5443  ;;  %v1801_v63 = vmul.f32 1.442695, %v1775_v34  ;;  %v1783_v14 = vmul.f32 1.442695, %v1766_v62 }
 0x639   :  { %v1828_v11 = vsel %vm945_vm6, %v7158_v19, 0.0  ;;  %v7162_v22 = vpop.eup %5445 }
 0x63a   :  { %5447 = vpow2.f32 %v1801_v63  ;;  %1829 = vadd.xlane.f32.xlu2 %v1828_v11  ;;  %v1822_v60 = vsel %vm945_vm6, %v7162_v22, 0.0 }
 0x63b   :  { %5449 = vpow2.f32 %v1783_v14 }
 0x63d   :  { %v1743_v21 = vpop.xlane.xlu2 %1742  ;;  %v1737_v0 = vpop.xlane.xlu1 %1736 }
 0x63e   :  { %v1773_v12 = vsub.f32 %v7069_v50, %v1743_v21  ;;  %v1771_v4 = vsub.f32 %v7072_v8, %v1737_v0 }
 0x640   :  { %v7166_v33 = vpop.eup %5447  ;;  %v1797_v46 = vmul.f32 1.442695, %v1773_v12  ;;  %v1793_v28 = vmul.f32 1.442695, %v1771_v4 }
 0x641   :  { %v7168_v57 = vpop.eup %5449  ;;  %v1843_v26 = vsel %vm945_vm6, %v7166_v33, 0.0 }
 0x642   :  { %5451 = vpow2.f32 %v1797_v46  ;;  %1844 = vadd.xlane.f32.xlu1 %v1843_v26  ;;  %v1816_v34 = vsel %vm945_vm6, %v7168_v57, 0.0  ;;  %1823 = vadd.xlane.f32.xlu2 %v1822_v60 }
 0x643   :  { %5453 = vpow2.f32 %v1793_v28  ;;  %1817 = vadd.xlane.f32.xlu0 %v1816_v34  ;;  %v1755_v28 = vpop.xlane.xlu0 %1754 }
 0x645   :  { %v1752_v50 = vpop.xlane.xlu2 %1751 }
 0x646   :  { %v1776_v8 = vsub.f32 %v7086_v40, %v1752_v50 }
 0x648   :  { %v7177_v62 = vpop.eup %5451  ;;  %v1803_v63 = vmul.f32 1.442695, %v1776_v8 }
 0x649   :  { %v7179_v14 = vpop.eup %5453  ;;  %v1837_v11 = vsel %vm945_vm6, %v7177_v62, 0.0 }
 0x64a   :  { %5455 = vpow2.f32 %v1803_v63  ;;  %v1831_v21 = vsel %vm945_vm6, %v7179_v14, 0.0  ;;  %1838 = vadd.xlane.f32.xlu2 %v1837_v11 }
 0x64b   :  { %1832 = vadd.xlane.f32.xlu0 %v1831_v21  ;;  %v7196_v34 = vpop.xlane.xlu0 %1757 }
 0x64d   :  { %v1746_v0 = vpop.xlane.xlu2 %1745 }
 0x64e   :  { %v1774_v12 = vsub.f32 %v7093_v15, %v1746_v0 }
 0x650   :  { %v7186_v4 = vpop.eup %5455  ;;  %v1799_v40 = vmul.f32 1.442695, %v1774_v12 }
 0x651   :  { %v1846_v46 = vsel %vm945_vm6, %v7186_v4, 0.0 }
 0x652   :  { %5457 = vpow2.f32 %v1799_v40  ;;  %1847 = vadd.xlane.f32.xlu1 %v1846_v46 }
 0x658   :  { %v7190_v26 = vpop.eup %5457 }
 0x659   :  { %v1840_v60 = vsel %vm945_vm6, %v7190_v26, 0.0 }
 0x65a   :  { %1841 = vadd.xlane.f32.xlu1 %v1840_v60 }
 0x65f   :  { %2410 = vrot.lane.b32.xlu0 %v6427_v36, %s5850_s27 }
 0x662   :  { %2293 = vrot.lane.b32.xlu2 %v6383_v43, %s5850_s27 }
 0x667   :  { %2412 = vrot.lane.b32.xlu0 %v6411_v38, %s5850_s27 }
 0x668   :  { %v1821_v15 = vpop.xlane.xlu0 %1820 }
 0x669   :  { %5459 = vrcp.f32 %v1821_v15 }
 0x66a   :  { %2295 = vrot.lane.b32.xlu2 %v6430_v47, %s5850_s27 }
 0x66f   :  { %v5460_v50 = vpop.eup %5459 }
 0x670   :  { %v1879_v8 = vmul.f32 %v5460_v50, %v7116_v1  ;;  %v1815_v63 = vpop.xlane.xlu0 %1814  ;;  %v1740_v1 = vpop.xlane.xlu1 %1739 }
 0x671   :  { %5461 = vrcp.f32 %v1815_v63 }
 0x672   :  { %2373 = vrot.lane.b32.xlu2 %v6452_v17, %s5850_s27  ;;  %4986 = vmatmul.msk.f32.vlgmr.msrb.gmra.mxu1 %vm945_vm6, %v1879_v8 }
 0x673   :  { %5004 = vmatpush.xpose.msk.msrb.mxu1 %vm654_vm5, %v7080_v53  ;;  %2375 = vrot.lane.b32.xlu1 %v6404_v35, %s5849_s26  ;;  %v1772_v53 = vsub.f32 %v7083_v51, %v1740_v1 }
 0x675   :  { %v1795_v0 = vmul.f32 1.442695, %v1772_v53 }
 0x677   :  { %v5462_v11 = vpop.eup %5461  ;;  %5005 = vmatpush.xpose.msk.msrb.mxu1 %vm654_vm5, %v7111_v5  ;;  %5463 = vpow2.f32 %v1795_v0 }
 0x678   :  { %v1877_v21 = vmul.f32 %v5462_v11, %v7124_v13  ;;  %v1761_v5 = vpop.xlane.xlu1 %1760  ;;  %v7225_v13 = vpop.permute.xlu2 %2414  ;;  %v5281_v11 = vpack.i.bf16 %v6427_v36, %v6383_v43 }
 0x679   :  { %v1779_v12 = vsub.f32 %v7096_v10, %v1761_v5 }
 0x67a   :  { %4984 = vmatmul.msk.f32.vlgmr.msrb.gmra.mxu0 %vm945_vm6, %v1877_v21 }
 0x67b   :  { %5000 = vmatpush.xpose.msk.msrb.mxu0 %vm654_vm5, %v7078_v49  ;;  %2371 = vrot.lane.b32.xlu1 %v6404_v35, %s5850_s27  ;;  %v1777_v49 = vsub.f32 %v7031_v9, %v1755_v28  ;;  %v1809_v40 = vmul.f32 1.442695, %v1779_v12 }
 0x67d   :  { %v7231_v51 = vpop.eup %5463  ;;  %v1805_v46 = vmul.f32 1.442695, %v1777_v49  ;;  %5465 = vpow2.f32 %v1809_v40 }
 0x67e   :  { %v1834_v15 = vsel %vm945_vm6, %v7231_v51, 0.0 }
 0x67f   :  { %5001 = vmatpush.xpose.msk.msrb.mxu0 %vm654_vm5, %v6985_v18  ;;  %5467 = vpow2.f32 %v1805_v46  ;;  %v5256_v46 = vpack.i.bf16 %v6397_v58, %v6353_v61 }
 0x680   :  { %v2298_v5 = vpop.permute.xlu1 %2297 }
 0x683   :  { %2455 = vrot.lane.b32.xlu1 %v6479_v25, %s5849_s26  ;;  %v7238_v9 = vpop.eup %5465 }
 0x684   :  { %v1855_v28 = vsel %vm945_vm6, %v7238_v9, 0.0 }
 0x685   :  { %v7240_v10 = vpop.eup %5467 }
 0x68b   :  { %2449 = vrot.lane.b32.xlu1 %v6420_v45, %s5850_s27 }
 0x68e   :  { %v1764_v18 = vpop.xlane.xlu2 %1763 }
 0x68f   :  { %v1780_v60 = vsub.f32 %v7139_v6, %v1764_v18  ;;  %v1849_v6 = vsel %vm945_vm6, %v7240_v10, 0.0 }
 0x691   :  { %1835 = vadd.xlane.f32.xlu0 %v1834_v15  ;;  %v1811_v50 = vmul.f32 1.442695, %v1780_v60 }
 0x693   :  { %5252 = vrot.lane.b32.xlu1 %v6489_v59, %s5851_s28  ;;  %5469 = vpow2.f32 %v1811_v50 }
 0x699   :  { %1856 = vadd.xlane.f32.xlu0 %v1855_v28  ;;  %v7248_v8 = vpop.eup %5469 }
 0x69a   :  { %v1858_v63 = vsel %vm945_vm6, %v7248_v8, 0.0 }
 0x69b   :  { %2953 = vrot.lane.b32.xlu1 %v6417_v39, %s5852_s1  ;;  %1850 = vadd.xlane.f32.xlu2 %v1849_v6 }
 0x6a1   :  { %1859 = vadd.xlane.f32.xlu0 %v1858_v63 }
 0x6a3   :  { %5282 = vrot.lane.b32.xlu1 %v5281_v11, %s5851_s28 }
 0x6a5   :  { %v1827_v21 = vpop.xlane.xlu2 %1826 }
 0x6a6   :  { %5471 = vrcp.f32 %v1827_v21  ;;  %v8660_v21 = vld [vmem:[#allocation19_spill] sm:$0xff] }
 0x6ab   :  { %2992 = vrot.lane.b32.xlu1 %v6353_v61, %s5852_s1 }
 0x6ac   :  { %v5472_v1 = vpop.eup %5471 }
 0x6ad   :  { %v1881_v53 = vmul.f32 %v5472_v1, %v7151_v41  ;;  %v1830_v0 = vpop.xlane.xlu2 %1829 }
 0x6ae   :  { %5473 = vrcp.f32 %v1830_v0 }
 0x6af   :  { %4988 = vmatmul.msk.f32.vlgmr.msra.gmra.mxu2 %vm945_vm6, %v1881_v53 }
 0x6b0   :  { %5008 = vmatpush.xpose.msk.msra.mxu2 %vm654_vm5, %v7066_v44 }
 0x6b3   :  { %2451 = vrot.lane.b32.xlu2 %v6479_v25, %s5850_s27 }
 0x6b4   :  { %v5474_v12 = vpop.eup %5473  ;;  %5009 = vmatpush.xpose.msk.msra.mxu2 %vm654_vm5, %v7108_v29 }
 0x6b5   :  { %2453 = vrot.lane.b32.xlu0 %v6420_v45, %s5849_s26  ;;  %v1824_v49 = vpop.xlane.xlu2 %1823  ;;  %v1882_v41 = vmul.f32 %v5474_v12, %v7158_v19  ;;  %v1845_v44 = vpop.xlane.xlu1 %1844 }
 0x6b6   :  { %v1818_v40 = vpop.xlane.xlu0 %1817  ;;  %5475 = vrcp.f32 %v1824_v49 }
 0x6b7   :  { %4989 = vmatmul.msk.f32.gmra.mxu2 %vm945_vm6, %v1882_v41  ;;  %5477 = vrcp.f32 %v1818_v40 }
 0x6b8   :  { %5479 = vrcp.f32 %v1845_v44 }
 0x6bc   :  { %v5476_v18 = vpop.eup %5475 }
 0x6bd   :  { %5257 = vrot.lane.b32.xlu0 %v5256_v46, %s5851_s28  ;;  %v1839_v29 = vpop.xlane.xlu2 %1838  ;;  %v5478_v60 = vpop.eup %5477  ;;  %v1880_v50 = vmul.f32 %v5476_v18, %v7162_v22 }
 0x6be   :  { %5481 = vrcp.f32 %v1839_v29  ;;  %v1833_v15 = vpop.xlane.xlu0 %1832  ;;  %v1878_v19 = vmul.f32 %v5478_v60, %v7168_v57  ;;  %v5480_v28 = vpop.eup %5479  ;;  %v1778_v57 = vsub.f32 %v7036_v24, %v7196_v34 }
 0x6bf   :  { %5483 = vrcp.f32 %v1833_v15  ;;  %4987 = vmatmul.msk.f32.gmra.mxu1 %vm945_vm6, %v1880_v50  ;;  %v1887_v53 = vmul.f32 %v5480_v28, %v7166_v33 }
 0x6c0   :  { %4985 = vmatmul.msk.f32.gmra.mxu0 %vm945_vm6, %v1878_v19  ;;  %v1807_v12 = vmul.f32 1.442695, %v1778_v57 }
 0x6c4   :  { %v5482_v6 = vpop.eup %5481 }
 0x6c5   :  { %v5484_v63 = vpop.eup %5483  ;;  %v1885_v11 = vmul.f32 %v5482_v6, %v7177_v62  ;;  %5267 = vrot.lane.b32.xlu0 %v8660_v21, %s5851_s28  ;;  %v1848_v1 = vpop.xlane.xlu1 %1847  ;;  %v8661_v62 = vld [vmem:[#allocation21_spill] sm:$0xff] }
 0x6c6   :  { %v1883_v22 = vmul.f32 %v5484_v63, %v7179_v14  ;;  %5485 = vrcp.f32 %v1848_v1 }
 0x6c7   :  { %4994 = vmatmul.msk.f32.vlgmr.msra.gmra.mxu1 %vm945_vm6, %v1887_v53  ;;  %v7372_v53 = vld [vmem:[#allocation7 + $0x20] sm:$0xff] }
 0x6c8   :  { %4990 = vmatmul.msk.f32.vlgmr.msrb.gmra.mxu3 %vm945_vm6, %v1883_v22  ;;  %4992 = vmatmul.msk.f32.vlgmr.msra.gmra.mxu0 %vm945_vm6, %v1885_v11 }
 0x6c9   :  { %5012 = vmatpush.xpose.msk.msrb.mxu3 %vm654_vm5, %v7143_v30  ;;  %5016 = vmatpush.xpose.msk.msra.mxu0 %vm654_vm5, %v7100_v16 }
 0x6ca   :  { %5020 = vmatpush.xpose.msk.msra.mxu1 %vm654_vm5, %v7145_v23 }
 0x6cc   :  { %v5486_v33 = vpop.eup %5485 }
 0x6cd   :  { %5013 = vmatpush.xpose.msk.msrb.mxu3 %vm654_vm5, %v2298_v5  ;;  %5272 = vrot.lane.b32.xlu0 %v8661_v62, %s5851_s28  ;;  %v1842_v14 = vpop.xlane.xlu1 %1841  ;;  %v1888_v0 = vmul.f32 %v5486_v33, %v7186_v4 }
 0x6ce   :  { %5017 = vmatpush.xpose.msk.msra.mxu0 %vm654_vm5, %v7122_v7  ;;  %5487 = vrcp.f32 %v1842_v14 }
 0x6cf   :  { %4995 = vmatmul.msk.f32.gmra.mxu1 %vm945_vm6, %v1888_v0  ;;  %5489 = vpow2.f32 %v1807_v12 }
 0x6d4   :  { %v5488_v30 = vpop.eup %5487 }
 0x6d5   :  { %2949 = vrot.lane.b32.xlu0 %v6417_v39, %s5853_s29  ;;  %v1886_v24 = vmul.f32 %v5488_v30, %v7190_v26  ;;  %v7303_v16 = vpop.eup %5489  ;;  %v2294_v39 = vpop.permute.xlu2 %2293 }
 0x6d6   :  { %v1852_v7 = vsel %vm945_vm6, %v7303_v16, 0.0 }
 0x6d7   :  { %4993 = vmatmul.msk.f32.gmra.mxu0 %vm945_vm6, %v1886_v24  ;;  %5006 = vmatmul.msk.f32.vlgmr.msrb.gmra.mxu1 %vm654_vm5, %v7128_v52 }
 0x6dc   :  { %1853 = vadd.xlane.f32.xlu2 %v1852_v7 }
 0x6dd   :  { %3031 = vrot.lane.b32.xlu0 %v6378_v27, %s5852_s1  ;;  %v2296_v52 = vpop.permute.xlu2 %2295 }
 0x6df   :  { %5002 = vmatmul.msk.f32.vlgmr.msrb.gmra.mxu0 %vm654_vm5, %v7052_v56  ;;  %5007 = vmatmul.msk.f32.gmra.mxu1 %vm654_vm5, %v7106_v55  ;;  %v7323_v56 = vpop.permute.xlu0 %2410 }
 0x6e5   :  { %2986 = vrot.lane.b32.xlu0 %v6318_v32, %s5853_s29  ;;  %v2376_v23 = vpop.permute.xlu1 %2375  ;;  %v2374_v55 = vpop.permute.xlu2 %2373 }
 0x6e6   :  { %5021 = vmatpush.xpose.msk.msra.mxu1 %vm654_vm5, %v2376_v23 }
 0x6e7   :  { %5003 = vmatmul.msk.f32.gmra.mxu0 %vm654_vm5, %v7098_v37  ;;  %v7330_v37 = vpop.permute.xlu0 %2412 }
 0x6ed   :  { %v2372_v4 = vpop.permute.xlu1 %2371 }
 0x6ee   :  { %5022 = vmatmul.msk.f32.vlgmr.msra.gmra.mxu1 %vm654_vm5, %v2372_v4  ;;  %v7383_v4 = vld [vmem:[#allocation7 + $0x28] sm:$0xff] }
 0x6ef   :  { %5018 = vmatmul.msk.f32.vlgmr.msra.gmra.mxu0 %vm654_vm5, %v7134_v20 }
 0x6f4   :  { %5262 = vrot.lane.b32.xlu2 %v6854_v48, %s5851_s28 }
 0x6f5   :  { %v2456_v26 = vpop.permute.xlu1 %2455 }
 0x6f6   :  { %5023 = vmatmul.msk.f32.gmra.mxu1 %vm654_vm5, %v2374_v55 }
 0x6f7   :  { %5019 = vmatmul.msk.f32.gmra.mxu0 %vm654_vm5, %v7147_v31 }
 0x6fc   :  { %2951 = vrot.lane.b32.xlu2 %v6264_v2, %s5852_s1 }
 0x6fd   :  { %v2450_v34 = vpop.permute.xlu1 %2449 }
 0x704   :  { %v1836_v5 = vpop.xlane.xlu0 %1835  ;;  %2947 = vrot.lane.b32.xlu2 %v6264_v2, %s5853_s29 }
 0x705   :  { %5491 = vrcp.f32 %v1836_v5  ;;  %v5253_v20 = vpop.permute.xlu1 %5252 }
 0x706   :  { %v5254_v48 = vunpack.i.l.bf16 %v5253_v20  ;;  %v5255_v49 = vunpack.i.h.bf16 %v5253_v20 }
 0x708   :  { %2690 = vmatpush.msrb.mxu0 %v5254_v48 }
 0x70a   :  { %2691 = vmatpush.msrb.mxu0 %v5255_v49 }
 0x70b   :  { %v5492_v41 = vpop.eup %5491 }
 0x70c   :  { %v1857_v40 = vpop.xlane.xlu0 %1856  ;;  %5277 = vrot.lane.b32.xlu2 %v6914_v42, %s5851_s28  ;;  %v1884_v31 = vmul.f32 %v5492_v41, %v7231_v51 }
 0x70d   :  { %5493 = vrcp.f32 %v1857_v40 }
 0x70e   :  { %4991 = vmatmul.msk.f32.gmra.mxu3 %vm945_vm6, %v1884_v31  ;;  %v1851_v44 = vpop.xlane.xlu2 %1850  ;;  %v7399_v31 = vpop.permute.xlu1 %2953 }
 0x70f   :  { %5495 = vrcp.f32 %v1851_v44 }
 0x713   :  { %v5494_v46 = vpop.eup %5493 }
 0x714   :  { %v1891_v2 = vmul.f32 %v5494_v46, %v7238_v9  ;;  %v1860_v18 = vpop.xlane.xlu0 %1859  ;;  %2990 = vrot.lane.b32.xlu2 %v6318_v32, %s5852_s1 }
 0x715   :  { %v5496_v29 = vpop.eup %5495  ;;  %5497 = vrcp.f32 %v1860_v18  ;;  %v8662_v18 = vld [vmem:[#allocation41_spill] sm:$0xff] }
 0x716   :  { %v1889_v60 = vmul.f32 %v5496_v29, %v7240_v10  ;;  %4998 = vmatmul.msk.f32.vlgmr.msra.gmra.mxu3 %vm945_vm6, %v1891_v2 }
 0x717   :  { %5028 = vmatpush.xpose.msk.msra.mxu3 %vm654_vm5, %v2456_v26 }
 0x718   :  { %4996 = vmatmul.msk.f32.vlgmr.msrb.gmra.mxu2 %vm945_vm6, %v1889_v60 }
 0x719   :  { %5024 = vmatpush.xpose.msk.msrb.mxu2 %vm654_vm5, %v7136_v3  ;;  %v7356_v3 = vpop.f32.mrf.mxu1 }
 0x71b   :  { %v5498_v42 = vpop.eup %5497 }
 0x71c   :  { %v1892_v51 = vmul.f32 %v5498_v42, %v7248_v8  ;;  %v7359_v8 = vpop.f32.mrf.mxu0 }
 0x71d   :  { %5025 = vmatpush.xpose.msk.msrb.mxu2 %vm654_vm5, %v7225_v13  ;;  %v2452_v13 = vpop.permute.xlu2 %2451 }
 0x71e   :  { %4999 = vmatmul.msk.f32.gmra.mxu3 %vm945_vm6, %v1892_v51 }
 0x726   :  { %5014 = vmatmul.msk.f32.vlgmr.msrb.gmra.mxu3 %vm654_vm5, %v2294_v39 }
 0x727   :  { %v2454_v32 = vpop.permute.xlu0 %2453 }
 0x728   :  { %5029 = vmatpush.xpose.msk.msra.mxu3 %vm654_vm5, %v2454_v32  ;;  %v5283_v32 = vpop.permute.xlu1 %5282 }
 0x72e   :  { %5015 = vmatmul.msk.f32.gmra.mxu3 %vm654_vm5, %v2296_v52 }
 0x72f   :  { %v5258_v9 = vpop.permute.xlu0 %5257 }
 0x730   :  { %v5260_v10 = vunpack.i.h.bf16 %v5258_v9  ;;  %v5259_v15 = vunpack.i.l.bf16 %v5258_v9 }
 0x732   :  { %2725 = vmatpush.msrb.mxu1 %v5259_v15  ;;  %2830 = vmatpush.msra.mxu0 %v5260_v10 }
 0x736   :  { %5030 = vmatmul.msk.f32.vlgmr.msra.gmra.mxu3 %vm654_vm5, %v2450_v34 }
 0x737   :  { %v5268_v6 = vpop.permute.xlu0 %5267 }
 0x738   :  { %v5269_v48 = vunpack.i.l.bf16 %v5268_v6  ;;  %v5270_v41 = vunpack.i.h.bf16 %v5268_v6  ;;  %v5285_v6 = vunpack.i.h.bf16 %v5283_v32 }
 0x73c   :  { %v7361_v50 = vpop.f32.mrf.mxu1 }
 0x73d   :  { %v7364_v19 = vpop.f32.mrf.mxu0 }
 0x73e   :  { %5031 = vmatmul.msk.f32.gmra.mxu3 %vm654_vm5, %v2452_v13 }
 0x73f   :  { %v5273_v14 = vpop.permute.xlu0 %5272 }
 0x740   :  { %v5274_v23 = vunpack.i.l.bf16 %v5273_v14  ;;  %v5275_v52 = vunpack.i.h.bf16 %v5273_v14 }
 0x744   :  { %v7366_v28 = vpop.f32.mrf.mxu1 }
 0x745   :  { %v7368_v63 = vpop.f32.mrf.mxu0 }
 0x74c   :  { %v7370_v11 = vpop.f32.mrf.mxu1 }
 0x74f   :  { %v1854_v1 = vpop.xlane.xlu2 %1853 }
 0x750   :  { %5499 = vrcp.f32 %v1854_v1  ;;  %v5284_v1 = vunpack.i.l.bf16 %v5283_v32 }
 0x754   :  { %v7374_v22 = vpop.f32.mrf.mxu0  ;;  %v2248_v57 = vpop.f32.mrf.mxu1 }
 0x755   :  { %v7377_v0 = vadd.f32 %v2248_v57, %v7372_v53 }
 0x756   :  { %v5500_v33 = vpop.eup %5499 }
 0x757   :  { %v5263_v12 = vpop.permute.xlu2 %5262  ;;  %v1890_v30 = vmul.f32 %v5500_v33, %v7303_v16  ;;  %v2494_v39 = vsel %vm945_vm6, %v7377_v0, -inf }
 0x758   :  { %v5265_v24 = vunpack.i.h.bf16 %v5263_v12  ;;  %v5264_v7 = vunpack.i.l.bf16 %v5263_v12  ;;  %2495 = vmax.xlane.f32.xlu2 %v2494_v39  ;;  %v7429_v12 = vpop.f32.mrf.mxu3 }
 0x759   :  { %4997 = vmatmul.msk.f32.gmra.mxu2 %vm945_vm6, %v1890_v30 }
 0x75a   :  { %2726 = vmatpush.msrb.mxu1 %v5264_v7  ;;  %2831 = vmatpush.msra.mxu0 %v5265_v24 }
 0x75c   :  { %2865 = vmatpush.msra.mxu1 %v5274_v23  ;;  %v2209_v55 = vpop.f32.mrf.mxu0  ;;  %v2251_v16 = vpop.f32.mrf.mxu1 }
 0x75d   :  { %v7386_v26 = vadd.f32 %v2209_v55, %v7372_v53  ;;  %v7389_v34 = vadd.f32 %v2251_v16, %v7383_v4 }
 0x75e   :  { %2866 = vmatpush.msra.mxu1 %v5275_v52 }
 0x75f   :  { %v7391_v5 = vpop.permute.xlu2 %2951  ;;  %v2488_v20 = vsel %vm945_vm6, %v7386_v26, -inf  ;;  %v2497_v49 = vsel %vm945_vm6, %v7389_v34, -inf }
 0x760   :  { %2489 = vmax.xlane.f32.xlu0 %v2488_v20  ;;  %2498 = vmax.xlane.f32.xlu2 %v2497_v49  ;;  %v7447_v20 = vpop.permute.xlu0 %2949 }
 0x761   :  { %5010 = vmatmul.msk.f32.vlgmr.msra.gmra.mxu2 %vm654_vm5, %v7130_v54 }
 0x762   :  { %2760 = vmatpush.msra.mxu2 %v5269_v48 }
 0x764   :  { %2761 = vmatpush.msra.mxu2 %v5270_v41  ;;  %v2212_v40 = vpop.f32.mrf.mxu0 }
 0x765   :  { %v7402_v44 = vadd.f32 %v2212_v40, %v7383_v4 }
 0x767   :  { %v7404_v46 = vpop.permute.xlu2 %2947  ;;  %v2491_v2 = vsel %vm945_vm6, %v7402_v44, -inf }
 0x768   :  { %2492 = vmax.xlane.f32.xlu1 %v2491_v2 }
 0x769   :  { %5011 = vmatmul.msk.f32.gmra.mxu2 %vm654_vm5, %v8662_v18  ;;  %v7459_v18 = vpop.permute.xlu0 %3031 }
 0x76b   :  { %v2404_v29 = vpop.f32.mrf.mxu1 }
 0x76c   :  { %v7411_v54 = vadd.f32 %v2404_v29, %v7372_v53  ;;  %v2365_v60 = vpop.f32.mrf.mxu0 }
 0x76d   :  { %v7414_v42 = vadd.f32 %v2365_v60, %v7372_v53  ;;  %v7461_v60 = vpop.f32.mrf.mxu2 }
 0x76e   :  { %v2518_v51 = vsel %vm945_vm6, %v7411_v54, -inf }
 0x76f   :  { %v5278_v9 = vpop.permute.xlu2 %5277  ;;  %2519 = vmax.xlane.f32.xlu2 %v2518_v51  ;;  %v2512_v10 = vsel %vm945_vm6, %v7414_v42, -inf }
 0x770   :  { %v5280_v15 = vunpack.i.h.bf16 %v5278_v9  ;;  %v5279_v13 = vunpack.i.l.bf16 %v5278_v9  ;;  %2513 = vmax.xlane.f32.xlu0 %v2512_v10 }
 0x771   :  { %5026 = vmatmul.msk.f32.vlgmr.msrb.gmra.mxu2 %vm654_vm5, %v7323_v56  ;;  %v7470_v10 = vpop.permute.xlu0 %2986 }
 0x772   :  { %2795 = vmatpush.msrb.mxu3 %v5279_v13  ;;  %2900 = vmatpush.msrb.mxu2 %v5280_v15 }
 0x773   :  { %v2407_v57 = vpop.f32.mrf.mxu1 }
 0x774   :  { %v7423_v33 = vadd.f32 %v2407_v57, %v7383_v4  ;;  %2796 = vmatpush.msrb.mxu3 %v5284_v1  ;;  %2901 = vmatpush.msrb.mxu2 %v5285_v6  ;;  %v2368_v52 = vpop.f32.mrf.mxu0  ;;  %v7475_v57 = vpop.permute.xlu1 %2992 }
 0x775   :  { %v7443_v55 = vadd.f32 %v2368_v52, %v7383_v4  ;;  %v7472_v15 = vpop.f32.mrf.mxu2 }
 0x776   :  { %v2521_v14 = vsel %vm945_vm6, %v7423_v33, -inf }
 0x777   :  { %2522 = vmax.xlane.f32.xlu2 %v2521_v14  ;;  %v2515_v16 = vsel %vm945_vm6, %v7443_v55, -inf  ;;  %v7466_v32 = vpop.permute.xlu2 %2990 }
 0x779   :  { %5027 = vmatmul.msk.f32.gmra.mxu2 %vm654_vm5, %v7330_v37 }
 0x791   :  { %v7431_v56 = vpop.f32.mrf.mxu3 }
 0x799   :  { %v7433_v30 = vpop.f32.mrf.mxu3 }
 0x79a   :  { %8663 = vst [vmem:[#allocation19_spill] sm:$0xff] %v7433_v30 }
 0x7a1   :  { %v7435_v24 = vpop.f32.mrf.mxu3 }
 0x7a2   :  { %8664 = vst [vmem:[#allocation21_spill] sm:$0xff] %v7435_v24 }
 0x7a9   :  { %v2326_v7 = vpop.f32.mrf.mxu3 }
 0x7aa   :  { %v7438_v39 = vadd.f32 %v2326_v7, %v7372_v53  ;;  %v7477_v7 = vpop.f32.mrf.mxu2 }
 0x7ac   :  { %v2506_v23 = vsel %vm945_vm6, %v7438_v39, -inf }
 0x7ad   :  { %2507 = vmax.xlane.f32.xlu0 %v2506_v23 }
 0x7b1   :  { %v2329_v37 = vpop.f32.mrf.mxu3 }
 0x7b2   :  { %v7450_v48 = vadd.f32 %v2329_v37, %v7383_v4 }
 0x7b4   :  { %v2509_v40 = vsel %vm945_vm6, %v7450_v48, -inf }
 0x7b5   :  { %2516 = vmax.xlane.f32.xlu0 %v2515_v16 }
 0x7b9   :  { %v2482_v49 = vpop.f32.mrf.mxu3 }
 0x7ba   :  { %v7453_v41 = vadd.f32 %v2482_v49, %v7372_v53 }
 0x7bc   :  { %v2530_v2 = vsel %vm945_vm6, %v7453_v41, -inf }
 0x7bd   :  { %2510 = vmax.xlane.f32.xlu0 %v2509_v40  ;;  %2531 = vmax.xlane.f32.xlu2 %v2530_v2 }
 0x7c1   :  { %v2485_v29 = vpop.f32.mrf.mxu3 }
 0x7c2   :  { %v7464_v51 = vadd.f32 %v2485_v29, %v7383_v4 }
 0x7c4   :  { %v2533_v9 = vsel %vm945_vm6, %v7464_v51, -inf }
 0x7c5   :  { %2534 = vmax.xlane.f32.xlu2 %v2533_v9 }
 0x7cb   :  { %v2496_v13 = vpop.xlane.xlu2 %2495 }
 0x7cc   :  { %v2538_v6 = vsub.f32 %v7377_v0, %v2496_v13 }
 0x7ce   :  { %v2556_v1 = vmul.f32 1.442695, %v2538_v6 }
 0x7d0   :  { %5501 = vpow2.f32 %v2556_v1 }
 0x7d3   :  { %v2490_v14 = vpop.xlane.xlu0 %2489  ;;  %v2499_v23 = vpop.xlane.xlu2 %2498 }
 0x7d4   :  { %v2536_v52 = vsub.f32 %v7386_v26, %v2490_v14  ;;  %v2539_v37 = vsub.f32 %v7389_v34, %v2499_v23 }
 0x7d6   :  { %v2552_v16 = vmul.f32 1.442695, %v2536_v52  ;;  %v7481_v49 = vpop.eup %5501  ;;  %v2558_v40 = vmul.f32 1.442695, %v2539_v37 }
 0x7d7   :  { %v2590_v0 = vsel %vm945_vm6, %v7481_v49, 0.0 }
 0x7d8   :  { %5503 = vpow2.f32 %v2552_v16  ;;  %2591 = vadd.xlane.f32.xlu2 %v2590_v0 }
 0x7d9   :  { %5505 = vpow2.f32 %v2558_v40 }
 0x7db   :  { %v2493_v2 = vpop.xlane.xlu1 %2492 }
 0x7dc   :  { %v2537_v29 = vsub.f32 %v7402_v44, %v2493_v2  ;;  %v7486_v9 = vpop.f32.mrf.mxu2 }
 0x7de   :  { %v7488_v13 = vpop.eup %5503  ;;  %v2554_v26 = vmul.f32 1.442695, %v2537_v29 }
 0x7df   :  { %v7490_v6 = vpop.eup %5505  ;;  %v2584_v34 = vsel %vm945_vm6, %v7488_v13, 0.0 }
 0x7e0   :  { %5507 = vpow2.f32 %v2554_v26  ;;  %v2593_v1 = vsel %vm945_vm6, %v7490_v6, 0.0  ;;  %2585 = vadd.xlane.f32.xlu0 %v2584_v34 }
 0x7e1   :  { %2594 = vadd.xlane.f32.xlu2 %v2593_v1 }
 0x7e2   :  { %v2520_v14 = vpop.xlane.xlu2 %2519 }
 0x7e3   :  { %v2546_v23 = vsub.f32 %v7411_v54, %v2520_v14  ;;  %v2514_v44 = vpop.xlane.xlu0 %2513 }
 0x7e4   :  { %v2544_v52 = vsub.f32 %v7414_v42, %v2514_v44  ;;  %v2287_v37 = vpop.f32.mrf.mxu2 }
 0x7e5   :  { %v2572_v16 = vmul.f32 1.442695, %v2546_v23  ;;  %v7499_v40 = vadd.f32 %v2287_v37, %v7372_v53 }
 0x7e6   :  { %v7501_v0 = vpop.eup %5507  ;;  %v2568_v2 = vmul.f32 1.442695, %v2544_v52 }
 0x7e7   :  { %5509 = vpow2.f32 %v2572_v16  ;;  %v2500_v29 = vsel %vm945_vm6, %v7499_v40, -inf  ;;  %v2587_v26 = vsel %vm945_vm6, %v7501_v0, 0.0 }
 0x7e8   :  { %5511 = vpow2.f32 %v2568_v2  ;;  %2501 = vmax.xlane.f32.xlu1 %v2500_v29  ;;  %2588 = vadd.xlane.f32.xlu0 %v2587_v26 }
 0x7ec   :  { %v2290_v54 = vpop.f32.mrf.mxu2 }
 0x7ed   :  { %v7507_v42 = vpop.eup %5509  ;;  %v7510_v34 = vadd.f32 %v2290_v54, %v7383_v4  ;;  %v2523_v54 = vpop.xlane.xlu2 %2522 }
 0x7ee   :  { %v7512_v1 = vpop.eup %5511  ;;  %v2614_v14 = vsel %vm945_vm6, %v7507_v42, 0.0 }
 0x7ef   :  { %2615 = vadd.xlane.f32.xlu2 %v2614_v14  ;;  %v2503_v23 = vsel %vm945_vm6, %v7510_v34, -inf  ;;  %v2608_v44 = vsel %vm945_vm6, %v7512_v1, 0.0 }
 0x7f0   :  { %2504 = vmax.xlane.f32.xlu1 %v2503_v23  ;;  %2609 = vadd.xlane.f32.xlu0 %v2608_v44  ;;  %v2547_v44 = vsub.f32 %v7423_v33, %v2523_v54 }
 0x7f4   :  { %v2443_v52 = vpop.f32.mrf.mxu2 }
 0x7f5   :  { %v7521_v37 = vadd.f32 %v2443_v52, %v7372_v53  ;;  %v2574_v52 = vmul.f32 1.442695, %v2547_v44 }
 0x7f7   :  { %v2524_v16 = vsel %vm945_vm6, %v7521_v37, -inf }
 0x7f8   :  { %2525 = vmax.xlane.f32.xlu1 %v2524_v16 }
 0x7fc   :  { %v2446_v2 = vpop.f32.mrf.mxu2 }
 0x7fd   :  { %v7526_v29 = vadd.f32 %v2446_v2, %v7383_v4 }
 0x7ff   :  { %v2527_v26 = vsel %vm945_vm6, %v7526_v29, -inf }
 0x800   :  { %2528 = vmax.xlane.f32.xlu1 %v2527_v26 }
 0x820   :  { %v2508_v14 = vpop.xlane.xlu0 %2507 }
 0x821   :  { %v2542_v23 = vsub.f32 %v7438_v39, %v2508_v14 }
 0x823   :  { %v2564_v53 = vmul.f32 1.442695, %v2542_v23 }
 0x825   :  { %5513 = vpow2.f32 %v2564_v53 }
 0x826   :  { %5515 = vpow2.f32 %v2574_v52 }
 0x828   :  { %v2517_v24 = vpop.xlane.xlu0 %2516 }
 0x829   :  { %v2545_v16 = vsub.f32 %v7443_v55, %v2517_v24 }
 0x82b   :  { %v7533_v30 = vpop.eup %5513  ;;  %v2570_v4 = vmul.f32 1.442695, %v2545_v16 }
 0x82c   :  { %v2602_v2 = vsel %vm945_vm6, %v7533_v30, 0.0  ;;  %v7537_v26 = vpop.eup %5515 }
 0x82d   :  { %5517 = vpow2.f32 %v2570_v4  ;;  %2603 = vadd.xlane.f32.xlu0 %v2602_v2  ;;  %v2617_v33 = vsel %vm945_vm6, %v7537_v26, 0.0 }
 0x830   :  { %v7545_v24 = vpop.xlane.xlu2 %2531  ;;  %v2511_v14 = vpop.xlane.xlu0 %2510 }
 0x833   :  { %v7539_v39 = vpop.eup %5517 }
 0x834   :  { %v2611_v54 = vsel %vm945_vm6, %v7539_v39, 0.0 }
 0x835   :  { %2618 = vadd.xlane.f32.xlu0 %v2617_v33  ;;  %2612 = vadd.xlane.f32.xlu1 %v2611_v54 }
 0x838   :  { %v7547_v55 = vpop.xlane.xlu2 %2534 }
 0x84b   :  { %v2592_v23 = vpop.xlane.xlu2 %2591 }
 0x84c   :  { %5519 = vrcp.f32 %v2592_v23 }
 0x84e   :  { %2988 = vrot.lane.b32.xlu1 %v6353_v61, %s5853_s29 }
 0x852   :  { %v5520_v44 = vpop.eup %5519 }
 0x853   :  { %v2586_v53 = vpop.xlane.xlu0 %2585  ;;  %v2650_v52 = vmul.f32 %v5520_v44, %v7481_v49 }
 0x854   :  { %v2595_v16 = vpop.xlane.xlu2 %2594  ;;  %5521 = vrcp.f32 %v2586_v53 }
 0x855   :  { %5523 = vrcp.f32 %v2595_v16  ;;  %5034 = vmatmul.msk.f32.vlgmr.msrb.gmra.mxu1 %vm945_vm6, %v2650_v52 }
 0x856   :  { %5052 = vmatpush.xpose.msk.msrb.mxu1 %vm654_vm5, %v7475_v57 }
 0x85a   :  { %v5522_v4 = vpop.eup %5521  ;;  %5053 = vmatpush.xpose.msk.msrb.mxu1 %vm654_vm5, %v7466_v32 }
 0x85b   :  { %v5524_v2 = vpop.eup %5523  ;;  %v2648_v33 = vmul.f32 %v5522_v4, %v7488_v13  ;;  %v2502_v61 = vpop.xlane.xlu1 %2501 }
 0x85c   :  { %v2589_v54 = vpop.xlane.xlu0 %2588  ;;  %v2540_v23 = vsub.f32 %v7499_v40, %v2502_v61  ;;  %v2651_v49 = vmul.f32 %v5524_v2, %v7490_v6 }
 0x85d   :  { %5525 = vrcp.f32 %v2589_v54  ;;  %5032 = vmatmul.msk.f32.vlgmr.msrb.gmra.mxu0 %vm945_vm6, %v2648_v33 }
 0x85e   :  { %v2560_v44 = vmul.f32 1.442695, %v2540_v23  ;;  %5035 = vmatmul.msk.f32.gmra.mxu1 %vm945_vm6, %v2651_v49  ;;  %5048 = vmatpush.xpose.msk.msrb.mxu0 %vm654_vm5, %v7399_v31  ;;  %v2543_v31 = vsub.f32 %v7450_v48, %v2511_v14 }
 0x860   :  { %5527 = vpow2.f32 %v2560_v44  ;;  %v2566_v33 = vmul.f32 1.442695, %v2543_v31 }
 0x862   :  { %5049 = vmatpush.xpose.msk.msrb.mxu0 %vm654_vm5, %v7391_v5  ;;  %v2616_v32 = vpop.xlane.xlu2 %2615 }
 0x863   :  { %v5526_v57 = vpop.eup %5525  ;;  %5529 = vrcp.f32 %v2616_v32  ;;  %v2505_v13 = vpop.xlane.xlu1 %2504  ;;  %v8665_v32 = vld [vmem:[#allocation17_spill] sm:$0xff] }
 0x864   :  { %v2610_v40 = vpop.xlane.xlu0 %2609  ;;  %v2649_v53 = vmul.f32 %v5526_v57, %v7501_v0  ;;  %v2541_v6 = vsub.f32 %v7510_v34, %v2505_v13 }
 0x865   :  { %5531 = vrcp.f32 %v2610_v40  ;;  %v2551_v40 = vsub.f32 %v7464_v51, %v7547_v55 }
 0x866   :  { %5033 = vmatmul.msk.f32.gmra.mxu0 %vm945_vm6, %v2649_v53  ;;  %v7569_v52 = vpop.eup %5527  ;;  %v2562_v16 = vmul.f32 1.442695, %v2541_v6 }
 0x867   :  { %v2596_v4 = vsel %vm945_vm6, %v7569_v52, 0.0  ;;  %v2582_v53 = vmul.f32 1.442695, %v2551_v40 }
 0x868   :  { %5533 = vpow2.f32 %v2562_v16  ;;  %2597 = vadd.xlane.f32.xlu2 %v2596_v4 }
 0x869   :  { %v5530_v5 = vpop.eup %5529  ;;  %5535 = vpow2.f32 %v2566_v33 }
 0x86a   :  { %v2658_v0 = vmul.f32 %v5530_v5, %v7507_v42  ;;  %v2550_v42 = vsub.f32 %v7453_v41, %v7545_v24  ;;  %v8666_v41 = vld [vmem:[#allocation23_spill] sm:$0xff] }
 0x86b   :  { %v5532_v2 = vpop.eup %5531  ;;  %v2526_v61 = vpop.xlane.xlu1 %2525 }
 0x86c   :  { %v2656_v34 = vmul.f32 %v5532_v2, %v7512_v1  ;;  %5042 = vmatmul.msk.f32.vlgmr.msra.gmra.mxu1 %vm945_vm6, %v2658_v0  ;;  %v2548_v48 = vsub.f32 %v7521_v37, %v2526_v61  ;;  %v2580_v44 = vmul.f32 1.442695, %v2550_v42 }
 0x86e   :  { %5040 = vmatmul.msk.f32.vlgmr.msra.gmra.mxu0 %vm945_vm6, %v2656_v34  ;;  %v7578_v54 = vpop.eup %5533  ;;  %v2576_v23 = vmul.f32 1.442695, %v2548_v48 }
 0x86f   :  { %v2599_v14 = vsel %vm945_vm6, %v7578_v54, 0.0  ;;  %v7583_v49 = vpop.eup %5535 }
 0x870   :  { %2600 = vadd.xlane.f32.xlu0 %v2599_v14  ;;  %5537 = vpow2.f32 %v2576_v23  ;;  %v2605_v1 = vsel %vm945_vm6, %v7583_v49, 0.0 }
 0x871   :  { %5539 = vpow2.f32 %v2580_v44 }
 0x873   :  { %v2529_v6 = vpop.xlane.xlu1 %2528 }
 0x874   :  { %v2549_v0 = vsub.f32 %v7526_v29, %v2529_v6 }
 0x876   :  { %v7589_v57 = vpop.eup %5537  ;;  %v2578_v48 = vmul.f32 1.442695, %v2549_v0 }
 0x877   :  { %v2620_v37 = vsel %vm945_vm6, %v7589_v57, 0.0  ;;  %v7595_v13 = vpop.eup %5539 }
 0x878   :  { %2606 = vadd.xlane.f32.xlu1 %v2605_v1  ;;  %v2626_v24 = vsel %vm945_vm6, %v7595_v13, 0.0 }
 0x880   :  { %2621 = vadd.xlane.f32.xlu1 %v2620_v37  ;;  %3029 = vrot.lane.b32.xlu2 %v8665_v32, %s5852_s1 }
 0x884   :  { %5287 = vrot.lane.b32.xlu0 %v8666_v41, %s5851_s28 }
 0x888   :  { %2627 = vadd.xlane.f32.xlu1 %v2626_v24  ;;  %3025 = vrot.lane.b32.xlu2 %v8665_v32, %s5853_s29 }
 0x890   :  { %3027 = vrot.lane.b32.xlu2 %v6378_v27, %s5853_s29  ;;  %v8667_v27 = vld [vmem:[#allocation16_spill] sm:$0xff] }
 0x898   :  { %3070 = vrot.lane.b32.xlu2 %v6430_v47, %s5852_s1 }
 0x8a0   :  { %v2604_v31 = vpop.xlane.xlu0 %2603 }
 0x8a1   :  { %5541 = vrcp.f32 %v2604_v31  ;;  %3064 = vrot.lane.b32.xlu1 %v6383_v43, %s5853_s29 }
 0x8a2   :  { %5543 = vpow2.f32 %v2582_v53 }
 0x8a7   :  { %v5542_v16 = vpop.eup %5541 }
 0x8a8   :  { %v2654_v4 = vmul.f32 %v5542_v16, %v7533_v30  ;;  %v2613_v5 = vpop.xlane.xlu1 %2612  ;;  %v2619_v2 = vpop.xlane.xlu0 %2618 }
 0x8a9   :  { %5545 = vrcp.f32 %v2613_v5  ;;  %3107 = vrot.lane.b32.xlu1 %v8667_v27, %s5852_s1  ;;  %v7614_v33 = vpop.eup %5543 }
 0x8aa   :  { %5547 = vrcp.f32 %v2619_v2  ;;  %5038 = vmatmul.msk.f32.vlgmr.msrb.gmra.mxu3 %vm945_vm6, %v2654_v4  ;;  %v2629_v51 = vsel %vm945_vm6, %v7614_v33, 0.0 }
 0x8ab   :  { %5549 = vpow2.f32 %v2578_v48  ;;  %v7709_v48 = vld [vmem:[#allocation7 + $0x30] sm:$0xff] }
 0x8ae   :  { %2630 = vadd.xlane.f32.xlu0 %v2629_v51 }
 0x8af   :  { %v5546_v55 = vpop.eup %5545 }
 0x8b0   :  { %v5548_v34 = vpop.eup %5547  ;;  %v2657_v30 = vmul.f32 %v5546_v55, %v7539_v39 }
 0x8b1   :  { %3105 = vrot.lane.b32.xlu1 %v6397_v58, %s5853_s29  ;;  %v2659_v61 = vmul.f32 %v5548_v34, %v7537_v26  ;;  %v7632_v29 = vpop.eup %5549 }
 0x8b2   :  { %5041 = vmatmul.msk.f32.gmra.mxu0 %vm945_vm6, %v2657_v30  ;;  %v2623_v26 = vsel %vm945_vm6, %v7632_v29, 0.0 }
 0x8b3   :  { %5043 = vmatmul.msk.f32.gmra.mxu1 %vm945_vm6, %v2659_v61 }
 0x8b9   :  { %3187 = vrot.lane.b32.xlu1 %v6411_v38, %s5852_s1 }
 0x8ba   :  { %5050 = vmatmul.msk.f32.vlgmr.msrb.gmra.mxu0 %vm654_vm5, %v7404_v46 }
 0x8bb   :  { %5054 = vmatmul.msk.f32.vlgmr.msrb.gmra.mxu1 %vm654_vm5, %v7470_v10 }
 0x8c0   :  { %v2989_v39 = vpop.permute.xlu1 %2988 }
 0x8c1   :  { %3181 = vrot.lane.b32.xlu1 %v6427_v36, %s5853_s29  ;;  %2624 = vadd.xlane.f32.xlu2 %v2623_v26 }
 0x8c2   :  { %5051 = vmatmul.msk.f32.gmra.mxu0 %vm654_vm5, %v7447_v20  ;;  %3109 = vrot.lane.b32.xlu0 %v6397_v58, %s5852_s1 }
 0x8c3   :  { %5055 = vmatmul.msk.f32.gmra.mxu1 %vm654_vm5, %v2989_v39 }
 0x8c9   :  { %3226 = vrot.lane.b32.xlu1 %v6479_v25, %s5852_s1 }
 0x8ca   :  { %3146 = vrot.lane.b32.xlu0 %v6404_v35, %s5852_s1 }
 0x8d1   :  { %3222 = vrot.lane.b32.xlu1 %v6479_v25, %s5853_s29 }
 0x8d2   :  { %3185 = vrot.lane.b32.xlu0 %v6427_v36, %s5852_s1  ;;  %v7691_v6 = vpop.f32.mrf.mxu1 }
 0x8d9   :  { %3068 = vrot.lane.b32.xlu2 %v6383_v43, %s5852_s1 }
 0x8da   :  { %3183 = vrot.lane.b32.xlu0 %v6411_v38, %s5853_s29  ;;  %v8668_v38 = vld [vmem:[#allocation20_spill] sm:$0xff] }
 0x8db   :  { %v2598_v58 = vpop.xlane.xlu2 %2597  ;;  %v7695_v4 = vpop.f32.mrf.mxu1 }
 0x8dc   :  { %5551 = vrcp.f32 %v2598_v58 }
 0x8e1   :  { %3066 = vrot.lane.b32.xlu2 %v6430_v47, %s5853_s29 }
 0x8e2   :  { %v5552_v46 = vpop.eup %5551  ;;  %3220 = vrot.lane.b32.xlu0 %v6420_v45, %s5853_s29 }
 0x8e3   :  { %v2652_v25 = vmul.f32 %v5552_v46, %v7569_v52  ;;  %v3030_v20 = vpop.permute.xlu2 %3029  ;;  %v2601_v10 = vpop.xlane.xlu0 %2600 }
 0x8e4   :  { %5553 = vrcp.f32 %v2601_v10 }
 0x8e5   :  { %5036 = vmatmul.msk.f32.vlgmr.msra.gmra.mxu2 %vm945_vm6, %v2652_v25 }
 0x8e6   :  { %5056 = vmatpush.xpose.msk.msra.mxu2 %vm654_vm5, %v7459_v18 }
 0x8e9   :  { %3103 = vrot.lane.b32.xlu2 %v8667_v27, %s5853_s29  ;;  %v7699_v27 = vpop.f32.mrf.mxu1 }
 0x8ea   :  { %v5554_v43 = vpop.eup %5553  ;;  %5057 = vmatpush.xpose.msk.msra.mxu2 %vm654_vm5, %v3030_v20  ;;  %5297 = vrot.lane.b32.xlu0 %v8668_v38, %s5854_s30 }
 0x8eb   :  { %v2607_v36 = vpop.xlane.xlu1 %2606  ;;  %v7668_v47 = vpop.permute.xlu2 %3025  ;;  %v2653_v52 = vmul.f32 %v5554_v43, %v7578_v54 }
 0x8ec   :  { %5555 = vrcp.f32 %v2607_v36 }
 0x8ed   :  { %5037 = vmatmul.msk.f32.gmra.mxu2 %vm945_vm6, %v2653_v52  ;;  %v7724_v52 = vld [vmem:[#allocation7 + $0x38] sm:$0xff] }
 0x8f1   :  { %3148 = vrot.lane.b32.xlu2 %v6452_v17, %s5852_s1 }
 0x8f2   :  { %v5556_v18 = vpop.eup %5555 }
 0x8f3   :  { %v2622_v14 = vpop.xlane.xlu1 %2621  ;;  %v7674_v23 = vpop.permute.xlu2 %3027  ;;  %v2655_v42 = vmul.f32 %v5556_v18, %v7583_v49 }
 0x8f4   :  { %5557 = vrcp.f32 %v2622_v14 }
 0x8f5   :  { %5039 = vmatmul.msk.f32.gmra.mxu3 %vm945_vm6, %v2655_v42 }
 0x8f6   :  { %v5288_v1 = vpop.permute.xlu0 %5287 }
 0x8f7   :  { %v5289_v44 = vunpack.i.l.bf16 %v5288_v1  ;;  %v5290_v37 = vunpack.i.h.bf16 %v5288_v1 }
 0x8f9   :  { %3142 = vrot.lane.b32.xlu2 %v6404_v35, %s5853_s29  ;;  %2935 = vmatpush.msra.mxu3 %v5289_v44  ;;  %v7689_v35 = vpop.f32.mrf.mxu0 }
 0x8fa   :  { %v5558_v54 = vpop.eup %5557 }
 0x8fb   :  { %v2660_v32 = vmul.f32 %v5558_v54, %v7589_v57  ;;  %v2628_v24 = vpop.xlane.xlu1 %2627  ;;  %v3071_v40 = vpop.permute.xlu2 %3070  ;;  %2936 = vmatpush.msra.mxu3 %v5290_v37 }
 0x8fc   :  { %5559 = vrcp.f32 %v2628_v24 }
 0x8fd   :  { %5060 = vmatpush.xpose.msk.msrb.mxu3 %vm654_vm5, %v3071_v40  ;;  %5044 = vmatmul.msk.f32.vlgmr.msrb.gmra.mxu2 %vm945_vm6, %v2660_v32 }
 0x901   :  { %3144 = vrot.lane.b32.xlu2 %v6452_v17, %s5853_s29  ;;  %v7693_v16 = vpop.f32.mrf.mxu0 }
 0x902   :  { %v5560_v49 = vpop.eup %5559 }
 0x903   :  { %v2662_v53 = vmul.f32 %v5560_v49, %v7595_v13 }
 0x905   :  { %5046 = vmatmul.msk.f32.vlgmr.msra.gmra.mxu3 %vm945_vm6, %v2662_v53 }
 0x909   :  { %3224 = vrot.lane.b32.xlu2 %v6420_v45, %s5852_s1  ;;  %v7697_v2 = vpop.f32.mrf.mxu0 }
 0x913   :  { %v3065_v57 = vpop.permute.xlu1 %3064 }
 0x91b   :  { %v3108_v31 = vpop.permute.xlu1 %3107 }
 0x921   :  { %v2631_v5 = vpop.xlane.xlu0 %2630 }
 0x922   :  { %5561 = vrcp.f32 %v2631_v5 }
 0x923   :  { %v3106_v17 = vpop.permute.xlu1 %3105 }
 0x928   :  { %v5562_v13 = vpop.eup %5561 }
 0x929   :  { %v2663_v45 = vmul.f32 %v5562_v13, %v7614_v33 }
 0x92b   :  { %v3188_v51 = vpop.permute.xlu1 %3187  ;;  %5047 = vmatmul.msk.f32.gmra.mxu3 %vm945_vm6, %v2663_v45 }
 0x92c   :  { %5072 = vmatpush.xpose.msk.msrb.mxu2 %vm654_vm5, %v3188_v51 }
 0x92f   :  { %v7704_v55 = vpop.f32.mrf.mxu0 }
 0x930   :  { %v7706_v0 = vpop.f32.mrf.mxu1 }
 0x933   :  { %v3182_v34 = vpop.permute.xlu1 %3181 }
 0x934   :  { %v2625_v30 = vpop.xlane.xlu2 %2624  ;;  %v3110_v61 = vpop.permute.xlu0 %3109 }
 0x935   :  { %5563 = vrcp.f32 %v2625_v30  ;;  %5064 = vmatpush.xpose.msk.msra.mxu0 %vm654_vm5, %v3110_v61 }
 0x937   :  { %v2980_v39 = vpop.f32.mrf.mxu0 }
 0x938   :  { %v7712_v33 = vadd.f32 %v2980_v39, %v7709_v48  ;;  %v3019_v26 = vpop.f32.mrf.mxu1 }
 0x939   :  { %v7715_v58 = vadd.f32 %v3019_v26, %v7709_v48  ;;  %5065 = vmatpush.xpose.msk.msra.mxu0 %vm654_vm5, %v3108_v31 }
 0x93a   :  { %v3259_v46 = vsel %vm945_vm6, %v7712_v33, -inf }
 0x93b   :  { %v5564_v25 = vpop.eup %5563  ;;  %3260 = vmax.xlane.f32.xlu2 %v3259_v46  ;;  %v3265_v20 = vsel %vm945_vm6, %v7715_v58, -inf  ;;  %v3227_v36 = vpop.permute.xlu1 %3226 }
 0x93c   :  { %3266 = vmax.xlane.f32.xlu1 %v3265_v20  ;;  %v3069_v10 = vpop.permute.xlu2 %3068  ;;  %v3147_v43 = vpop.permute.xlu0 %3146  ;;  %v2661_v38 = vmul.f32 %v5564_v25, %v7632_v29 }
 0x93d   :  { %5061 = vmatpush.xpose.msk.msrb.mxu3 %vm654_vm5, %v3069_v10 }
 0x93e   :  { %5045 = vmatmul.msk.f32.gmra.mxu2 %vm945_vm6, %v2661_v38 }
 0x93f   :  { %v2983_v18 = vpop.f32.mrf.mxu0 }
 0x940   :  { %v7729_v14 = vadd.f32 %v2983_v18, %v7724_v52  ;;  %v3022_v42 = vpop.f32.mrf.mxu1  ;;  %5062 = vmatmul.msk.f32.vlgmr.msrb.gmra.mxu3 %vm654_vm5, %v3065_v57 }
 0x941   :  { %5076 = vmatpush.xpose.msk.msra.mxu3 %vm654_vm5, %v3227_v36  ;;  %v7733_v1 = vadd.f32 %v3022_v42, %v7724_v52 }
 0x942   :  { %v3262_v29 = vsel %vm945_vm6, %v7729_v14, -inf }
 0x943   :  { %3263 = vmax.xlane.f32.xlu0 %v3262_v29  ;;  %v3268_v44 = vsel %vm945_vm6, %v7733_v1, -inf  ;;  %v3223_v5 = vpop.permute.xlu1 %3222 }
 0x944   :  { %3269 = vmax.xlane.f32.xlu2 %v3268_v44  ;;  %v3067_v37 = vpop.permute.xlu2 %3066  ;;  %v3186_v54 = vpop.permute.xlu0 %3185 }
 0x945   :  { %5073 = vmatpush.xpose.msk.msrb.mxu2 %vm654_vm5, %v3186_v54 }
 0x946   :  { %5058 = vmatmul.msk.f32.vlgmr.msra.gmra.mxu2 %vm654_vm5, %v7668_v47 }
 0x948   :  { %5063 = vmatmul.msk.f32.gmra.mxu3 %vm654_vm5, %v3067_v37 }
 0x94c   :  { %v3104_v32 = vpop.permute.xlu2 %3103  ;;  %v3184_v24 = vpop.permute.xlu0 %3183 }
 0x94d   :  { %5066 = vmatmul.msk.f32.vlgmr.msra.gmra.mxu0 %vm654_vm5, %v3104_v32 }
 0x94e   :  { %5059 = vmatmul.msk.f32.gmra.mxu2 %vm654_vm5, %v7674_v23 }
 0x954   :  { %v3149_v40 = vpop.permute.xlu2 %3148  ;;  %v3221_v49 = vpop.permute.xlu0 %3220 }
 0x955   :  { %5292 = vrot.lane.b32.xlu1 %v6489_v59, %s5854_s30  ;;  %5067 = vmatmul.msk.f32.gmra.mxu0 %vm654_vm5, %v3106_v17  ;;  %v7758_v17 = vpop.f32.mrf.mxu3 }
 0x956   :  { %5068 = vmatpush.xpose.msk.msra.mxu1 %vm654_vm5, %v3149_v40  ;;  %5074 = vmatmul.msk.f32.vlgmr.msrb.gmra.mxu2 %vm654_vm5, %v3182_v34 }
 0x95a   :  { %5069 = vmatpush.xpose.msk.msra.mxu1 %vm654_vm5, %v3147_v43 }
 0x95c   :  { %v3143_v47 = vpop.permute.xlu2 %3142  ;;  %v5298_v53 = vpop.permute.xlu0 %5297 }
 0x95d   :  { %v5299_v57 = vunpack.i.l.bf16 %v5298_v53  ;;  %5070 = vmatmul.msk.f32.vlgmr.msra.gmra.mxu1 %vm654_vm5, %v3143_v47  ;;  %v5300_v23 = vunpack.i.h.bf16 %v5298_v53 }
 0x95e   :  { %5075 = vmatmul.msk.f32.gmra.mxu2 %vm654_vm5, %v3184_v24 }
 0x95f   :  { %3496 = vmatpush.msrb.mxu1 %v5299_v57 }
 0x961   :  { %3497 = vmatpush.msrb.mxu1 %v5300_v23 }
 0x964   :  { %v3145_v31 = vpop.permute.xlu2 %3144 }
 0x965   :  { %5071 = vmatmul.msk.f32.gmra.mxu1 %vm654_vm5, %v3145_v31 }
 0x968   :  { %v7760_v13 = vpop.f32.mrf.mxu2 }
 0x96c   :  { %v3225_v59 = vpop.permute.xlu2 %3224 }
 0x96d   :  { %5077 = vmatpush.xpose.msk.msra.mxu3 %vm654_vm5, %v3225_v59 }
 0x970   :  { %5078 = vmatmul.msk.f32.vlgmr.msra.gmra.mxu3 %vm654_vm5, %v3221_v49  ;;  %v7764_v51 = vpop.f32.mrf.mxu2 }
 0x978   :  { %5079 = vmatmul.msk.f32.gmra.mxu3 %vm654_vm5, %v3223_v5  ;;  %v7762_v45 = vpop.f32.mrf.mxu3 }
 0x980   :  { %v7768_v30 = vpop.f32.mrf.mxu2 }
 0x988   :  { %v7766_v34 = vpop.f32.mrf.mxu3 }
 0x9ae   :  { %v7770_v61 = vpop.f32.mrf.mxu3 }
 0x9af   :  { %v3267_v39 = vpop.xlane.xlu1 %3266 }
 0x9b0   :  { %v3309_v42 = vsub.f32 %v7715_v58, %v3267_v39 }
 0x9b2   :  { %v3327_v37 = vmul.f32 1.442695, %v3309_v42 }
 0x9b4   :  { %5565 = vpow2.f32 %v3327_v37 }
 0x9b6   :  { %v3264_v54 = vpop.xlane.xlu0 %3263 }
 0x9b7   :  { %v3308_v40 = vsub.f32 %v7729_v14, %v3264_v54 }
 0x9b9   :  { %v3325_v58 = vmul.f32 1.442695, %v3308_v40 }
 0x9ba   :  { %v7791_v47 = vpop.eup %5565 }
 0x9bb   :  { %5567 = vpow2.f32 %v3325_v58  ;;  %v3361_v5 = vsel %vm945_vm6, %v7791_v47, 0.0 }
 0x9c1   :  { %v7772_v26 = vpop.f32.mrf.mxu2 }
 0x9c3   :  { %v3097_v46 = vpop.f32.mrf.mxu3 }
 0x9c4   :  { %v7775_v25 = vadd.f32 %v3097_v46, %v7709_v48  ;;  %v7805_v46 = vpop.eup %5567 }
 0x9c6   :  { %v3277_v20 = vsel %vm945_vm6, %v7775_v25, -inf }
 0x9c7   :  { %v5293_v10 = vpop.permute.xlu1 %5292  ;;  %3278 = vmax.xlane.f32.xlu1 %v3277_v20 }
 0x9c8   :  { %v5294_v43 = vunpack.i.l.bf16 %v5293_v10  ;;  %v5295_v36 = vunpack.i.h.bf16 %v5293_v10 }
 0x9c9   :  { %v3058_v38 = vpop.f32.mrf.mxu2 }
 0x9ca   :  { %3461 = vmatpush.msrb.mxu0 %v5294_v43  ;;  %v7780_v18 = vadd.f32 %v3058_v38, %v7709_v48  ;;  %v3136_v59 = vpop.f32.mrf.mxu0 }
 0x9cb   :  { %v3100_v44 = vpop.f32.mrf.mxu3  ;;  %v7808_v20 = vadd.f32 %v3136_v59, %v7709_v48 }
 0x9cc   :  { %3462 = vmatpush.msrb.mxu0 %v5295_v36  ;;  %v3271_v29 = vsel %vm945_vm6, %v7780_v18, -inf  ;;  %v7786_v32 = vadd.f32 %v3100_v44, %v7724_v52  ;;  %v3358_v36 = vsel %vm945_vm6, %v7805_v46, 0.0 }
 0x9cd   :  { %3272 = vmax.xlane.f32.xlu0 %v3271_v29  ;;  %v3283_v42 = vsel %vm945_vm6, %v7808_v20, -inf }
 0x9ce   :  { %v3280_v49 = vsel %vm945_vm6, %v7786_v32, -inf }
 0x9d1   :  { %v3061_v24 = vpop.f32.mrf.mxu2 }
 0x9d2   :  { %v3139_v29 = vpop.f32.mrf.mxu0  ;;  %v7822_v54 = vadd.f32 %v3061_v24, %v7724_v52 }
 0x9d3   :  { %v3140_v44 = vadd.f32 %v3139_v29, %v7724_v52 }
 0x9d4   :  { %v3274_v40 = vsel %vm945_vm6, %v7822_v54, -inf }
 0x9d5   :  { %3281 = vmax.xlane.f32.xlu0 %v3280_v49  ;;  %v3286_v37 = vsel %vm945_vm6, %v3140_v44, -inf  ;;  %v3261_v49 = vpop.xlane.xlu2 %3260 }
 0x9d6   :  { %v3307_v58 = vsub.f32 %v7712_v33, %v3261_v49 }
 0x9d9   :  { %v3214_v53 = vpop.f32.mrf.mxu2 }
 0x9da   :  { %v7794_v57 = vadd.f32 %v3214_v53, %v7709_v48  ;;  %v3175_v23 = vpop.f32.mrf.mxu1  ;;  %v3323_v53 = vmul.f32 1.442695, %v3307_v58 }
 0x9db   :  { %v7797_v31 = vadd.f32 %v3175_v23, %v7709_v48 }
 0x9dc   :  { %v3295_v14 = vsel %vm945_vm6, %v7794_v57, -inf  ;;  %5569 = vpow2.f32 %v3323_v53 }
 0x9dd   :  { %3296 = vmax.xlane.f32.xlu1 %v3295_v14  ;;  %3362 = vadd.xlane.f32.xlu0 %v3361_v5  ;;  %v3289_v39 = vsel %vm945_vm6, %v7797_v31, -inf  ;;  %v3270_v23 = vpop.xlane.xlu2 %3269 }
 0x9de   :  { %3290 = vmax.xlane.f32.xlu2 %v3289_v39  ;;  %v3310_v14 = vsub.f32 %v7733_v1, %v3270_v23 }
 0x9e0   :  { %v3329_v39 = vmul.f32 1.442695, %v3310_v14 }
 0x9e1   :  { %v3217_v10 = vpop.f32.mrf.mxu2 }
 0x9e2   :  { %v7811_v43 = vadd.f32 %v3217_v10, %v7724_v52  ;;  %v7829_v59 = vpop.eup %5569  ;;  %v3178_v5 = vpop.f32.mrf.mxu1  ;;  %5571 = vpow2.f32 %v3329_v39 }
 0x9e3   :  { %v3355_v24 = vsel %vm945_vm6, %v7829_v59, 0.0  ;;  %v7835_v10 = vadd.f32 %v3178_v5, %v7724_v52 }
 0x9e4   :  { %v3298_v38 = vsel %vm945_vm6, %v7811_v43, -inf }
 0x9e5   :  { %3299 = vmax.xlane.f32.xlu1 %v3298_v38  ;;  %3359 = vadd.xlane.f32.xlu0 %v3358_v36  ;;  %v3292_v33 = vsel %vm945_vm6, %v7835_v10, -inf }
 0x9e6   :  { %3284 = vmax.xlane.f32.xlu2 %v3283_v42 }
 0x9e8   :  { %v7840_v1 = vpop.eup %5571 }
 0x9ee   :  { %3287 = vmax.xlane.f32.xlu2 %v3286_v37 }
 0x9f6   :  { %3275 = vmax.xlane.f32.xlu2 %v3274_v40  ;;  %v3364_v40 = vsel %vm945_vm6, %v7840_v1, 0.0 }
 0xa0e   :  { %5302 = vrot.lane.b32.xlu2 %v8660_v21, %s5854_s30  ;;  %v3253_v21 = vpop.f32.mrf.mxu3 }
 0xa16   :  { %v3256_v49 = vpop.f32.mrf.mxu3 }
 0xa17   :  { %v7846_v23 = vadd.f32 %v3256_v49, %v7724_v52 }
 0xa37   :  { %3356 = vadd.xlane.f32.xlu2 %v3355_v24 }
 0xa3a   :  { %v3279_v38 = vpop.xlane.xlu1 %3278 }
 0xa3b   :  { %v3313_v29 = vsub.f32 %v7775_v25, %v3279_v38  ;;  %v3304_v25 = vsel %vm945_vm6, %v7846_v23, -inf }
 0xa3d   :  { %v3335_v58 = vmul.f32 1.442695, %v3313_v29 }
 0xa3f   :  { %3293 = vmax.xlane.f32.xlu2 %v3292_v33 }
 0xa40   :  { %v3273_v36 = vpop.xlane.xlu0 %3272 }
 0xa41   :  { %v3311_v42 = vsub.f32 %v7780_v18, %v3273_v36 }
 0xa43   :  { %v3331_v37 = vmul.f32 1.442695, %v3311_v42  ;;  %v7860_v42 = vadd.f32 %v3253_v21, %v7709_v48 }
 0xa45   :  { %5573 = vpow2.f32 %v3331_v37 }
 0xa46   :  { %5575 = vpow2.f32 %v3335_v58 }
 0xa47   :  { %3365 = vadd.xlane.f32.xlu2 %v3364_v40  ;;  %v3301_v40 = vsel %vm945_vm6, %v7860_v42, -inf }
 0xa48   :  { %v3282_v53 = vpop.xlane.xlu0 %3281 }
 0xa49   :  { %v3314_v33 = vsub.f32 %v7786_v32, %v3282_v53 }
 0xa4b   :  { %v7848_v14 = vpop.eup %5573  ;;  %v3337_v36 = vmul.f32 1.442695, %v3314_v33 }
 0xa4c   :  { %v3367_v18 = vsel %vm945_vm6, %v7848_v14, 0.0  ;;  %v7854_v5 = vpop.eup %5575 }
 0xa4d   :  { %3368 = vadd.xlane.f32.xlu1 %v3367_v18  ;;  %v3373_v52 = vsel %vm945_vm6, %v7854_v5, 0.0 }
 0xa4f   :  { %3305 = vmax.xlane.f32.xlu2 %v3304_v25 }
 0xa50   :  { %v3363_v24 = vpop.xlane.xlu0 %3362 }
 0xa51   :  { %5577 = vrcp.f32 %v3363_v24  ;;  %v3291_v39 = vpop.xlane.xlu2 %3290 }
 0xa52   :  { %5579 = vpow2.f32 %v3337_v36  ;;  %v3317_v53 = vsub.f32 %v7797_v31, %v3291_v39 }
 0xa55   :  { %3374 = vadd.xlane.f32.xlu1 %v3373_v52 }
 0xa57   :  { %v5578_v38 = vpop.eup %5577 }
 0xa58   :  { %v3421_v29 = vmul.f32 %v5578_v38, %v7791_v47  ;;  %v7866_v32 = vpop.eup %5579  ;;  %v3343_v47 = vmul.f32 1.442695, %v3317_v53 }
 0xa59   :  { %v3285_v37 = vpop.xlane.xlu2 %3284  ;;  %v3376_v48 = vsel %vm945_vm6, %v7866_v32, 0.0 }
 0xa5a   :  { %5082 = vmatmul.msk.f32.vlgmr.msrb.gmra.mxu1 %vm945_vm6, %v3421_v29  ;;  %v3315_v53 = vsub.f32 %v7808_v20, %v3285_v37 }
 0xa5d   :  { %3302 = vmax.xlane.f32.xlu1 %v3301_v40  ;;  %v8669_v40 = vld [vmem:[#allocation22_spill] sm:$0xff] }
 0xa61   :  { %v3288_v49 = vpop.xlane.xlu2 %3287 }
 0xa62   :  { %v3316_v58 = vsub.f32 %v3140_v44, %v3288_v49  ;;  %v8670_v49 = vld [vmem:[#allocation18_spill] sm:$0xff] }
 0xa64   :  { %v3341_v18 = vmul.f32 1.442695, %v3316_v58  ;;  %v8671_v58 = vld [vmem:[#allocation24_spill] sm:$0xff] }
 0xa65   :  { %3377 = vadd.xlane.f32.xlu1 %v3376_v48  ;;  %v3339_v48 = vmul.f32 1.442695, %v3315_v53 }
 0xa66   :  { %5581 = vpow2.f32 %v3341_v18  ;;  %v3297_v18 = vpop.xlane.xlu1 %3296 }
 0xa67   :  { %5583 = vpow2.f32 %v3343_v47 }
 0xa69   :  { %v3276_v21 = vpop.xlane.xlu2 %3275 }
 0xa6a   :  { %v3312_v25 = vsub.f32 %v7822_v54, %v3276_v21  ;;  %v3319_v21 = vsub.f32 %v7794_v57, %v3297_v18 }
 0xa6c   :  { %v7872_v24 = vpop.eup %5581  ;;  %v3333_v33 = vmul.f32 1.442695, %v3312_v25  ;;  %v3360_v25 = vpop.xlane.xlu0 %3359 }
 0xa6d   :  { %v3382_v52 = vsel %vm945_vm6, %v7872_v24, 0.0  ;;  %v7876_v44 = vpop.eup %5583 }
 0xa6e   :  { %5585 = vpow2.f32 %v3333_v33  ;;  %3383 = vadd.xlane.f32.xlu2 %v3382_v52  ;;  %v3385_v54 = vsel %vm945_vm6, %v7876_v44, 0.0  ;;  %v3347_v33 = vmul.f32 1.442695, %v3319_v21  ;;  %v3300_v52 = vpop.xlane.xlu1 %3299 }
 0xa6f   :  { %5587 = vpow2.f32 %v3339_v48 }
 0xa71   :  { %v5303_v31 = vpop.permute.xlu2 %5302 }
 0xa72   :  { %v5304_v39 = vunpack.i.l.bf16 %v5303_v31  ;;  %v5305_v36 = vunpack.i.h.bf16 %v5303_v31 }
 0xa74   :  { %v7878_v38 = vpop.eup %5585  ;;  %3531 = vmatpush.msra.mxu2 %v5304_v39 }
 0xa75   :  { %v3370_v29 = vsel %vm945_vm6, %v7878_v38, 0.0  ;;  %v7894_v31 = vpop.eup %5587 }
 0xa76   :  { %3386 = vadd.xlane.f32.xlu2 %v3385_v54  ;;  %3532 = vmatpush.msra.mxu2 %v5305_v36  ;;  %v3379_v37 = vsel %vm945_vm6, %v7894_v31, 0.0 }
 0xa77   :  { %3371 = vadd.xlane.f32.xlu0 %v3370_v29 }
 0xa7e   :  { %5312 = vrot.lane.b32.xlu1 %v8669_v40, %s5854_s30 }
 0xa8b   :  { %5307 = vrot.lane.b32.xlu0 %v8670_v49, %s5854_s30 }
 0xa8e   :  { %5317 = vrot.lane.b32.xlu2 %v8661_v62, %s5854_s30  ;;  %v3320_v62 = vsub.f32 %v7811_v43, %v3300_v52 }
 0xa90   :  { %v3349_v29 = vmul.f32 1.442695, %v3320_v62 }
 0xa96   :  { %5322 = vrot.lane.b32.xlu2 %v8671_v58, %s5854_s30 }
 0xaaa   :  { %v3357_v47 = vpop.xlane.xlu2 %3356 }
 0xaab   :  { %5589 = vrcp.f32 %v3357_v47 }
 0xaac   :  { %5591 = vrcp.f32 %v3360_v25 }
 0xaad   :  { %5593 = vpow2.f32 %v3347_v33 }
 0xab1   :  { %v5590_v39 = vpop.eup %5589 }
 0xab2   :  { %v3419_v36 = vmul.f32 %v5590_v39, %v7829_v59  ;;  %v3294_v54 = vpop.xlane.xlu2 %3293  ;;  %v5592_v40 = vpop.eup %5591 }
 0xab3   :  { %v3318_v20 = vsub.f32 %v7835_v10, %v3294_v54  ;;  %v7902_v49 = vpop.eup %5593  ;;  %v3420_v59 = vmul.f32 %v5592_v40, %v7805_v46 }
 0xab4   :  { %5080 = vmatmul.msk.f32.vlgmr.msrb.gmra.mxu0 %vm945_vm6, %v3419_v36  ;;  %v3391_v10 = vsel %vm945_vm6, %v7902_v49, 0.0 }
 0xab5   :  { %v3345_v57 = vmul.f32 1.442695, %v3318_v20  ;;  %3380 = vadd.xlane.f32.xlu0 %v3379_v37 }
 0xab7   :  { %5595 = vpow2.f32 %v3345_v57 }
 0xab8   :  { %5597 = vpow2.f32 %v3349_v29 }
 0xaba   :  { %v3366_v43 = vpop.xlane.xlu2 %3365 }
 0xabb   :  { %5599 = vrcp.f32 %v3366_v43 }
 0xabc   :  { %5081 = vmatmul.msk.f32.gmra.mxu0 %vm945_vm6, %v3420_v59 }
 0xabd   :  { %v7908_v58 = vpop.eup %5595  ;;  %3392 = vadd.xlane.f32.xlu0 %v3391_v10 }
 0xabe   :  { %v3388_v53 = vsel %vm945_vm6, %v7908_v58, 0.0  ;;  %v7912_v18 = vpop.eup %5597 }
 0xabf   :  { %3389 = vadd.xlane.f32.xlu1 %v3388_v53  ;;  %v3394_v33 = vsel %vm945_vm6, %v7912_v18, 0.0 }
 0xac0   :  { %v3369_v48 = vpop.xlane.xlu1 %3368 }
 0xac1   :  { %v5600_v47 = vpop.eup %5599  ;;  %5601 = vrcp.f32 %v3369_v48 }
 0xac2   :  { %v3306_v21 = vpop.xlane.xlu2 %3305  ;;  %v3422_v46 = vmul.f32 %v5600_v47, %v7840_v1 }
 0xac3   :  { %v3322_v25 = vsub.f32 %v7846_v23, %v3306_v21 }
 0xac4   :  { %5083 = vmatmul.msk.f32.gmra.mxu1 %vm945_vm6, %v3422_v46 }
 0xac5   :  { %v3353_v52 = vmul.f32 1.442695, %v3322_v25  ;;  %3395 = vadd.xlane.f32.xlu0 %v3394_v33 }
 0xac7   :  { %v5602_v39 = vpop.eup %5601  ;;  %5603 = vpow2.f32 %v3353_v52 }
 0xac8   :  { %v3423_v62 = vmul.f32 %v5602_v39, %v7848_v14  ;;  %v3375_v36 = vpop.xlane.xlu1 %3374 }
 0xaca   :  { %5084 = vmatmul.msk.f32.vlgmr.msra.gmra.mxu2 %vm945_vm6, %v3423_v62 }
 0xacd   :  { %v7921_v54 = vpop.eup %5603 }
 0xace   :  { %v3400_v1 = vsel %vm945_vm6, %v7921_v54, 0.0 }
 0xacf   :  { %3401 = vadd.xlane.f32.xlu1 %v3400_v1 }
 0xad0   :  { %v3303_v23 = vpop.xlane.xlu1 %3302 }
 0xad1   :  { %v3321_v20 = vsub.f32 %v7860_v42, %v3303_v23 }
 0xad3   :  { %v3351_v37 = vmul.f32 1.442695, %v3321_v20 }
 0xad5   :  { %5605 = vpow2.f32 %v3351_v37 }
 0xad8   :  { %v3378_v40 = vpop.xlane.xlu1 %3377 }
 0xad9   :  { %5327 = vrot.lane.b32.xlu0 %v8666_v41, %s5854_s30 }
 0xadb   :  { %v7928_v57 = vpop.eup %5605 }
 0xadc   :  { %v3397_v14 = vsel %vm945_vm6, %v7928_v57, 0.0 }
 0xadd   :  { %3398 = vadd.xlane.f32.xlu2 %v3397_v14 }
 0xae1   :  { %3795 = vrot.lane.b32.xlu0 %v7689_v35, %s5855_s15  ;;  %v3384_v29 = vpop.xlane.xlu2 %3383 }
 0xae8   :  { %3731 = vrot.lane.b32.xlu1 %v7359_v8, %s5839_s22 }
 0xae9   :  { %3733 = vrot.lane.b32.xlu0 %v7364_v19, %s5839_s22  ;;  %v3387_v42 = vpop.xlane.xlu2 %3386 }
 0xaea   :  { %v3372_v41 = vpop.xlane.xlu0 %3371 }
 0xaeb   :  { %5607 = vrcp.f32 %v3372_v41  ;;  %v8673_v41 = vld [vmem:[#allocation19_spill] sm:$0xff] }
 0xaec   :  { %5609 = vrcp.f32 %v3387_v42 }
 0xaed   :  { %5611 = vrcp.f32 %v3375_v36 }
 0xaee   :  { %5613 = vrcp.f32 %v3378_v40 }
 0xaf0   :  { %3735 = vrot.lane.b32.xlu1 %v7356_v3, %s5839_s22  ;;  %v5313_v43 = vpop.permute.xlu1 %5312  ;;  %v3499_v3 = vpop.f32.mrf.mxu1 }
 0xaf1   :  { %v5608_v59 = vpop.eup %5607  ;;  %v5314_v10 = vunpack.i.l.bf16 %v5313_v43  ;;  %v5318_v53 = vpop.permute.xlu2 %5317  ;;  %v5315_v21 = vunpack.i.h.bf16 %v5313_v43 }
 0xaf2   :  { %v5610_v35 = vpop.eup %5609  ;;  %v5319_v48 = vunpack.i.l.bf16 %v5318_v53  ;;  %v3424_v47 = vmul.f32 %v5608_v59, %v7878_v38  ;;  %v5320_v8 = vunpack.i.h.bf16 %v5318_v53  ;;  %v8675_v53 = vld [vmem:[#allocation21_spill] sm:$0xff] }
 0xaf3   :  { %3601 = vmatpush.msra.mxu0 %v5314_v10  ;;  %v3429_v19 = vmul.f32 %v5610_v35, %v7876_v44  ;;  %v5612_v52 = vpop.eup %5611  ;;  %v8674_v10 = vld [vmem:[#allocation25_spill] sm:$0xff] }
 0xaf4   :  { %5085 = vmatmul.msk.f32.gmra.mxu2 %vm945_vm6, %v3424_v47  ;;  %3636 = vmatpush.msra.mxu1 %v5319_v48  ;;  %v5614_v62 = vpop.eup %5613 }
 0xaf5   :  { %3797 = vrot.lane.b32.xlu2 %v7693_v16, %s5855_s15  ;;  %3602 = vmatpush.msra.mxu0 %v5315_v21  ;;  %v3425_v16 = vmul.f32 %v5612_v52, %v7854_v5  ;;  %v3426_v36 = vmul.f32 %v5614_v62, %v7866_v32 }
 0xaf6   :  { %3637 = vmatpush.msra.mxu1 %v5320_v8 }
 0xaf7   :  { %5090 = vmatmul.msk.f32.vlgmr.msra.gmra.mxu1 %vm945_vm6, %v3429_v19 }
 0xaf8   :  { %3863 = vrot.lane.b32.xlu1 %v3499_v3, %s5856_s16  ;;  %v8676_v3 = vld [vmem:[#allocation35_spill] sm:$0xff] }
 0xaf9   :  { %v5323_v38 = vpop.permute.xlu2 %5322 }
 0xafa   :  { %v5324_v46 = vunpack.i.l.bf16 %v5323_v38  ;;  %v5325_v25 = vunpack.i.h.bf16 %v5323_v38 }
 0xafc   :  { %3671 = vmatpush.msrb.mxu2 %v5324_v46 }
 0xafd   :  { %v5308_v33 = vpop.permute.xlu0 %5307 }
 0xafe   :  { %v5309_v39 = vunpack.i.l.bf16 %v5308_v33  ;;  %3672 = vmatpush.msrb.mxu2 %v5325_v25  ;;  %v5310_v44 = vunpack.i.h.bf16 %v5308_v33 }
 0xb00   :  { %3566 = vmatpush.msrb.mxu3 %v5309_v39  ;;  %3801 = vrot.lane.b32.xlu1 %v7695_v4, %s5855_s15 }
 0xb02   :  { %3567 = vmatpush.msrb.mxu3 %v5310_v44 }
 0xb03   :  { %5086 = vmatmul.msk.f32.vlgmr.msrb.gmra.mxu3 %vm945_vm6, %v3425_v16  ;;  %v8677_v16 = vld [vmem:[#allocation36_spill] sm:$0xff] }
 0xb08   :  { %3803 = vrot.lane.b32.xlu1 %v7760_v13, %s5855_s15 }
 0xb0b   :  { %5087 = vmatmul.msk.f32.gmra.mxu3 %vm945_vm6, %v3426_v36 }
 0xb10   :  { %3805 = vrot.lane.b32.xlu1 %v7764_v51, %s5855_s15 }
 0xb18   :  { %3807 = vrot.lane.b32.xlu1 %v7758_v17, %s5855_s15 }
 0xb20   :  { %3809 = vrot.lane.b32.xlu1 %v7762_v45, %s5855_s15 }
 0xb28   :  { %v3381_v4 = vpop.xlane.xlu0 %3380  ;;  %3811 = vrot.lane.b32.xlu1 %v7697_v2, %s5855_s15 }
 0xb29   :  { %5615 = vrcp.f32 %v3381_v4 }
 0xb2a   :  { %5617 = vrcp.f32 %v3384_v29 }
 0xb2f   :  { %v5616_v5 = vpop.eup %5615 }
 0xb30   :  { %v3427_v13 = vmul.f32 %v5616_v5, %v7894_v31  ;;  %v3393_v32 = vpop.xlane.xlu0 %3392  ;;  %3813 = vrot.lane.b32.xlu1 %v7704_v55, %s5855_s15  ;;  %v5618_v45 = vpop.eup %5617 }
 0xb31   :  { %5619 = vrcp.f32 %v3393_v32  ;;  %v3464_v51 = vpop.f32.mrf.mxu0  ;;  %v3428_v31 = vmul.f32 %v5618_v45, %v7872_v24 }
 0xb32   :  { %5088 = vmatmul.msk.f32.vlgmr.msra.gmra.mxu0 %vm945_vm6, %v3427_v13  ;;  %v3390_v17 = vpop.xlane.xlu1 %3389  ;;  %3859 = vrot.lane.b32.xlu0 %v3464_v51, %s5856_s16 }
 0xb33   :  { %5621 = vrcp.f32 %v3390_v17  ;;  %v8678_v17 = vld [vmem:[#allocation27_spill] sm:$0xff] }
 0xb37   :  { %v5620_v1 = vpop.eup %5619 }
 0xb38   :  { %v3431_v2 = vmul.f32 %v5620_v1, %v7902_v49  ;;  %v3396_v23 = vpop.xlane.xlu0 %3395  ;;  %3815 = vrot.lane.b32.xlu1 %v7699_v27, %s5855_s15 }
 0xb39   :  { %v5622_v20 = vpop.eup %5621  ;;  %5623 = vrcp.f32 %v3396_v23  ;;  %v3467_v55 = vpop.f32.mrf.mxu0 }
 0xb3a   :  { %5089 = vmatmul.msk.f32.gmra.mxu0 %vm945_vm6, %v3428_v31  ;;  %5092 = vmatmul.msk.f32.vlgmr.msrb.gmra.mxu2 %vm945_vm6, %v3431_v2  ;;  %v3430_v37 = vmul.f32 %v5622_v20, %v7908_v58 }
 0xb3b   :  { %3861 = vrot.lane.b32.xlu0 %v3467_v55, %s5856_s16 }
 0xb3c   :  { %5091 = vmatmul.msk.f32.gmra.mxu1 %vm945_vm6, %v3430_v37  ;;  %v8679_v37 = vld [vmem:[#allocation28_spill] sm:$0xff] }
 0xb3f   :  { %v5624_v49 = vpop.eup %5623 }
 0xb40   :  { %3817 = vrot.lane.b32.xlu1 %v7706_v0, %s5855_s15  ;;  %v3432_v27 = vmul.f32 %v5624_v49, %v7912_v18 }
 0xb41   :  { %v3502_v24 = vpop.f32.mrf.mxu1 }
 0xb42   :  { %5093 = vmatmul.msk.f32.gmra.mxu2 %vm945_vm6, %v3432_v27  ;;  %3865 = vrot.lane.b32.xlu2 %v3502_v24, %s5856_s16 }
 0xb43   :  { %3799 = vrot.lane.b32.xlu0 %v7691_v6, %s5855_s15  ;;  %v3402_v6 = vpop.xlane.xlu1 %3401 }
 0xb48   :  { %3819 = vrot.lane.b32.xlu1 %v7768_v30, %s5855_s15 }
 0xb4b   :  { %v5328_v58 = vpop.permute.xlu0 %5327  ;;  %3737 = vrot.lane.b32.xlu0 %v7361_v50, %s5839_s22 }
 0xb4c   :  { %v5329_v14 = vunpack.i.l.bf16 %v5328_v58  ;;  %v5330_v0 = vunpack.i.h.bf16 %v5328_v58 }
 0xb4d   :  { %v3534_v29 = vpop.f32.mrf.mxu2 }
 0xb4e   :  { %3706 = vmatpush.msra.mxu3 %v5329_v14  ;;  %3867 = vrot.lane.b32.xlu2 %v3534_v29, %s5856_s16 }
 0xb50   :  { %3707 = vmatpush.msra.mxu3 %v5330_v0  ;;  %3821 = vrot.lane.b32.xlu1 %v7772_v26, %s5855_s15  ;;  %v3399_v18 = vpop.xlane.xlu2 %3398 }
 0xb51   :  { %5625 = vrcp.f32 %v3399_v18 }
 0xb52   :  { %5627 = vrcp.f32 %v3402_v6 }
 0xb53   :  { %3739 = vrot.lane.b32.xlu0 %v7461_v60, %s5839_s22 }
 0xb57   :  { %v5626_v30 = vpop.eup %5625 }
 0xb58   :  { %v3433_v50 = vmul.f32 %v5626_v30, %v7928_v57  ;;  %3823 = vrot.lane.b32.xlu1 %v7766_v34, %s5855_s15  ;;  %v5628_v40 = vpop.eup %5627  ;;  %v3958_v34 = vld [vmem:[#allocation5 + $0x10] sm:$0xff]  ;;  %v8672_v57 = vld [vmem:[#allocation26_spill] sm:$0xff]  ;;  %v3798_v35 = vpop.permute.xlu2 %3797  ;;  %v8680_v30 = vld [vmem:[#allocation31_spill] sm:$0xff] }
 0xb59   :  { %v3434_v26 = vmul.f32 %v5628_v40, %v7921_v54 }
 0xb5a   :  { %5094 = vmatmul.msk.f32.vlgmr.msra.gmra.mxu3 %vm945_vm6, %v3433_v50  ;;  %v3732_v54 = vpop.permute.xlu1 %3731 }
 0xb5b   :  { %3741 = vrot.lane.b32.xlu0 %v7472_v15, %s5839_s22  ;;  %v3959_v15 = vld [vmem:[#allocation5 + $0x18] sm:$0xff]  ;;  %v3907_v42 = vsel %vm654_vm5, %v8672_v57, %v3732_v54 }
 0xb5c   :  { %4024 = vmatpush.msrb.mxu0 %v3959_v15 }
 0xb5e   :  { %4025 = vmatpush.msrb.mxu0 %v3958_v34 }
 0xb60   :  { %3825 = vrot.lane.b32.xlu1 %v7770_v61, %s5855_s15  ;;  %v3956_v61 = vld [vmem:[#allocation5] sm:$0xff] }
 0xb62   :  { %5095 = vmatmul.msk.f32.gmra.mxu3 %vm945_vm6, %v3434_v26 }
 0xb63   :  { %3743 = vrot.lane.b32.xlu0 %v7429_v12, %s5839_s22  ;;  %v3957_v12 = vld [vmem:[#allocation5 + $0x8] sm:$0xff] }
 0xb64   :  { %4026 = vmatpush.msrb.mxu0 %v3957_v12  ;;  %v8681_v12 = vld [vmem:[#allocation30_spill] sm:$0xff] }
 0xb66   :  { %4027 = vmatpush.msrb.mxu0 %v3956_v61 }
 0xb6b   :  { %3745 = vrot.lane.b32.xlu0 %v7431_v56, %s5839_s22 }
 0xb73   :  { %3747 = vrot.lane.b32.xlu0 %v7368_v63, %s5839_s22 }
 0xb74   :  { %v3639_v36 = vpop.f32.mrf.mxu1 }
 0xb77   :  { %v3537_v60 = vpop.f32.mrf.mxu2 }
 0xb78   :  { %3869 = vrot.lane.b32.xlu2 %v3537_v60, %s5856_s16 }
 0xb7b   :  { %3749 = vrot.lane.b32.xlu0 %v7374_v22, %s5839_s22  ;;  %v3796_v22 = vpop.permute.xlu0 %3795 }
 0xb83   :  { %3751 = vrot.lane.b32.xlu0 %v7366_v28, %s5839_s22  ;;  %v3734_v28 = vpop.permute.xlu0 %3733 }
 0xb86   :  { %v3569_v56 = vpop.f32.mrf.mxu3 }
 0xb87   :  { %3871 = vrot.lane.b32.xlu2 %v3569_v56, %s5856_s16 }
 0xb8b   :  { %3753 = vrot.lane.b32.xlu0 %v7370_v11, %s5839_s22  ;;  %v3923_v11 = vsel %vm945_vm6, %v3907_v42, %v3796_v22 }
 0xb8e   :  { %v3572_v63 = vpop.f32.mrf.mxu3 }
 0xb8f   :  { %3873 = vrot.lane.b32.xlu2 %v3572_v63, %s5856_s16 }
 0xb93   :  { %3755 = vrot.lane.b32.xlu0 %v7477_v7, %s5839_s22  ;;  %v3736_v7 = vpop.permute.xlu1 %3735 }
 0xb94   :  { %v3909_v38 = vsel %vm654_vm5, %v8676_v3, %v3736_v7  ;;  %v8684_v3 = vld [vmem:[#allocation32_spill] sm:$0xff] }
 0xb9b   :  { %3757 = vrot.lane.b32.xlu0 %v7486_v9, %s5839_s22  ;;  %v3908_v9 = vsel %vm654_vm5, %v8674_v10, %v3734_v28  ;;  %v3864_v19 = vpop.permute.xlu1 %3863 }
 0xb9c   :  { %v3924_v48 = vsel %vm945_vm6, %v3908_v9, %v3798_v35  ;;  %v3866_v4 = vpop.permute.xlu2 %3865  ;;  %v8683_v35 = vld [vmem:[#allocation38_spill] sm:$0xff] }
 0xba3   :  { %3759 = vrot.lane.b32.xlu0 %v8673_v41, %s5839_s22  ;;  %v3802_v39 = vpop.permute.xlu1 %3801 }
 0xba4   :  { %v3860_v43 = vpop.permute.xlu0 %3859 }
 0xba5   :  { %v3940_v59 = vsel %vm3939_vm7, %v3923_v11, %v3860_v43  ;;  %v8682_v11 = vld [vmem:[#allocation37_spill] sm:$0xff] }
 0xba6   :  { %5096 = vmatmul.msk.f32.vlgmr.msrb.gmra.mxu0 %vm127_vm0, %v3940_v59 }
 0xba8   :  { %v3868_v1 = vpop.permute.xlu2 %3867 }
 0xbab   :  { %3761 = vrot.lane.b32.xlu0 %v8675_v53, %s5839_s22  ;;  %v3804_v51 = vpop.permute.xlu1 %3803 }
 0xbad   :  { %v3862_v47 = vpop.permute.xlu0 %3861 }
 0xbae   :  { %v3941_v21 = vsel %vm3939_vm7, %v3924_v48, %v3862_v47 }
 0xbaf   :  { %v3604_v8 = vpop.f32.mrf.mxu0  ;;  %5097 = vmatmul.msk.f32.gmra.mxu0 %vm127_vm0, %v3941_v21 }
 0xbb0   :  { %3875 = vrot.lane.b32.xlu2 %v3604_v8, %s5856_s16 }
 0xbb3   :  { %v3806_v27 = vpop.permute.xlu1 %3805 }
 0xbb5   :  { %v3800_v46 = vpop.permute.xlu0 %3799 }
 0xbb6   :  { %v3925_v25 = vsel %vm945_vm6, %v3909_v38, %v3800_v46 }
 0xbb7   :  { %v3607_v33 = vpop.f32.mrf.mxu0  ;;  %v3942_v52 = vsel %vm3939_vm7, %v3925_v25, %v3864_v19 }
 0xbb8   :  { %5098 = vmatmul.msk.f32.gmra.mxu0 %vm127_vm0, %v3942_v52  ;;  %3877 = vrot.lane.b32.xlu2 %v3607_v33, %s5856_s16 }
 0xbb9   :  { %v3642_v2 = vpop.f32.mrf.mxu1 }
 0xbbb   :  { %v3808_v6 = vpop.permute.xlu1 %3807 }
 0xbbd   :  { %v3738_v44 = vpop.permute.xlu0 %3737  ;;  %v3674_v20 = vpop.f32.mrf.mxu2 }
 0xbbe   :  { %v3910_v62 = vsel %vm654_vm5, %v8677_v16, %v3738_v44  ;;  %v8685_v44 = vld [vmem:[#allocation34_spill] sm:$0xff] }
 0xbbf   :  { %v3926_v5 = vsel %vm945_vm6, %v3910_v62, %v3802_v39  ;;  %v8094_v62 = vld [vmem:[%s8584_s6] ss:$0 sm:$0xff] }
 0xbc0   :  { %3879 = vrot.lane.b32.xlu2 %v3639_v36, %s5856_s16  ;;  %v3943_v13 = vsel %vm3939_vm7, %v3926_v5, %v3866_v4 }
 0xbc1   :  { %5099 = vmatmul.msk.f32.gmra.mxu0 %vm127_vm0, %v3943_v13 }
 0xbc3   :  { %v3810_v56 = vpop.permute.xlu1 %3809 }
 0xbc5   :  { %v3740_v32 = vpop.permute.xlu0 %3739  ;;  %v3677_v29 = vpop.f32.mrf.mxu2 }
 0xbc6   :  { %v3911_v45 = vsel %vm654_vm5, %v8678_v17, %v3740_v32  ;;  %v5693_v17 = vld [vmem:[%s8578_s0] sm:$0xff] }
 0xbc7   :  { %v3927_v23 = vsel %vm945_vm6, %v3911_v45, %v3804_v51 }
 0xbc8   :  { %3881 = vrot.lane.b32.xlu2 %v3642_v2, %s5856_s16  ;;  %v3944_v31 = vsel %vm3939_vm7, %v3927_v23, %v3868_v1  ;;  %v8686_v1 = vld [vmem:[#allocation29_spill] sm:$0xff] }
 0xbc9   :  { %5100 = vmatmul.msk.f32.gmra.mxu0 %vm127_vm0, %v3944_v31 }
 0xbcb   :  { %v3812_v57 = vpop.permute.xlu1 %3811 }
 0xbcd   :  { %v3742_v55 = vpop.permute.xlu0 %3741 }
 0xbce   :  { %v3912_v49 = vsel %vm654_vm5, %v8679_v37, %v3742_v55 }
 0xbcf   :  { %v3928_v58 = vsel %vm945_vm6, %v3912_v49, %v3806_v27 }
 0xbd0   :  { %3883 = vrot.lane.b32.xlu2 %v3674_v20, %s5856_s16 }
 0xbd2   :  { %v3870_v24 = vpop.permute.xlu2 %3869 }
 0xbd3   :  { %v3945_v14 = vsel %vm3939_vm7, %v3928_v58, %v3870_v24  ;;  %v3814_v41 = vpop.permute.xlu1 %3813  ;;  %v8687_v58 = vld [vmem:[#allocation33_spill] sm:$0xff] }
 0xbd4   :  { %5101 = vmatmul.msk.f32.gmra.mxu0 %vm127_vm0, %v3945_v14 }
 0xbd5   :  { %v3744_v0 = vpop.permute.xlu0 %3743 }
 0xbd6   :  { %v3913_v50 = vsel %vm654_vm5, %v8680_v30, %v3744_v0 }
 0xbd7   :  { %v3929_v26 = vsel %vm945_vm6, %v3913_v50, %v3808_v6 }
 0xbd8   :  { %3885 = vrot.lane.b32.xlu2 %v3677_v29, %s5856_s16  ;;  %v5694_v29 = vld [vmem:[%s8578_s0 + $0x8] sm:$0xff] }
 0xbdb   :  { %v3816_v53 = vpop.permute.xlu1 %3815 }
 0xbdd   :  { %v3709_v18 = vpop.f32.mrf.mxu3  ;;  %v3746_v15 = vpop.permute.xlu0 %3745 }
 0xbde   :  { %v3914_v61 = vsel %vm654_vm5, %v8681_v12, %v3746_v15 }
 0xbdf   :  { %v3930_v22 = vsel %vm945_vm6, %v3914_v61, %v3810_v56  ;;  %v5695_v61 = vld [vmem:[%s8578_s0 + $0x10] sm:$0xff] }
 0xbe0   :  { %3887 = vrot.lane.b32.xlu2 %v3709_v18, %s5856_s16 }
 0xbe1   :  { %v3872_v40 = vpop.permute.xlu2 %3871 }
 0xbe2   :  { %v3946_v60 = vsel %vm3939_vm7, %v3929_v26, %v3872_v40 }
 0xbe3   :  { %5102 = vmatmul.msk.f32.gmra.mxu0 %vm127_vm0, %v3946_v60  ;;  %v3818_v46 = vpop.permute.xlu1 %3817 }
 0xbe5   :  { %v3712_v34 = vpop.f32.mrf.mxu3  ;;  %v3748_v54 = vpop.permute.xlu0 %3747 }
 0xbe6   :  { %v3915_v43 = vsel %vm654_vm5, %v8682_v11, %v3748_v54 }
 0xbe7   :  { %v3931_v7 = vsel %vm945_vm6, %v3915_v43, %v3812_v57 }
 0xbe8   :  { %3889 = vrot.lane.b32.xlu2 %v3712_v34, %s5856_s16  ;;  %v8688_v34 = vld [vmem:[#allocation39_spill] sm:$0xff] }
 0xbe9   :  { %v3874_v63 = vpop.permute.xlu2 %3873 }
 0xbea   :  { %v3947_v28 = vsel %vm3939_vm7, %v3930_v22, %v3874_v63 }
 0xbeb   :  { %5103 = vmatmul.msk.f32.gmra.mxu0 %vm127_vm0, %v3947_v28  ;;  %v3820_v5 = vpop.permute.xlu1 %3819 }
 0xbed   :  { %v3750_v42 = vpop.permute.xlu0 %3749 }
 0xbee   :  { %v3916_v48 = vsel %vm654_vm5, %v8683_v35, %v3750_v42 }
 0xbef   :  { %v3932_v47 = vsel %vm945_vm6, %v3916_v48, %v3814_v41  ;;  %v8689_v41 = vld [vmem:[#allocation40_spill] sm:$0xff] }
 0xbf3   :  { %v3822_v27 = vpop.permute.xlu1 %3821 }
 0xbf5   :  { %v3752_v59 = vpop.permute.xlu0 %3751 }
 0xbf6   :  { %v3917_v38 = vsel %vm654_vm5, %v8684_v3, %v3752_v59 }
 0xbf7   :  { %v3933_v25 = vsel %vm945_vm6, %v3917_v38, %v3816_v53 }
 0xbfb   :  { %v3824_v15 = vpop.permute.xlu1 %3823 }
 0xbfd   :  { %v3754_v19 = vpop.permute.xlu0 %3753 }
 0xbfe   :  { %v3918_v16 = vsel %vm654_vm5, %v8685_v44, %v3754_v19 }
 0xbff   :  { %v3934_v36 = vsel %vm945_vm6, %v3918_v16, %v3818_v46  ;;  %v5699_v16 = vld [vmem:[%s8578_s0 + $0x30] sm:$0xff] }
 0xc03   :  { %v3826_v59 = vpop.permute.xlu1 %3825 }
 0xc05   :  { %v3756_v39 = vpop.permute.xlu0 %3755 }
 0xc06   :  { %v3919_v2 = vsel %vm654_vm5, %v8686_v1, %v3756_v39 }
 0xc07   :  { %v3935_v20 = vsel %vm945_vm6, %v3919_v2, %v3820_v5 }
 0xc0a   :  { %v3876_v10 = vpop.permute.xlu2 %3875 }
 0xc0b   :  { %v3948_v9 = vsel %vm3939_vm7, %v3931_v7, %v3876_v10  ;;  %v5696_v7 = vld [vmem:[%s8578_s0 + $0x18] sm:$0xff] }
 0xc0c   :  { %5104 = vmatmul.msk.f32.gmra.mxu0 %vm127_vm0, %v3948_v9 }
 0xc0d   :  { %v3758_v23 = vpop.permute.xlu0 %3757 }
 0xc0e   :  { %v3920_v14 = vsel %vm654_vm5, %v8687_v58, %v3758_v23 }
 0xc0f   :  { %v3936_v30 = vsel %vm945_vm6, %v3920_v14, %v3822_v27 }
 0xc12   :  { %v3878_v21 = vpop.permute.xlu2 %3877 }
 0xc13   :  { %v3949_v8 = vsel %vm3939_vm7, %v3932_v47, %v3878_v21 }
 0xc14   :  { %5105 = vmatmul.msk.f32.gmra.mxu0 %vm127_vm0, %v3949_v8  ;;  %v5697_v8 = vld [vmem:[%s8578_s0 + $0x20] sm:$0xff] }
 0xc15   :  { %v3760_v6 = vpop.permute.xlu0 %3759 }
 0xc16   :  { %v3921_v12 = vsel %vm654_vm5, %v8688_v34, %v3760_v6 }
 0xc17   :  { %v3937_v63 = vsel %vm945_vm6, %v3921_v12, %v3824_v15 }
 0xc1a   :  { %v3880_v33 = vpop.permute.xlu2 %3879 }
 0xc1b   :  { %v3950_v52 = vsel %vm3939_vm7, %v3933_v25, %v3880_v33  ;;  %v5698_v25 = vld [vmem:[%s8578_s0 + $0x28] sm:$0xff] }
 0xc1c   :  { %5106 = vmatmul.msk.f32.gmra.mxu0 %vm127_vm0, %v3950_v52 }
 0xc1d   :  { %v3762_v57 = vpop.permute.xlu0 %3761 }
 0xc1e   :  { %v3922_v11 = vsel %vm654_vm5, %v8689_v41, %v3762_v57 }
 0xc1f   :  { %v3938_v9 = vsel %vm945_vm6, %v3922_v11, %v3826_v59 }
 0xc22   :  { %v3882_v4 = vpop.permute.xlu2 %3881 }
 0xc23   :  { %v3951_v13 = vsel %vm3939_vm7, %v3934_v36, %v3882_v4  ;;  %v4029_v32 = vpop.f32.mrf.mxu0 }
 0xc24   :  { %v4030_v51 = vadd.f32 %v8094_v62, %v4029_v32  ;;  %5107 = vmatmul.msk.f32.gmra.mxu0 %vm127_vm0, %v3951_v13  ;;  %v8690_v32 = vld [vmem:[#allocation15_spill] sm:$0xff] }
 0xc26   :  { %v8103_v45 = vadd.f32 %v5693_v17, %v4030_v51 }
 0xc28   :  { %v4095_v31 = vsel %vm127_vm0, %v8103_v45, 0.0 }
 0xc29   :  { %4096 = vadd.xlane.f32.xlu0 %v4095_v31 }
 0xc2a   :  { %v3884_v55 = vpop.permute.xlu2 %3883 }
 0xc2b   :  { %v3952_v37 = vsel %vm3939_vm7, %v3935_v20, %v3884_v55 }
 0xc2c   :  { %v4032_v49 = vpop.f32.mrf.mxu0  ;;  %5108 = vmatmul.msk.f32.gmra.mxu0 %vm127_vm0, %v3952_v37  ;;  %v5700_v37 = vld [vmem:[%s8578_s0 + $0x38] sm:$0xff] }
 0xc2d   :  { %v4033_v24 = vadd.f32 %v8094_v62, %v4032_v49 }
 0xc2f   :  { %v8118_v0 = vadd.f32 %v5694_v29, %v4033_v24 }
 0xc31   :  { %v4098_v18 = vsel %vm127_vm0, %v8118_v0, 0.0 }
 0xc32   :  { %v3886_v50 = vpop.permute.xlu2 %3885  ;;  %4099 = vadd.xlane.f32.xlu1 %v4098_v18 }
 0xc33   :  { %v3953_v40 = vsel %vm3939_vm7, %v3936_v30, %v3886_v50  ;;  %v5701_v50 = vld [vmem:[%s8578_s0 + $0x40] sm:$0xff] }
 0xc34   :  { %5109 = vmatmul.msk.f32.gmra.mxu0 %vm127_vm0, %v3953_v40 }
 0xc35   :  { %v4035_v26 = vpop.f32.mrf.mxu0 }
 0xc36   :  { %v4036_v60 = vadd.f32 %v8094_v62, %v4035_v26 }
 0xc38   :  { %v8131_v56 = vadd.f32 %v5695_v61, %v4036_v60 }
 0xc3a   :  { %v3888_v22 = vpop.permute.xlu2 %3887  ;;  %v4101_v28 = vsel %vm127_vm0, %v8131_v56, 0.0 }
 0xc3b   :  { %v3954_v54 = vsel %vm3939_vm7, %v3937_v63, %v3888_v22  ;;  %4102 = vadd.xlane.f32.xlu2 %v4101_v28  ;;  %v5702_v22 = vld [vmem:[%s8578_s0 + $0x48] sm:$0xff] }
 0xc3c   :  { %5110 = vmatmul.msk.f32.gmra.mxu0 %vm127_vm0, %v3954_v54 }
 0xc3e   :  { %v4038_v42 = vpop.f32.mrf.mxu0 }
 0xc3f   :  { %v4039_v43 = vadd.f32 %v8094_v62, %v4038_v42 }
 0xc41   :  { %v8144_v10 = vadd.f32 %v5696_v7, %v4039_v43 }
 0xc42   :  { %v3890_v53 = vpop.permute.xlu2 %3889 }
 0xc43   :  { %v3955_v35 = vsel %vm3939_vm7, %v3938_v9, %v3890_v53  ;;  %v4104_v48 = vsel %vm127_vm0, %v8144_v10, 0.0  ;;  %v5703_v9 = vld [vmem:[%s8578_s0 + $0x50] sm:$0xff] }
 0xc44   :  { %5111 = vmatmul.msk.f32.gmra.mxu0 %vm127_vm0, %v3955_v35  ;;  %4105 = vadd.xlane.f32.xlu0 %v4104_v48 }
 0xc46   :  { %v4041_v47 = vpop.f32.mrf.mxu0 }
 0xc47   :  { %v4042_v21 = vadd.f32 %v8094_v62, %v4041_v47 }
 0xc49   :  { %v8155_v19 = vadd.f32 %v5697_v8, %v4042_v21 }
 0xc4b   :  { %v4107_v3 = vsel %vm127_vm0, %v8155_v19, 0.0 }
 0xc4c   :  { %4108 = vadd.xlane.f32.xlu1 %v4107_v3 }
 0xc51   :  { %v4044_v38 = vpop.f32.mrf.mxu0 }
 0xc52   :  { %v4045_v46 = vadd.f32 %v8094_v62, %v4044_v38  ;;  %v5704_v38 = vld [vmem:[%s8578_s0 + $0x58] sm:$0xff] }
 0xc54   :  { %v8163_v33 = vadd.f32 %v5698_v25, %v4045_v46 }
 0xc56   :  { %v4110_v52 = vsel %vm127_vm0, %v8163_v33, 0.0 }
 0xc57   :  { %4111 = vadd.xlane.f32.xlu2 %v4110_v52 }
 0xc60   :  { %v4047_v39 = vpop.f32.mrf.mxu0 }
 0xc61   :  { %v4048_v44 = vadd.f32 %v8094_v62, %v4047_v39 }
 0xc63   :  { %v8171_v36 = vadd.f32 %v5699_v16, %v4048_v44 }
 0xc65   :  { %v4113_v4 = vsel %vm127_vm0, %v8171_v36, 0.0 }
 0xc66   :  { %4114 = vadd.xlane.f32.xlu1 %v4113_v4 }
 0xc68   :  { %v4050_v13 = vpop.f32.mrf.mxu0 }
 0xc69   :  { %v4051_v2 = vadd.f32 %v8094_v62, %v4050_v13 }
 0xc6b   :  { %v8187_v49 = vadd.f32 %v5700_v37, %v4051_v2 }
 0xc6d   :  { %v4116_v58 = vsel %vm127_vm0, %v8187_v49, 0.0 }
 0xc89   :  { %v4053_v31 = vpop.f32.mrf.mxu0 }
 0xc8a   :  { %v4054_v14 = vadd.f32 %v8094_v62, %v4053_v31 }
 0xc8c   :  { %v8202_v40 = vadd.f32 %v5701_v50, %v4054_v14  ;;  %v5706_v14 = vld [vmem:[%s8578_s0 + $0x68] sm:$0xff] }
 0xc8d   :  { %v4486_v50 = vld [vmem:[#allocation8 + $0x8] sm:$0xff] }
 0xc8e   :  { %v4119_v15 = vsel %vm127_vm0, %v8202_v40, 0.0 }
 0xc91   :  { %v4056_v6 = vpop.f32.mrf.mxu0 }
 0xc92   :  { %v4057_v34 = vadd.f32 %v8094_v62, %v4056_v6  ;;  %v4488_v6 = vld [vmem:[#allocation8 + $0x18] sm:$0xff] }
 0xc93   :  { %4553 = vmatpush.msrb.mxu1 %v4488_v6 }
 0xc94   :  { %v8217_v28 = vadd.f32 %v5702_v22, %v4057_v34  ;;  %v4485_v34 = vld [vmem:[#allocation8] sm:$0xff] }
 0xc96   :  { %v4122_v41 = vsel %vm127_vm0, %v8217_v28, 0.0 }
 0xc99   :  { %v4059_v54 = vpop.f32.mrf.mxu0 }
 0xc9a   :  { %v4060_v11 = vadd.f32 %v8094_v62, %v4059_v54 }
 0xc9c   :  { %v4097_v5 = vpop.xlane.xlu0 %4096  ;;  %v8232_v53 = vadd.f32 %v5703_v9, %v4060_v11 }
 0xc9d   :  { %v4143_v51 = vmul.f32 %v4097_v5, %v8690_v32 }
 0xc9e   :  { %v4125_v3 = vsel %vm127_vm0, %v8232_v53, 0.0 }
 0xc9f   :  { %v8177_v17 = vsub.f32 %v8103_v45, %v4143_v51  ;;  %v5705_v51 = vld [vmem:[%s8578_s0 + $0x60] sm:$0xff] }
 0xca1   :  { %v4175_v1 = vmul.f32 %v8177_v17, %v8177_v17  ;;  %v4062_v48 = vpop.f32.mrf.mxu0 }
 0xca2   :  { %v4063_v21 = vadd.f32 %v8094_v62, %v4062_v48 }
 0xca3   :  { %v4191_v23 = vsel %vm127_vm0, %v4175_v1, 0.0 }
 0xca4   :  { %4192 = vadd.xlane.f32.xlu0 %v4191_v23  ;;  %v8246_v46 = vadd.f32 %v5704_v38, %v4063_v21 }
 0xca5   :  { %v4100_v20 = vpop.xlane.xlu1 %4099 }
 0xca6   :  { %v4144_v55 = vmul.f32 %v4100_v20, %v8690_v32  ;;  %v4128_v16 = vsel %vm127_vm0, %v8246_v46, 0.0 }
 0xca8   :  { %v8190_v27 = vsub.f32 %v8118_v0, %v4144_v55 }
 0xca9   :  { %v4065_v44 = vpop.f32.mrf.mxu0 }
 0xcaa   :  { %v4176_v24 = vmul.f32 %v8190_v27, %v8190_v27  ;;  %v4066_v5 = vadd.f32 %v8094_v62, %v4065_v44 }
 0xcac   :  { %v4194_v29 = vsel %vm127_vm0, %v4176_v24, 0.0  ;;  %4117 = vadd.xlane.f32.xlu0 %v4116_v58  ;;  %v8261_v1 = vadd.f32 %v5705_v51, %v4066_v5 }
 0xcad   :  { %4195 = vadd.xlane.f32.xlu2 %v4194_v29 }
 0xcae   :  { %v4103_v18 = vpop.xlane.xlu2 %4102  ;;  %v4131_v23 = vsel %vm127_vm0, %v8261_v1, 0.0 }
 0xcaf   :  { %v4145_v30 = vmul.f32 %v4103_v18, %v8690_v32 }
 0xcb1   :  { %v8205_v26 = vsub.f32 %v8131_v56, %v4145_v30  ;;  %v4068_v55 = vpop.f32.mrf.mxu0  ;;  %v4487_v30 = vld [vmem:[#allocation8 + $0x10] sm:$0xff] }
 0xcb2   :  { %v4069_v24 = vadd.f32 %v8094_v62, %v4068_v55  ;;  %4554 = vmatpush.msrb.mxu1 %v4487_v30 }
 0xcb3   :  { %v4177_v60 = vmul.f32 %v8205_v26, %v8205_v26 }
 0xcb4   :  { %v8276_v29 = vadd.f32 %v5706_v14, %v4069_v24  ;;  %4555 = vmatpush.msrb.mxu1 %v4486_v50  ;;  %v8310_v24 = vld [vmem:[%s8587_s9] ss:$0 sm:$0xff] }
 0xcb5   :  { %4120 = vadd.xlane.f32.xlu2 %v4119_v15  ;;  %v4197_v12 = vsel %vm127_vm0, %v4177_v60, 0.0 }
 0xcb6   :  { %4198 = vadd.xlane.f32.xlu1 %v4197_v12  ;;  %v4134_v18 = vsel %vm127_vm0, %v8276_v29, 0.0  ;;  %4556 = vmatpush.msrb.mxu1 %v4485_v34 }
 0xcb7   :  { %v4106_v61 = vpop.xlane.xlu0 %4105 }
 0xcb8   :  { %v4146_v63 = vmul.f32 %v4106_v61, %v8690_v32 }
 0xcba   :  { %v8220_v57 = vsub.f32 %v8144_v10, %v4146_v63 }
 0xcbc   :  { %v4178_v42 = vmul.f32 %v8220_v57, %v8220_v57 }
 0xcbe   :  { %4123 = vadd.xlane.f32.xlu1 %v4122_v41  ;;  %v4200_v43 = vsel %vm127_vm0, %v4178_v42, 0.0  ;;  %v4071_v41 = vpop.f32.mrf.mxu0 }
 0xcbf   :  { %v4109_v59 = vpop.xlane.xlu1 %4108  ;;  %4201 = vadd.xlane.f32.xlu0 %v4200_v43  ;;  %v4072_v48 = vadd.f32 %v8094_v62, %v4071_v41 }
 0xcc0   :  { %v4147_v7 = vmul.f32 %v4109_v59, %v8690_v32 }
 0xcc2   :  { %v8235_v35 = vsub.f32 %v8155_v19, %v4147_v7 }
 0xcc4   :  { %v4179_v47 = vmul.f32 %v8235_v35, %v8235_v35 }
 0xcc6   :  { %v4203_v8 = vsel %vm127_vm0, %v4179_v47, 0.0  ;;  %v4074_v51 = vpop.f32.mrf.mxu0 }
 0xcc7   :  { %4204 = vadd.xlane.f32.xlu2 %v4203_v8  ;;  %4126 = vadd.xlane.f32.xlu0 %v4125_v3  ;;  %v4075_v6 = vadd.f32 %v8094_v62, %v4074_v51 }
 0xcca   :  { %v4112_v25 = vpop.xlane.xlu2 %4111 }
 0xccb   :  { %v4148_v52 = vmul.f32 %v4112_v25, %v8690_v32 }
 0xccd   :  { %v8250_v39 = vsub.f32 %v8163_v33, %v4148_v52  ;;  %v5707_v52 = vld [vmem:[%s8578_s0 + $0x70] sm:$0xff] }
 0xcce   :  { %v8294_v44 = vadd.f32 %v5707_v52, %v4072_v48 }
 0xccf   :  { %4129 = vadd.xlane.f32.xlu2 %v4128_v16  ;;  %v4180_v4 = vmul.f32 %v8250_v39, %v8250_v39 }
 0xcd1   :  { %v4206_v13 = vsel %vm127_vm0, %v4180_v4, 0.0 }
 0xcd2   :  { %4207 = vadd.xlane.f32.xlu1 %v4206_v13 }
 0xcd9   :  { %v4115_v2 = vpop.xlane.xlu1 %4114 }
 0xcda   :  { %v4149_v31 = vmul.f32 %v4115_v2, %v8690_v32  ;;  %4132 = vadd.xlane.f32.xlu1 %v4131_v23  ;;  %v8303_v2 = vld [vmem:[%s8586_s8] ss:$0 sm:$0xff] }
 0xcdc   :  { %v8267_v20 = vsub.f32 %v8171_v36, %v4149_v31 }
 0xcde   :  { %v4181_v37 = vmul.f32 %v8267_v20, %v8267_v20 }
 0xce0   :  { %v4209_v58 = vsel %vm127_vm0, %v4181_v37, 0.0 }
 0xce1   :  { %4210 = vadd.xlane.f32.xlu0 %v4209_v58 }
 0xce9   :  { %4135 = vadd.xlane.f32.xlu0 %v4134_v18  ;;  %v4137_v18 = vsel %vm127_vm0, %v8294_v44, 0.0 }
 0xd17   :  { %v4193_v60 = vpop.xlane.xlu0 %4192 }
 0xd18   :  { %v4239_v15 = vmul.f32 %v4193_v60, %v8690_v32 }
 0xd1a   :  { %v4255_v12 = vadd.f32 1e-05, %v4239_v15 }
 0xd1c   :  { %5629 = vrsqrt.f32 %v4255_v12  ;;  %vm4277_vm9 = vweird.f32 %v4255_v12 }
 0xd1f   :  { %v4118_v61 = vpop.xlane.xlu0 %4117 }
 0xd20   :  { %v4196_v63 = vpop.xlane.xlu2 %4195  ;;  %v4150_v22 = vmul.f32 %v4118_v61, %v8690_v32 }
 0xd21   :  { %v4240_v54 = vmul.f32 %v4196_v63, %v8690_v32  ;;  %v5708_v63 = vld [vmem:[%s8578_s0 + $0x78] sm:$0xff] }
 0xd22   :  { %v5630_v42 = vpop.eup %5629  ;;  %v8284_v11 = vsub.f32 %v8187_v49, %v4150_v22  ;;  %v8323_v62 = vadd.f32 %v5708_v63, %v4075_v6 }
 0xd23   :  { %v4272_v43 = vmul.f32 %v5630_v42, %v4255_v12  ;;  %v4256_v59 = vadd.f32 1e-05, %v4240_v54  ;;  %vm4278_vm8 = vweird.f32 %v5630_v42 }
 0xd24   :  { %v4182_v7 = vmul.f32 %v8284_v11, %v8284_v11  ;;  %vm4279_vm10 = vmor %vm4277_vm9, %vm4278_vm8 }
 0xd25   :  { %v4273_v9 = vmul.f32 %v5630_v42, %v4272_v43  ;;  %5631 = vrsqrt.f32 %v4256_v59  ;;  %vm4287_vm12 = vweird.f32 %v4256_v59 }
 0xd26   :  { %v4212_v47 = vsel %vm127_vm0, %v4182_v7, 0.0 }
 0xd27   :  { %v4274_v21 = vmul.f32 0.5, %v4273_v9  ;;  %4213 = vadd.xlane.f32.xlu2 %v4212_v47 }
 0xd28   :  { %v4121_v8 = vpop.xlane.xlu2 %4120 }
 0xd29   :  { %v4275_v3 = vsub.f32 1.5, %v4274_v21  ;;  %v4151_v38 = vmul.f32 %v4121_v8, %v8690_v32  ;;  %v4199_v25 = vpop.xlane.xlu1 %4198  ;;  %v4140_v8 = vsel %vm127_vm0, %v8323_v62, 0.0 }
 0xd2a   :  { %v4241_v16 = vmul.f32 %v4199_v25, %v8690_v32 }
 0xd2b   :  { %v5632_v4 = vpop.eup %5631  ;;  %v4276_v5 = vmul.f32 %v5630_v42, %v4275_v3  ;;  %v8298_v13 = vsub.f32 %v8202_v40, %v4151_v38 }
 0xd2c   :  { %v4282_v23 = vmul.f32 %v5632_v4, %v4256_v59  ;;  %v4257_v31 = vadd.f32 1e-05, %v4241_v16  ;;  %vm4288_vm11 = vweird.f32 %v5632_v4 }
 0xd2d   :  { %v4280_v55 = vsel %vm4279_vm10, %v5630_v42, %v4276_v5  ;;  %v4183_v37 = vmul.f32 %v8298_v13, %v8298_v13  ;;  %vm4289_vm13 = vmor %vm4287_vm12, %vm4288_vm11 }
 0xd2e   :  { %v4431_v58 = vmul.f32 %v4280_v55, %v8177_v17  ;;  %v4283_v14 = vmul.f32 %v5632_v4, %v4282_v23  ;;  %5633 = vrsqrt.f32 %v4257_v31  ;;  %vm4297_vm15 = vweird.f32 %v4257_v31 }
 0xd2f   :  { %v4215_v30 = vsel %vm127_vm0, %v4183_v37, 0.0  ;;  %4138 = vadd.xlane.f32.xlu2 %v4137_v18 }
 0xd30   :  { %v4450_v50 = vmul.f32 %v8303_v2, %v4431_v58  ;;  %v4284_v60 = vmul.f32 0.5, %v4283_v14  ;;  %4216 = vadd.xlane.f32.xlu1 %v4215_v30 }
 0xd31   :  { %v4124_v15 = vpop.xlane.xlu1 %4123 }
 0xd32   :  { %v4469_v34 = vadd.f32 %v8310_v24, %v4450_v50  ;;  %v4285_v12 = vsub.f32 1.5, %v4284_v60  ;;  %v4152_v17 = vmul.f32 %v4124_v15, %v8690_v32  ;;  %v4202_v61 = vpop.xlane.xlu0 %4201 }
 0xd33   :  { %v4242_v22 = vmul.f32 %v4202_v61, %v8690_v32 }
 0xd34   :  { %v5634_v54 = vpop.eup %5633  ;;  %v4286_v42 = vmul.f32 %v5632_v4, %v4285_v12  ;;  %v8327_v41 = vsub.f32 %v8217_v28, %v4152_v17  ;;  %5112 = vmatmul.msk.f32.vlgmr.msrb.gmra.mxu1 %vm127_vm0, %v4469_v34 }
 0xd35   :  { %v4292_v43 = vmul.f32 %v5634_v54, %v4257_v31  ;;  %v4258_v7 = vadd.f32 1e-05, %v4242_v22  ;;  %vm4298_vm14 = vweird.f32 %v5634_v54 }
 0xd36   :  { %v4290_v9 = vsel %vm4289_vm13, %v5632_v4, %v4286_v42  ;;  %v4184_v48 = vmul.f32 %v8327_v41, %v8327_v41  ;;  %vm4299_vm1 = vmor %vm4297_vm15, %vm4298_vm14 }
 0xd37   :  { %v4432_v47 = vmul.f32 %v4290_v9, %v8190_v27  ;;  %v4293_v21 = vmul.f32 %v5634_v54, %v4292_v43  ;;  %5635 = vrsqrt.f32 %v4258_v7  ;;  %vm4307_vm3 = vweird.f32 %v4258_v7 }
 0xd38   :  { %4141 = vadd.xlane.f32.xlu1 %v4140_v8  ;;  %v4218_v59 = vsel %vm127_vm0, %v4184_v48, 0.0 }
 0xd39   :  { %v4294_v3 = vmul.f32 0.5, %v4293_v21  ;;  %4219 = vadd.xlane.f32.xlu0 %v4218_v59  ;;  %v4451_v38 = vmul.f32 %v8303_v2, %v4432_v47 }
 0xd3a   :  { %v4205_v25 = vpop.xlane.xlu2 %4204  ;;  %v4127_v52 = vpop.xlane.xlu0 %4126 }
 0xd3b   :  { %v4295_v16 = vsub.f32 1.5, %v4294_v3  ;;  %v4243_v4 = vmul.f32 %v4205_v25, %v8690_v32  ;;  %v4153_v27 = vmul.f32 %v4127_v52, %v8690_v32  ;;  %v4470_v5 = vadd.f32 %v8310_v24, %v4451_v38 }
 0xd3d   :  { %v5636_v51 = vpop.eup %5635  ;;  %v4296_v23 = vmul.f32 %v5634_v54, %v4295_v16  ;;  %v4259_v55 = vadd.f32 1e-05, %v4243_v4  ;;  %v8341_v37 = vsub.f32 %v8232_v53, %v4153_v27  ;;  %5113 = vmatmul.msk.f32.gmra.mxu1 %vm127_vm0, %v4470_v5 }
 0xd3e   :  { %v4302_v58 = vmul.f32 %v5636_v51, %v4258_v7  ;;  %vm4308_vm2 = vweird.f32 %v5636_v51 }
 0xd3f   :  { %v4300_v14 = vsel %vm4299_vm1, %v5634_v54, %v4296_v23  ;;  %5637 = vrsqrt.f32 %v4259_v55  ;;  %v4185_v18 = vmul.f32 %v8341_v37, %v8341_v37  ;;  %vm4309_vm4 = vmor %vm4307_vm3, %vm4308_vm2  ;;  %vm4317_vm6 = vweird.f32 %v4259_v55 }
 0xd40   :  { %v4433_v6 = vmul.f32 %v4300_v14, %v8205_v26  ;;  %v4303_v30 = vmul.f32 %v5636_v51, %v4302_v58 }
 0xd41   :  { %v4221_v50 = vsel %vm127_vm0, %v4185_v18, 0.0 }
 0xd42   :  { %v4304_v60 = vmul.f32 0.5, %v4303_v30  ;;  %v4130_v31 = vpop.xlane.xlu2 %4129  ;;  %4222 = vadd.xlane.f32.xlu2 %v4221_v50  ;;  %v4452_v15 = vmul.f32 %v8303_v2, %v4433_v6 }
 0xd43   :  { %v4154_v34 = vmul.f32 %v4130_v31, %v8690_v32 }
 0xd44   :  { %v4305_v12 = vsub.f32 1.5, %v4304_v60  ;;  %v4471_v17 = vadd.f32 %v8310_v24, %v4452_v15 }
 0xd45   :  { %v5638_v61 = vpop.eup %5637  ;;  %v8352_v63 = vsub.f32 %v8246_v46, %v4154_v34  ;;  %v4208_v22 = vpop.xlane.xlu1 %4207 }
 0xd46   :  { %v4306_v26 = vmul.f32 %v5636_v51, %v4305_v12  ;;  %v4312_v54 = vmul.f32 %v5638_v61, %v4259_v55  ;;  %v4244_v42 = vmul.f32 %v4208_v22, %v8690_v32  ;;  %5114 = vmatmul.msk.f32.gmra.mxu1 %vm127_vm0, %v4471_v17  ;;  %vm4318_vm5 = vweird.f32 %v5638_v61 }
 0xd47   :  { %v4186_v43 = vmul.f32 %v8352_v63, %v8352_v63  ;;  %vm4319_vm7 = vmor %vm4317_vm6, %vm4318_vm5 }
 0xd48   :  { %v4310_v9 = vsel %vm4309_vm4, %v5636_v51, %v4306_v26  ;;  %v4313_v48 = vmul.f32 %v5638_v61, %v4312_v54  ;;  %v4260_v47 = vadd.f32 1e-05, %v4244_v42 }
 0xd49   :  { %v4434_v21 = vmul.f32 %v4310_v9, %v8220_v57  ;;  %v4224_v8 = vsel %vm127_vm0, %v4186_v43, 0.0 }
 0xd4a   :  { %v4314_v59 = vmul.f32 0.5, %v4313_v48  ;;  %5639 = vrsqrt.f32 %v4260_v47  ;;  %4225 = vadd.xlane.f32.xlu0 %v4224_v8  ;;  %vm4327_vm9 = vweird.f32 %v4260_v47 }
 0xd4b   :  { %v4453_v7 = vmul.f32 %v8303_v2, %v4434_v21 }
 0xd4c   :  { %v4315_v3 = vsub.f32 1.5, %v4314_v59 }
 0xd4d   :  { %v4133_v38 = vpop.xlane.xlu1 %4132  ;;  %v4472_v25 = vadd.f32 %v8310_v24, %v4453_v7 }
 0xd4e   :  { %v4316_v52 = vmul.f32 %v5638_v61, %v4315_v3  ;;  %v4155_v16 = vmul.f32 %v4133_v38, %v8690_v32  ;;  %v4765_v38 = vld [vmem:[%s8590_s12 + $0x78] sm:$0xff] }
 0xd4f   :  { %5115 = vmatmul.msk.f32.gmra.mxu1 %vm127_vm0, %v4472_v25  ;;  %4770 = vmatpush.msra.mxu2 %v4765_v38  ;;  %v4764_v25 = vld [vmem:[%s8590_s12 + $0x70] sm:$0xff] }
 0xd50   :  { %v5640_v57 = vpop.eup %5639  ;;  %v4320_v4 = vsel %vm4319_vm7, %v5638_v61, %v4316_v52  ;;  %v8365_v27 = vsub.f32 %v8261_v1, %v4155_v16  ;;  %5134 = vmatpush.msrb.mxu3 %v4765_v38  ;;  %v4762_v52 = vld [vmem:[%s8590_s12 + $0x60] sm:$0xff]  ;;  %v4761_v16 = vld [vmem:[%s8590_s12 + $0x58] sm:$0xff] }
 0xd51   :  { %v4435_v5 = vmul.f32 %v4320_v4, %v8235_v35  ;;  %v4322_v51 = vmul.f32 %v5640_v57, %v4260_v47  ;;  %vm4328_vm8 = vweird.f32 %v5640_v57  ;;  %4771 = vmatpush.msra.mxu2 %v4764_v25 }
 0xd52   :  { %v4187_v23 = vmul.f32 %v8365_v27, %v8365_v27  ;;  %vm4329_vm10 = vmor %vm4327_vm9, %vm4328_vm8  ;;  %5135 = vmatpush.msrb.mxu3 %v4764_v25  ;;  %v8455_v25 = vld [vmem:[%s8589_s11] ss:$0 sm:$0xff] }
 0xd53   :  { %v4323_v58 = vmul.f32 %v5640_v57, %v4322_v51  ;;  %v4454_v14 = vmul.f32 %v8303_v2, %v4435_v5  ;;  %v4759_v51 = vld [vmem:[%s8590_s12 + $0x48] sm:$0xff] }
 0xd54   :  { %v4211_v55 = vpop.xlane.xlu0 %4210  ;;  %v4227_v18 = vsel %vm127_vm0, %v4187_v23, 0.0 }
 0xd55   :  { %v4324_v6 = vmul.f32 0.5, %v4323_v58  ;;  %v4245_v30 = vmul.f32 %v4211_v55, %v8690_v32  ;;  %4228 = vadd.xlane.f32.xlu1 %v4227_v18  ;;  %v4473_v50 = vadd.f32 %v8310_v24, %v4454_v14  ;;  %v4758_v58 = vld [vmem:[%s8590_s12 + $0x40] sm:$0xff]  ;;  %v4757_v14 = vld [vmem:[%s8590_s12 + $0x38] sm:$0xff]  ;;  %v4756_v55 = vld [vmem:[%s8590_s12 + $0x30] sm:$0xff] }
 0xd57   :  { %v4325_v60 = vsub.f32 1.5, %v4324_v6  ;;  %v4261_v31 = vadd.f32 1e-05, %v4245_v30  ;;  %5116 = vmatmul.msk.f32.gmra.mxu1 %vm127_vm0, %v4473_v50  ;;  %v4755_v50 = vld [vmem:[%s8590_s12 + $0x28] sm:$0xff] }
 0xd59   :  { %v4326_v35 = vmul.f32 %v5640_v57, %v4325_v60  ;;  %5641 = vrsqrt.f32 %v4261_v31  ;;  %vm4337_vm12 = vweird.f32 %v4261_v31 }
 0xd5b   :  { %v4330_v15 = vsel %vm4329_vm10, %v5640_v57, %v4326_v35  ;;  %v4760_v57 = vld [vmem:[%s8590_s12 + $0x50] sm:$0xff] }
 0xd5c   :  { %v4436_v34 = vmul.f32 %v4330_v15, %v8250_v39  ;;  %v4136_v12 = vpop.xlane.xlu0 %4135  ;;  %v4754_v15 = vld [vmem:[%s8590_s12 + $0x20] sm:$0xff] }
 0xd5d   :  { %v4156_v17 = vmul.f32 %v4136_v12, %v8690_v32 }
 0xd5e   :  { %v4455_v61 = vmul.f32 %v8303_v2, %v4436_v34 }
 0xd5f   :  { %v5642_v22 = vpop.eup %5641  ;;  %v8379_v26 = vsub.f32 %v8276_v29, %v4156_v17 }
 0xd60   :  { %v4332_v54 = vmul.f32 %v5642_v22, %v4261_v31  ;;  %v4474_v42 = vadd.f32 %v8310_v24, %v4455_v61  ;;  %vm4338_vm11 = vweird.f32 %v5642_v22  ;;  %v4753_v61 = vld [vmem:[%s8590_s12 + $0x18] sm:$0xff] }
 0xd61   :  { %v4188_v43 = vmul.f32 %v8379_v26, %v8379_v26  ;;  %vm4339_vm13 = vmor %vm4337_vm12, %vm4338_vm11 }
 0xd62   :  { %v4333_v9 = vmul.f32 %v5642_v22, %v4332_v54  ;;  %5117 = vmatmul.msk.f32.gmra.mxu1 %vm127_vm0, %v4474_v42  ;;  %v4752_v42 = vld [vmem:[%s8590_s12 + $0x10] sm:$0xff] }
 0xd63   :  { %v4230_v39 = vsel %vm127_vm0, %v4188_v43, 0.0 }
 0xd64   :  { %v4334_v48 = vmul.f32 0.5, %v4333_v9  ;;  %4231 = vadd.xlane.f32.xlu2 %v4230_v39  ;;  %v4751_v39 = vld [vmem:[%s8590_s12 + $0x8] sm:$0xff] }
 0xd66   :  { %v4335_v47 = vsub.f32 1.5, %v4334_v48 }
 0xd68   :  { %v4336_v21 = vmul.f32 %v5642_v22, %v4335_v47 }
 0xd6a   :  { %v4340_v8 = vsel %vm4339_vm13, %v5642_v22, %v4336_v21 }
 0xd6b   :  { %v4437_v59 = vmul.f32 %v4340_v8, %v8267_v20  ;;  %v4763_v20 = vld [vmem:[%s8590_s12 + $0x68] sm:$0xff] }
 0xd6c   :  { %4772 = vmatpush.msra.mxu2 %v4763_v20  ;;  %5136 = vmatpush.msrb.mxu3 %v4763_v20 }
 0xd6d   :  { %v4456_v7 = vmul.f32 %v8303_v2, %v4437_v59  ;;  %v4750_v59 = vld [vmem:[%s8590_s12] sm:$0xff] }
 0xd6e   :  { %4773 = vmatpush.msra.mxu2 %v4762_v52  ;;  %5137 = vmatpush.msrb.mxu3 %v4762_v52 }
 0xd6f   :  { %v4475_v3 = vadd.f32 %v8310_v24, %v4456_v7 }
 0xd70   :  { %4774 = vmatpush.msra.mxu2 %v4761_v16  ;;  %5138 = vmatpush.msrb.mxu3 %v4761_v16 }
 0xd71   :  { %5118 = vmatmul.msk.f32.gmra.mxu1 %vm127_vm0, %v4475_v3 }
 0xd72   :  { %4775 = vmatpush.msra.mxu2 %v4760_v57  ;;  %5139 = vmatpush.msrb.mxu3 %v4760_v57 }
 0xd74   :  { %4776 = vmatpush.msra.mxu2 %v4759_v51  ;;  %5140 = vmatpush.msrb.mxu3 %v4759_v51 }
 0xd76   :  { %4777 = vmatpush.msra.mxu2 %v4758_v58  ;;  %5141 = vmatpush.msrb.mxu3 %v4758_v58 }
 0xd78   :  { %4778 = vmatpush.msra.mxu2 %v4757_v14  ;;  %5142 = vmatpush.msrb.mxu3 %v4757_v14 }
 0xd7a   :  { %4779 = vmatpush.msra.mxu2 %v4756_v55  ;;  %5143 = vmatpush.msrb.mxu3 %v4756_v55 }
 0xd7c   :  { %4780 = vmatpush.msra.mxu2 %v4755_v50  ;;  %5144 = vmatpush.msrb.mxu3 %v4755_v50 }
 0xd7e   :  { %4781 = vmatpush.msra.mxu2 %v4754_v15  ;;  %5145 = vmatpush.msrb.mxu3 %v4754_v15 }
 0xd80   :  { %4782 = vmatpush.msra.mxu2 %v4753_v61  ;;  %5146 = vmatpush.msrb.mxu3 %v4753_v61 }
 0xd82   :  { %4783 = vmatpush.msra.mxu2 %v4752_v42  ;;  %5147 = vmatpush.msrb.mxu3 %v4752_v42 }
 0xd84   :  { %4784 = vmatpush.msra.mxu2 %v4751_v39  ;;  %5148 = vmatpush.msrb.mxu3 %v4751_v39 }
 0xd86   :  { %4785 = vmatpush.msra.mxu2 %v4750_v59  ;;  %5149 = vmatpush.msrb.mxu3 %v4750_v59 }
 0xd9a   :  { %v4214_v4 = vpop.xlane.xlu2 %4213 }
 0xd9b   :  { %v4246_v5 = vmul.f32 %v4214_v4, %v8690_v32 }
 0xd9d   :  { %v4262_v23 = vadd.f32 1e-05, %v4246_v5 }
 0xd9f   :  { %5643 = vrsqrt.f32 %v4262_v23  ;;  %vm4347_vm15 = vweird.f32 %v4262_v23 }
 0xda2   :  { %v4139_v18 = vpop.xlane.xlu2 %4138 }
 0xda3   :  { %v4217_v6 = vpop.xlane.xlu1 %4216  ;;  %v4157_v30 = vmul.f32 %v4139_v18, %v8690_v32 }
 0xda4   :  { %v4247_v60 = vmul.f32 %v4217_v6, %v8690_v32 }
 0xda5   :  { %v5644_v31 = vpop.eup %5643  ;;  %v8427_v35 = vsub.f32 %v8294_v44, %v4157_v30 }
 0xda6   :  { %v4342_v34 = vmul.f32 %v5644_v31, %v4262_v23  ;;  %v4263_v12 = vadd.f32 1e-05, %v4247_v60  ;;  %vm4348_vm14 = vweird.f32 %v5644_v31 }
 0xda7   :  { %v4189_v17 = vmul.f32 %v8427_v35, %v8427_v35  ;;  %vm4349_vm1 = vmor %vm4347_vm15, %vm4348_vm14 }
 0xda8   :  { %v4343_v22 = vmul.f32 %v5644_v31, %v4342_v34  ;;  %5645 = vrsqrt.f32 %v4263_v12  ;;  %vm4357_vm3 = vweird.f32 %v4263_v12 }
 0xda9   :  { %v4233_v54 = vsel %vm127_vm0, %v4189_v17, 0.0 }
 0xdaa   :  { %v4344_v43 = vmul.f32 0.5, %v4343_v22  ;;  %4234 = vadd.xlane.f32.xlu0 %v4233_v54 }
 0xdab   :  { %v4142_v9 = vpop.xlane.xlu1 %4141 }
 0xdac   :  { %v4345_v48 = vsub.f32 1.5, %v4344_v43  ;;  %v4158_v47 = vmul.f32 %v4142_v9, %v8690_v32  ;;  %v4220_v21 = vpop.xlane.xlu0 %4219 }
 0xdad   :  { %v4248_v8 = vmul.f32 %v4220_v21, %v8690_v32 }
 0xdae   :  { %v5646_v7 = vpop.eup %5645  ;;  %v4346_v3 = vmul.f32 %v5644_v31, %v4345_v48  ;;  %v8450_v38 = vsub.f32 %v8323_v62, %v4158_v47 }
 0xdaf   :  { %v4352_v20 = vmul.f32 %v5646_v7, %v4263_v12  ;;  %v4264_v52 = vadd.f32 1e-05, %v4248_v8  ;;  %vm4358_vm2 = vweird.f32 %v5646_v7 }
 0xdb0   :  { %v4350_v16 = vsel %vm4349_vm1, %v5644_v31, %v4346_v3  ;;  %v4190_v57 = vmul.f32 %v8450_v38, %v8450_v38  ;;  %vm4359_vm4 = vmor %vm4357_vm3, %vm4358_vm2 }
 0xdb1   :  { %v4438_v4 = vmul.f32 %v4350_v16, %v8284_v11  ;;  %v4353_v5 = vmul.f32 %v5646_v7, %v4352_v20  ;;  %5647 = vrsqrt.f32 %v4264_v52  ;;  %v4558_v51 = vpop.f32.mrf.mxu1  ;;  %vm4367_vm6 = vweird.f32 %v4264_v52 }
 0xdb2   :  { %v4559_v23 = vadd.f32 %v8455_v25, %v4558_v51  ;;  %v4236_v58 = vsel %vm127_vm0, %v4190_v57, 0.0 }
 0xdb3   :  { %v4354_v14 = vmul.f32 0.5, %v4353_v5  ;;  %4237 = vadd.xlane.f32.xlu1 %v4236_v58  ;;  %v4457_v55 = vmul.f32 %v8303_v2, %v4438_v4 }
 0xdb4   :  { %v4622_v18 = vmul.f32 0.044715, %v4559_v23 }
 0xdb5   :  { %v4355_v6 = vsub.f32 1.5, %v4354_v14  ;;  %v4223_v30 = vpop.xlane.xlu2 %4222  ;;  %v4476_v50 = vadd.f32 %v8310_v24, %v4457_v55 }
 0xdb6   :  { %v4638_v60 = vmul.f32 %v4622_v18, %v4559_v23  ;;  %v4249_v11 = vmul.f32 %v4223_v30, %v8690_v32  ;;  %v4606_v30 = vmul.f32 0.5, %v4559_v23 }
 0xdb7   :  { %v5648_v31 = vpop.eup %5647  ;;  %v4356_v15 = vmul.f32 %v5646_v7, %v4355_v6  ;;  %5119 = vmatmul.msk.f32.gmra.mxu1 %vm127_vm0, %v4476_v50 }
 0xdb8   :  { %v4362_v34 = vmul.f32 %v5648_v31, %v4264_v52  ;;  %v4654_v17 = vmul.f32 %v4638_v60, %v4559_v23  ;;  %v4265_v61 = vadd.f32 1e-05, %v4249_v11  ;;  %vm4368_vm5 = vweird.f32 %v5648_v31 }
 0xdb9   :  { %v4360_v22 = vsel %vm4359_vm4, %v5646_v7, %v4356_v15  ;;  %vm4369_vm7 = vmor %vm4367_vm6, %vm4368_vm5 }
 0xdba   :  { %v4439_v54 = vmul.f32 %v4360_v22, %v8298_v13  ;;  %v4363_v42 = vmul.f32 %v5648_v31, %v4362_v34  ;;  %v4670_v43 = vadd.f32 %v4654_v17, %v4559_v23  ;;  %5649 = vrsqrt.f32 %v4265_v61  ;;  %v4561_v9 = vpop.f32.mrf.mxu1 }
 0xdbb   :  { %v4562_v39 = vadd.f32 %v8455_v25, %v4561_v9  ;;  %vm4377_vm9 = vweird.f32 %v4265_v61 }
 0xdbc   :  { %v4364_v48 = vmul.f32 0.5, %v4363_v42  ;;  %v4686_v47 = vmul.f32 0.7978846, %v4670_v43  ;;  %v4458_v21 = vmul.f32 %v8303_v2, %v4439_v54 }
 0xdbd   :  { %v4623_v12 = vmul.f32 0.044715, %v4562_v39  ;;  %v4226_v8 = vpop.xlane.xlu0 %4225 }
 0xdbe   :  { %v4365_v59 = vsub.f32 1.5, %v4364_v48  ;;  %5651 = vtanh.f32 %v4686_v47  ;;  %v4250_v3 = vmul.f32 %v4226_v8, %v8690_v32  ;;  %v4477_v7 = vadd.f32 %v8310_v24, %v4458_v21 }
 0xdbf   :  { %v4639_v13 = vmul.f32 %v4623_v12, %v4562_v39 }
 0xdc0   :  { %v5650_v20 = vpop.eup %5649  ;;  %v4366_v16 = vmul.f32 %v5648_v31, %v4365_v59  ;;  %v4266_v57 = vadd.f32 1e-05, %v4250_v3  ;;  %5120 = vmatmul.msk.f32.gmra.mxu1 %vm127_vm0, %v4477_v7 }
 0xdc1   :  { %v4372_v4 = vmul.f32 %v5650_v20, %v4265_v61  ;;  %v4655_v5 = vmul.f32 %v4639_v13, %v4562_v39  ;;  %vm4378_vm8 = vweird.f32 %v5650_v20 }
 0xdc2   :  { %v4370_v51 = vsel %vm4369_vm7, %v5648_v31, %v4366_v16  ;;  %5653 = vrsqrt.f32 %v4266_v57  ;;  %vm4379_vm10 = vmor %vm4377_vm9, %vm4378_vm8  ;;  %vm4387_vm12 = vweird.f32 %v4266_v57 }
 0xdc3   :  { %v4440_v58 = vmul.f32 %v4370_v51, %v8327_v41  ;;  %v4373_v14 = vmul.f32 %v5650_v20, %v4372_v4  ;;  %v4564_v55 = vpop.f32.mrf.mxu1  ;;  %v4671_v18 = vadd.f32 %v4655_v5, %v4562_v39  ;;  %v4607_v4 = vmul.f32 0.5, %v4562_v39 }
 0xdc4   :  { %v5652_v6 = vpop.eup %5651  ;;  %v4565_v50 = vadd.f32 %v8455_v25, %v4564_v55 }
 0xdc5   :  { %v4374_v60 = vmul.f32 0.5, %v4373_v14  ;;  %v4459_v52 = vmul.f32 %v8303_v2, %v4440_v58  ;;  %v4718_v11 = vadd.f32 1.0, %v5652_v6  ;;  %v4687_v15 = vmul.f32 0.7978846, %v4671_v18 }
 0xdc6   :  { %v4624_v34 = vmul.f32 0.044715, %v4565_v50 }
 0xdc7   :  { %v4375_v17 = vsub.f32 1.5, %v4374_v60  ;;  %v4478_v31 = vadd.f32 %v8310_v24, %v4459_v52  ;;  %v4734_v22 = vmul.f32 %v4718_v11, %v4606_v30  ;;  %5655 = vtanh.f32 %v4687_v15 }
 0xdc8   :  { %v5654_v41 = vpop.eup %5653  ;;  %v4229_v54 = vpop.xlane.xlu1 %4228  ;;  %v4640_v42 = vmul.f32 %v4624_v34, %v4565_v50 }
 0xdc9   :  { %v4376_v43 = vmul.f32 %v5650_v20, %v4375_v17  ;;  %v4382_v23 = vmul.f32 %v5654_v41, %v4266_v57  ;;  %v4251_v9 = vmul.f32 %v4229_v54, %v8690_v32  ;;  %5121 = vmatmul.msk.f32.gmra.mxu1 %vm127_vm0, %v4478_v31  ;;  %4786 = vmatmul.f32.vlgmr.msra.gmra.mxu2 %v4734_v22  ;;  %vm4388_vm11 = vweird.f32 %v5654_v41 }
 0xdca   :  { %v4656_v48 = vmul.f32 %v4640_v42, %v4565_v50  ;;  %vm4389_vm13 = vmor %vm4387_vm12, %vm4388_vm11  ;;  %v4608_v42 = vmul.f32 0.5, %v4565_v50 }
 0xdcb   :  { %v4380_v47 = vsel %vm4379_vm10, %v5650_v20, %v4376_v43  ;;  %v4383_v21 = vmul.f32 %v5654_v41, %v4382_v23  ;;  %v4267_v12 = vadd.f32 1e-05, %v4251_v9 }
 0xdcc   :  { %v4441_v8 = vmul.f32 %v4380_v47, %v8341_v37  ;;  %v4567_v59 = vpop.f32.mrf.mxu1  ;;  %v4672_v3 = vadd.f32 %v4656_v48, %v4565_v50 }
 0xdcd   :  { %v5656_v7 = vpop.eup %5655  ;;  %v4384_v13 = vmul.f32 0.5, %v4383_v21  ;;  %5657 = vrsqrt.f32 %v4267_v12  ;;  %v4568_v61 = vadd.f32 %v8455_v25, %v4567_v59  ;;  %vm4397_vm15 = vweird.f32 %v4267_v12 }
 0xdce   :  { %v4460_v16 = vmul.f32 %v8303_v2, %v4441_v8  ;;  %v4719_v5 = vadd.f32 1.0, %v5656_v7  ;;  %v4688_v51 = vmul.f32 0.7978846, %v4672_v3 }
 0xdcf   :  { %v4385_v58 = vsub.f32 1.5, %v4384_v13  ;;  %v4625_v14 = vmul.f32 0.044715, %v4568_v61 }
 0xdd0   :  { %v4479_v20 = vadd.f32 %v8310_v24, %v4460_v16  ;;  %v4735_v55 = vmul.f32 %v4719_v5, %v4607_v4  ;;  %5659 = vtanh.f32 %v4688_v51 }
 0xdd1   :  { %v4386_v37 = vmul.f32 %v5654_v41, %v4385_v58  ;;  %v4641_v18 = vmul.f32 %v4625_v14, %v4568_v61  ;;  %v4609_v58 = vmul.f32 0.5, %v4568_v61 }
 0xdd2   :  { %5122 = vmatmul.msk.f32.gmra.mxu1 %vm127_vm0, %v4479_v20  ;;  %4789 = vmatmul.f32.gmra.mxu2 %v4735_v55 }
 0xdd3   :  { %v5658_v6 = vpop.eup %5657  ;;  %v4390_v30 = vsel %vm4389_vm13, %v5654_v41, %v4386_v37  ;;  %v4657_v60 = vmul.f32 %v4641_v18, %v4568_v61 }
 0xdd4   :  { %v4442_v39 = vmul.f32 %v4390_v30, %v8352_v63  ;;  %v4392_v52 = vmul.f32 %v5658_v6, %v4267_v12  ;;  %v4570_v11 = vpop.f32.mrf.mxu1  ;;  %vm4398_vm14 = vweird.f32 %v5658_v6 }
 0xdd5   :  { %v4571_v15 = vadd.f32 %v8455_v25, %v4570_v11  ;;  %v4673_v34 = vadd.f32 %v4657_v60, %v4568_v61  ;;  %vm4399_vm1 = vmor %vm4397_vm15, %vm4398_vm14 }
 0xdd6   :  { %v5660_v17 = vpop.eup %5659  ;;  %v4393_v31 = vmul.f32 %v5658_v6, %v4392_v52  ;;  %v4461_v22 = vmul.f32 %v8303_v2, %v4442_v39 }
 0xdd7   :  { %v4626_v57 = vmul.f32 0.044715, %v4571_v15  ;;  %v4232_v54 = vpop.xlane.xlu2 %4231  ;;  %v4720_v43 = vadd.f32 1.0, %v5660_v17  ;;  %v4689_v23 = vmul.f32 0.7978846, %v4673_v34  ;;  %v4610_v11 = vmul.f32 0.5, %v4571_v15 }
 0xdd8   :  { %v4394_v9 = vmul.f32 0.5, %v4393_v31  ;;  %v4252_v41 = vmul.f32 %v4232_v54, %v8690_v32  ;;  %v4480_v48 = vadd.f32 %v8310_v24, %v4461_v22 }
 0xdd9   :  { %v4736_v63 = vmul.f32 %v4720_v43, %v4608_v42  ;;  %5661 = vtanh.f32 %v4689_v23  ;;  %v4642_v47 = vmul.f32 %v4626_v57, %v4571_v15 }
 0xdda   :  { %v4395_v21 = vsub.f32 1.5, %v4394_v9  ;;  %v4268_v8 = vadd.f32 1e-05, %v4252_v41  ;;  %5123 = vmatmul.msk.f32.gmra.mxu1 %vm127_vm0, %v4480_v48 }
 0xddb   :  { %4792 = vmatmul.f32.gmra.mxu2 %v4736_v63  ;;  %v4658_v59 = vmul.f32 %v4642_v47, %v4571_v15 }
 0xddc   :  { %v4396_v3 = vmul.f32 %v5658_v6, %v4395_v21  ;;  %5663 = vrsqrt.f32 %v4268_v8  ;;  %vm4407_vm3 = vweird.f32 %v4268_v8 }
 0xddd   :  { %v4674_v50 = vadd.f32 %v4658_v59, %v4571_v15 }
 0xdde   :  { %v4400_v7 = vsel %vm4399_vm1, %v5658_v6, %v4396_v3 }
 0xddf   :  { %v5662_v13 = vpop.eup %5661  ;;  %v4443_v16 = vmul.f32 %v4400_v7, %v8365_v27  ;;  %v4573_v4 = vpop.f32.mrf.mxu1  ;;  %v4690_v5 = vmul.f32 0.7978846, %v4674_v50 }
 0xde0   :  { %v4574_v51 = vadd.f32 %v8455_v25, %v4573_v4  ;;  %v4721_v14 = vadd.f32 1.0, %v5662_v13 }
 0xde1   :  { %v4462_v20 = vmul.f32 %v8303_v2, %v4443_v16  ;;  %5665 = vtanh.f32 %v4690_v5 }
 0xde2   :  { %v5664_v55 = vpop.eup %5663  ;;  %v4627_v37 = vmul.f32 0.044715, %v4574_v51  ;;  %v4737_v18 = vmul.f32 %v4721_v14, %v4609_v58  ;;  %v4611_v63 = vmul.f32 0.5, %v4574_v51 }
 0xde3   :  { %v4402_v12 = vmul.f32 %v5664_v55, %v4268_v8  ;;  %v4481_v30 = vadd.f32 %v8310_v24, %v4462_v20  ;;  %vm4408_vm2 = vweird.f32 %v5664_v55 }
 0xde4   :  { %4795 = vmatmul.f32.gmra.mxu2 %v4737_v18  ;;  %v4643_v6 = vmul.f32 %v4627_v37, %v4574_v51  ;;  %vm4409_vm4 = vmor %vm4407_vm3, %vm4408_vm2 }
 0xde5   :  { %v4403_v60 = vmul.f32 %v5664_v55, %v4402_v12  ;;  %5124 = vmatmul.msk.f32.gmra.mxu1 %vm127_vm0, %v4481_v30 }
 0xde6   :  { %v4659_v27 = vmul.f32 %v4643_v6, %v4574_v51 }
 0xde7   :  { %v5666_v39 = vpop.eup %5665  ;;  %v4404_v52 = vmul.f32 0.5, %v4403_v60 }
 0xde8   :  { %v4722_v61 = vadd.f32 1.0, %v5666_v39  ;;  %v4675_v34 = vadd.f32 %v4659_v27, %v4574_v51 }
 0xde9   :  { %v4405_v17 = vsub.f32 1.5, %v4404_v52 }
 0xdea   :  { %v4738_v31 = vmul.f32 %v4722_v61, %v4610_v11  ;;  %v4691_v22 = vmul.f32 0.7978846, %v4675_v34 }
 0xdeb   :  { %v4406_v57 = vmul.f32 %v5664_v55, %v4405_v17 }
 0xdec   :  { %4798 = vmatmul.f32.gmra.mxu2 %v4738_v31  ;;  %5667 = vtanh.f32 %v4691_v22 }
 0xded   :  { %v4410_v54 = vsel %vm4409_vm4, %v5664_v55, %v4406_v57 }
 0xdee   :  { %v4444_v42 = vmul.f32 %v4410_v54, %v8379_v26  ;;  %v4576_v43 = vpop.f32.mrf.mxu1 }
 0xdef   :  { %v4577_v23 = vadd.f32 %v8455_v25, %v4576_v43 }
 0xdf0   :  { %v4463_v9 = vmul.f32 %v8303_v2, %v4444_v42 }
 0xdf1   :  { %v4628_v15 = vmul.f32 0.044715, %v4577_v23  ;;  %v4612_v7 = vmul.f32 0.5, %v4577_v23 }
 0xdf2   :  { %v5668_v41 = vpop.eup %5667  ;;  %v4482_v48 = vadd.f32 %v8310_v24, %v4463_v9 }
 0xdf3   :  { %v4723_v47 = vadd.f32 1.0, %v5668_v41  ;;  %v4644_v21 = vmul.f32 %v4628_v15, %v4577_v23 }
 0xdf4   :  { %5125 = vmatmul.msk.f32.gmra.mxu1 %vm127_vm0, %v4482_v48 }
 0xdf5   :  { %v4739_v8 = vmul.f32 %v4723_v47, %v4611_v63  ;;  %v4660_v59 = vmul.f32 %v4644_v21, %v4577_v23 }
 0xdf7   :  { %4801 = vmatmul.f32.gmra.mxu2 %v4739_v8  ;;  %v4676_v3 = vadd.f32 %v4660_v59, %v4577_v23 }
 0xdf9   :  { %v4692_v50 = vmul.f32 0.7978846, %v4676_v3 }
 0xdfb   :  { %5669 = vtanh.f32 %v4692_v50 }
 0xe01   :  { %v5670_v26 = vpop.eup %5669 }
 0xe02   :  { %v4724_v13 = vadd.f32 1.0, %v5670_v26 }
 0xe04   :  { %v4740_v16 = vmul.f32 %v4724_v13, %v4612_v7 }
 0xe06   :  { %4804 = vmatmul.f32.gmra.mxu2 %v4740_v16 }
 0xe1d   :  { %v4235_v4 = vpop.xlane.xlu0 %4234 }
 0xe1e   :  { %v4253_v5 = vmul.f32 %v4235_v4, %v8690_v32 }
 0xe20   :  { %v4269_v58 = vadd.f32 1e-05, %v4253_v5 }
 0xe22   :  { %5671 = vrsqrt.f32 %v4269_v58  ;;  %vm4417_vm6 = vweird.f32 %v4269_v58 }
 0xe26   :  { %v4238_v51 = vpop.xlane.xlu1 %4237 }
 0xe27   :  { %v4254_v14 = vmul.f32 %v4238_v51, %v8690_v32 }
 0xe28   :  { %v5672_v20 = vpop.eup %5671 }
 0xe29   :  { %v4412_v55 = vmul.f32 %v5672_v20, %v4269_v58  ;;  %v4270_v37 = vadd.f32 1e-05, %v4254_v14  ;;  %vm4418_vm5 = vweird.f32 %v5672_v20 }
 0xe2a   :  { %vm4419_vm7 = vmor %vm4417_vm6, %vm4418_vm5 }
 0xe2b   :  { %v4413_v18 = vmul.f32 %v5672_v20, %v4412_v55  ;;  %5673 = vrsqrt.f32 %v4270_v37  ;;  %vm4427_vm9 = vweird.f32 %v4270_v37 }
 0xe2d   :  { %v4414_v12 = vmul.f32 0.5, %v4413_v18 }
 0xe2f   :  { %v4415_v30 = vsub.f32 1.5, %v4414_v12 }
 0xe31   :  { %v5674_v6 = vpop.eup %5673  ;;  %v4416_v60 = vmul.f32 %v5672_v20, %v4415_v30 }
 0xe32   :  { %v4422_v27 = vmul.f32 %v5674_v6, %v4270_v37  ;;  %vm4428_vm8 = vweird.f32 %v5674_v6 }
 0xe33   :  { %v4420_v39 = vsel %vm4419_vm7, %v5672_v20, %v4416_v60  ;;  %vm4429_vm10 = vmor %vm4427_vm9, %vm4428_vm8 }
 0xe34   :  { %v4445_v52 = vmul.f32 %v4420_v39, %v8427_v35  ;;  %v4423_v11 = vmul.f32 %v5674_v6, %v4422_v27  ;;  %v4579_v61 = vpop.f32.mrf.mxu1 }
 0xe35   :  { %v4580_v32 = vadd.f32 %v8455_v25, %v4579_v61 }
 0xe36   :  { %v4424_v34 = vmul.f32 0.5, %v4423_v11  ;;  %v4464_v17 = vmul.f32 %v8303_v2, %v4445_v52 }
 0xe37   :  { %v4629_v31 = vmul.f32 0.044715, %v4580_v32  ;;  %v4613_v7 = vmul.f32 0.5, %v4580_v32 }
 0xe38   :  { %v4425_v22 = vsub.f32 1.5, %v4424_v34  ;;  %v4483_v57 = vadd.f32 %v8310_v24, %v4464_v17 }
 0xe39   :  { %v4645_v54 = vmul.f32 %v4629_v31, %v4580_v32 }
 0xe3a   :  { %v4426_v42 = vmul.f32 %v5674_v6, %v4425_v22  ;;  %5126 = vmatmul.msk.f32.gmra.mxu1 %vm127_vm0, %v4483_v57 }
 0xe3b   :  { %v4661_v43 = vmul.f32 %v4645_v54, %v4580_v32 }
 0xe3c   :  { %v4430_v35 = vsel %vm4429_vm10, %v5674_v6, %v4426_v42 }
 0xe3d   :  { %v4446_v23 = vmul.f32 %v4430_v35, %v8450_v38  ;;  %v4582_v9 = vpop.f32.mrf.mxu1  ;;  %v4677_v15 = vadd.f32 %v4661_v43, %v4580_v32 }
 0xe3e   :  { %v4583_v41 = vadd.f32 %v8455_v25, %v4582_v9 }
 0xe3f   :  { %v4465_v48 = vmul.f32 %v8303_v2, %v4446_v23  ;;  %v4693_v63 = vmul.f32 0.7978846, %v4677_v15  ;;  %v8516_v2 = vld [vmem:[%s8591_s13] ss:$0 sm:$0xff]  ;;  %s5857_s13 = smov [#allocation10]  }
 0xe40   :  { %v4630_v47 = vmul.f32 0.044715, %v4583_v41  ;;  %v4614_v30 = vmul.f32 0.5, %v4583_v41  ;;  %s4871_s7 = sshll.u32 %s5857_s13, 4  ;;  %s4872_s7 = int_to_ptr.vmem [resolvable:$true] %s4871_s7 }
 0xe41   :  { %v4484_v21 = vadd.f32 %v8310_v24, %v4465_v48  ;;  %5675 = vtanh.f32 %v4693_v63 }
 0xe42   :  { %v4646_v8 = vmul.f32 %v4630_v47, %v4583_v41 }
 0xe43   :  { %5127 = vmatmul.msk.f32.gmra.mxu1 %vm127_vm0, %v4484_v21 }
 0xe44   :  { %v4662_v59 = vmul.f32 %v4646_v8, %v4583_v41 }
 0xe46   :  { %v4585_v3 = vpop.f32.mrf.mxu1  ;;  %v4678_v50 = vadd.f32 %v4662_v59, %v4583_v41 }
 0xe47   :  { %v5676_v26 = vpop.eup %5675  ;;  %v4586_v38 = vadd.f32 %v8455_v25, %v4585_v3 }
 0xe48   :  { %v4725_v13 = vadd.f32 1.0, %v5676_v26  ;;  %v4694_v16 = vmul.f32 0.7978846, %v4678_v50 }
 0xe49   :  { %v4631_v4 = vmul.f32 0.044715, %v4586_v38  ;;  %v4615_v54 = vmul.f32 0.5, %v4586_v38 }
 0xe4a   :  { %v4741_v24 = vmul.f32 %v4725_v13, %v4613_v7  ;;  %5677 = vtanh.f32 %v4694_v16 }
 0xe4b   :  { %v4647_v5 = vmul.f32 %v4631_v4, %v4586_v38 }
 0xe4c   :  { %v4787_v58 = vpop.f32.mrf.mxu2  ;;  %4807 = vmatmul.f32.gmra.mxu2 %v4741_v24 }
 0xe4d   :  { %v4788_v51 = vadd.f32 %v8516_v2, %v4787_v58  ;;  %v4663_v14 = vmul.f32 %v4647_v5, %v4586_v38 }
 0xe4f   :  { %v4835_v20 = vadd.f32 %v4788_v51, %v8103_v45  ;;  %v4588_v55 = vpop.f32.mrf.mxu1  ;;  %v4679_v37 = vadd.f32 %v4663_v14, %v4586_v38 }
 0xe50   :  { %v5678_v18 = vpop.eup %5677  ;;  %v4589_v12 = vadd.f32 %v8455_v25, %v4588_v55 }
 0xe51   :  { %4851 = vst.msk [vmem:[#allocation10] sm:$0xff] %vm127_vm0, %v4835_v20  ;;  %v4726_v6 = vadd.f32 1.0, %v5678_v18  ;;  %v4695_v60 = vmul.f32 0.7978846, %v4679_v37 }
 0xe52   :  { %v4632_v27 = vmul.f32 0.044715, %v4589_v12  ;;  %v4616_v59 = vmul.f32 0.5, %v4589_v12 }
 0xe53   :  { %v4742_v39 = vmul.f32 %v4726_v6, %v4614_v30  ;;  %5679 = vtanh.f32 %v4695_v60 }
 0xe54   :  { %v4648_v52 = vmul.f32 %v4632_v27, %v4589_v12 }
 0xe55   :  { %v4790_v11 = vpop.f32.mrf.mxu2  ;;  %4810 = vmatmul.f32.gmra.mxu2 %v4742_v39 }
 0xe56   :  { %v4791_v61 = vadd.f32 %v8516_v2, %v4790_v11  ;;  %v4664_v32 = vmul.f32 %v4648_v52, %v4589_v12 }
 0xe57   :  { %v4591_v45 = vpop.f32.mrf.mxu1 }
 0xe58   :  { %v4836_v34 = vadd.f32 %v4791_v61, %v8118_v0  ;;  %v4592_v17 = vadd.f32 %v8455_v25, %v4591_v45  ;;  %v4680_v31 = vadd.f32 %v4664_v32, %v4589_v12 }
 0xe59   :  { %v5680_v22 = vpop.eup %5679 }
 0xe5a   :  { %4852 = vst.msk [vmem:[#allocation10 + $0x8] sm:$0xff] %vm127_vm0, %v4836_v34  ;;  %v4633_v57 = vmul.f32 0.044715, %v4592_v17  ;;  %v4727_v42 = vadd.f32 1.0, %v5680_v22  ;;  %v4696_v43 = vmul.f32 0.7978846, %v4680_v31 }
 0xe5b   :  { %v4617_v24 = vmul.f32 0.5, %v4592_v17 }
 0xe5c   :  { %v4649_v35 = vmul.f32 %v4633_v57, %v4592_v17  ;;  %v4743_v23 = vmul.f32 %v4727_v42, %v4615_v54  ;;  %5681 = vtanh.f32 %v4696_v43 }
 0xe5e   :  { %v4665_v9 = vmul.f32 %v4649_v35, %v4592_v17  ;;  %v4793_v15 = vpop.f32.mrf.mxu2  ;;  %4813 = vmatmul.f32.gmra.mxu2 %v4743_v23 }
 0xe5f   :  { %v4794_v41 = vadd.f32 %v8516_v2, %v4793_v15 }
 0xe60   :  { %v4681_v48 = vadd.f32 %v4665_v9, %v4592_v17 }
 0xe61   :  { %v4837_v0 = vadd.f32 %v4794_v41, %v8131_v56 }
 0xe62   :  { %v4697_v63 = vmul.f32 0.7978846, %v4681_v48  ;;  %v4594_v47 = vpop.f32.mrf.mxu1  ;;  %v5682_v21 = vpop.eup %5681 }
 0xe63   :  { %4853 = vst.msk [vmem:[#allocation10 + $0x10] sm:$0xff] %vm127_vm0, %v4837_v0  ;;  %v4595_v8 = vadd.f32 %v8455_v25, %v4594_v47  ;;  %v4728_v3 = vadd.f32 1.0, %v5682_v21 }
 0xe64   :  { %5683 = vtanh.f32 %v4697_v63 }
 0xe65   :  { %v4634_v50 = vmul.f32 0.044715, %v4595_v8  ;;  %v4744_v26 = vmul.f32 %v4728_v3, %v4616_v59  ;;  %v4618_v6 = vmul.f32 0.5, %v4595_v8 }
 0xe67   :  { %v4796_v38 = vpop.f32.mrf.mxu2  ;;  %v4650_v7 = vmul.f32 %v4634_v50, %v4595_v8  ;;  %4816 = vmatmul.f32.gmra.mxu2 %v4744_v26 }
 0xe68   :  { %v4797_v13 = vadd.f32 %v8516_v2, %v4796_v38 }
 0xe69   :  { %v4666_v16 = vmul.f32 %v4650_v7, %v4595_v8 }
 0xe6a   :  { %v5684_v4 = vpop.eup %5683  ;;  %v4838_v56 = vadd.f32 %v4797_v13, %v8144_v10 }
 0xe6b   :  { %v4729_v5 = vadd.f32 1.0, %v5684_v4  ;;  %v4682_v58 = vadd.f32 %v4666_v16, %v4595_v8 }
 0xe6c   :  { %4854 = vst.msk [vmem:[#allocation10 + $0x18] sm:$0xff] %vm127_vm0, %v4838_v56 }
 0xe6d   :  { %v4745_v51 = vmul.f32 %v4729_v5, %v4617_v24  ;;  %v4698_v14 = vmul.f32 0.7978846, %v4682_v58 }
 0xe6f   :  { %v4799_v20 = vpop.f32.mrf.mxu2  ;;  %4819 = vmatmul.f32.vlgmr.msrb.gmra.mxu3 %v4745_v51  ;;  %5685 = vtanh.f32 %v4698_v14 }
 0xe70   :  { %v4800_v55 = vadd.f32 %v8516_v2, %v4799_v20 }
 0xe71   :  { %v4597_v37 = vpop.f32.mrf.mxu1 }
 0xe72   :  { %v4839_v18 = vadd.f32 %v4800_v55, %v8155_v19  ;;  %v4598_v12 = vadd.f32 %v8455_v25, %v4597_v37 }
 0xe74   :  { %4855 = vst.msk [vmem:[#allocation10 + $0x20] sm:$0xff] %vm127_vm0, %v4839_v18  ;;  %v4635_v10 = vmul.f32 0.044715, %v4598_v12  ;;  %v4619_v17 = vmul.f32 0.5, %v4598_v12 }
 0xe75   :  { %v5686_v30 = vpop.eup %5685 }
 0xe76   :  { %v4730_v60 = vadd.f32 1.0, %v5686_v30  ;;  %v4651_v27 = vmul.f32 %v4635_v10, %v4598_v12 }
 0xe78   :  { %v4746_v39 = vmul.f32 %v4730_v60, %v4618_v6  ;;  %v4667_v52 = vmul.f32 %v4651_v27, %v4598_v12 }
 0xe7a   :  { %v4802_v11 = vpop.f32.mrf.mxu2  ;;  %4822 = vmatmul.f32.gmra.mxu3 %v4746_v39  ;;  %v4683_v61 = vadd.f32 %v4667_v52, %v4598_v12 }
 0xe7b   :  { %v4803_v32 = vadd.f32 %v8516_v2, %v4802_v11 }
 0xe7c   :  { %v4699_v45 = vmul.f32 0.7978846, %v4683_v61 }
 0xe7d   :  { %v4840_v34 = vadd.f32 %v4803_v32, %v8163_v33 }
 0xe7e   :  { %5687 = vtanh.f32 %v4699_v45 }
 0xe7f   :  { %4856 = vst.msk [vmem:[#allocation10 + $0x28] sm:$0xff] %vm127_vm0, %v4840_v34 }
 0xe84   :  { %v5688_v19 = vpop.eup %5687 }
 0xe85   :  { %v4731_v31 = vadd.f32 1.0, %v5688_v19 }
 0xe87   :  { %v4747_v22 = vmul.f32 %v4731_v31, %v4619_v17 }
 0xe89   :  { %v4805_v57 = vpop.f32.mrf.mxu2  ;;  %4825 = vmatmul.f32.gmra.mxu3 %v4747_v22 }
 0xe8a   :  { %v4806_v54 = vadd.f32 %v8516_v2, %v4805_v57 }
 0xe8c   :  { %v4841_v42 = vadd.f32 %v4806_v54, %v8171_v36 }
 0xe8e   :  { %4857 = vst.msk [vmem:[#allocation10 + $0x30] sm:$0xff] %vm127_vm0, %v4841_v42 }
 0xeb7   :  { %v4600_v43 = vpop.f32.mrf.mxu1 }
 0xeb8   :  { %v4601_v35 = vadd.f32 %v8455_v25, %v4600_v43 }
 0xeba   :  { %v4636_v23 = vmul.f32 0.044715, %v4601_v35  ;;  %v4620_v36 = vmul.f32 0.5, %v4601_v35 }
 0xebc   :  { %v4652_v33 = vmul.f32 %v4636_v23, %v4601_v35 }
 0xebe   :  { %v4668_v9 = vmul.f32 %v4652_v33, %v4601_v35 }
 0xec0   :  { %v4603_v15 = vpop.f32.mrf.mxu1  ;;  %v4684_v41 = vadd.f32 %v4668_v9, %v4601_v35 }
 0xec1   :  { %v4604_v48 = vadd.f32 %v8455_v25, %v4603_v15 }
 0xec2   :  { %v4700_v0 = vmul.f32 0.7978846, %v4684_v41 }
 0xec3   :  { %v4637_v63 = vmul.f32 0.044715, %v4604_v48  ;;  %v4621_v25 = vmul.f32 0.5, %v4604_v48 }
 0xec4   :  { %5689 = vtanh.f32 %v4700_v0 }
 0xec5   :  { %v4653_v47 = vmul.f32 %v4637_v63, %v4604_v48 }
 0xec7   :  { %v4669_v21 = vmul.f32 %v4653_v47, %v4604_v48 }
 0xec9   :  { %v4685_v8 = vadd.f32 %v4669_v21, %v4604_v48 }
 0xeca   :  { %v5690_v59 = vpop.eup %5689 }
 0xecb   :  { %v4732_v3 = vadd.f32 1.0, %v5690_v59  ;;  %v4701_v50 = vmul.f32 0.7978846, %v4685_v8 }
 0xecd   :  { %v4748_v26 = vmul.f32 %v4732_v3, %v4620_v36  ;;  %5691 = vtanh.f32 %v4701_v50 }
 0xecf   :  { %v4808_v38 = vpop.f32.mrf.mxu2  ;;  %4828 = vmatmul.f32.gmra.mxu3 %v4748_v26 }
 0xed0   :  { %v4809_v7 = vadd.f32 %v8516_v2, %v4808_v38 }
 0xed2   :  { %v4842_v13 = vadd.f32 %v4809_v7, %v8187_v49 }
 0xed3   :  { %v5692_v16 = vpop.eup %5691 }
 0xed4   :  { %4858 = vst.msk [vmem:[#allocation10 + $0x38] sm:$0xff] %vm127_vm0, %v4842_v13  ;;  %v4733_v4 = vadd.f32 1.0, %v5692_v16 }
 0xed6   :  { %v4749_v56 = vmul.f32 %v4733_v4, %v4621_v25 }
 0xed8   :  { %v4811_v24 = vpop.f32.mrf.mxu2  ;;  %4831 = vmatmul.f32.gmra.mxu3 %v4749_v56 }
 0xed9   :  { %v4812_v5 = vadd.f32 %v8516_v2, %v4811_v24 }
 0xedb   :  { %v4843_v58 = vadd.f32 %v4812_v5, %v8202_v40 }
 0xedd   :  { %4859 = vst.msk [vmem:[#allocation10 + $0x40] sm:$0xff] %vm127_vm0, %v4843_v58 }
 0xee1   :  { %v4814_v51 = vpop.f32.mrf.mxu2 }
 0xee2   :  { %v4815_v14 = vadd.f32 %v8516_v2, %v4814_v51 }
 0xee4   :  { %v4844_v20 = vadd.f32 %v4815_v14, %v8217_v28 }
 0xee6   :  { %4860 = vst.msk [vmem:[#allocation10 + $0x48] sm:$0xff] %vm127_vm0, %v4844_v20 }
 0xeea   :  { %v4817_v49 = vpop.f32.mrf.mxu2 }
 0xeeb   :  { %v4818_v55 = vadd.f32 %v8516_v2, %v4817_v49 }
 0xeed   :  { %v4845_v37 = vadd.f32 %v4818_v55, %v8232_v53 }
 0xeef   :  { %4861 = vst.msk [vmem:[#allocation10 + $0x50] sm:$0xff] %vm127_vm0, %v4845_v37 }
 0xef2   :  { %v4820_v18 = vpop.f32.mrf.mxu3 }
 0xef3   :  { %v4821_v12 = vadd.f32 %v8516_v2, %v4820_v18 }
 0xef5   :  { %v4846_v40 = vadd.f32 %v4821_v12, %v8246_v46 }
 0xef7   :  { %4862 = vst.msk [vmem:[#allocation10 + $0x58] sm:$0xff] %vm127_vm0, %v4846_v40 }
 0xefd   :  { %v4823_v10 = vpop.f32.mrf.mxu3 }
 0xefe   :  { %v4824_v30 = vadd.f32 %v8516_v2, %v4823_v10 }
 0xf00   :  { %v4847_v28 = vadd.f32 %v4824_v30, %v8261_v1 }
 0xf02   :  { %4863 = vst.msk [vmem:[#allocation10 + $0x60] sm:$0xff] %vm127_vm0, %v4847_v28 }
 0xf0c   :  { %v4826_v6 = vpop.f32.mrf.mxu3 }
 0xf0d   :  { %v4827_v60 = vadd.f32 %v8516_v2, %v4826_v6 }
 0xf0f   :  { %v4848_v53 = vadd.f32 %v4827_v60, %v8276_v29 }
 0xf11   :  { %4864 = vst.msk [vmem:[#allocation10 + $0x68] sm:$0xff] %vm127_vm0, %v4848_v53 }
 0xf52   :  { %v4829_v27 = vpop.f32.mrf.mxu3 }
 0xf53   :  { %v4830_v39 = vadd.f32 %v8516_v2, %v4829_v27 }
 0xf55   :  { %v4849_v46 = vadd.f32 %v4830_v39, %v8294_v44 }
 0xf57   :  { %4865 = vst.msk [vmem:[#allocation10 + $0x70] sm:$0xff] %vm127_vm0, %v4849_v46 }
 0xf5b   :  { %v4832_v52 = vpop.f32.mrf.mxu3 }
 0xf5c   :  { %v4833_v1 = vadd.f32 %v8516_v2, %v4832_v52 }
 0xf5e   :  { %v4850_v29 = vadd.f32 %v4833_v1, %v8323_v62 }
 0xf60   :  { %4866 = vst.msk [vmem:[#allocation10 + $0x78] sm:$0xff] %vm127_vm0, %v4850_v29 }
 0xf61   :  { %4879 = dma.vmem_to_hbm [thread:$0]  %s4872_s7, 2048, %s4874_s18, [#allocation4], %s5838_s21, %s5838_s21, %s5839_s22  }
 0xf62   :  { %5835 = dma.done.wait [#allocation4], 2048  }
 0xf63   :  { %5836 = vsyncadd [#allocation4], 4294965248 }
 0xf64   :  { %4884 = vsyncpa [#allocation3], 1 }
 0xf65   :  { %4885 = vsyncpa [#allocation6], 1 }
 0xf66   :  { %4886 = vsyncpa [#allocation9], 1 }
 0xf67   :  { %4887 = vsyncpa [#allocation4], 1 }

</bundles_post_ra>
